<compile_context>
chip_gen: v6e
topology: v6e:2x2x1
jax: 0.10.0
libtpu: 0.0.40
codegen_flags: <defaults>
</compile_context>

<pallas_src>
import functools
import math

import jax
import jax.numpy as jnp
from jax.experimental import pallas as pl
from jax.experimental.pallas import tpu as pltpu

# ----------------------------- config (small) -----------------------------
BATCH = 2
SEQ = 8
HIDDEN = 32
NUM_HEADS = 4
HEAD_DIM = HIDDEN // NUM_HEADS
INTERMEDIATE = 64
NUM_LAYERS = 2
VOCAB = 100
MAX_POS = 16
TYPE_VOCAB = 2
LN_EPS = 1e-12          # BERT default
VEC_W = 3 * HIDDEN      # width of the packed bias/LN slab (>= INTERMEDIATE)


# ------------------------------ kernel utils ------------------------------
def _layernorm(x, g, b, eps=LN_EPS):
    mu = jnp.mean(x, axis=-1, keepdims=True)
    xc = x - mu
    var = jnp.mean(xc * xc, axis=-1, keepdims=True)
    return xc * jax.lax.rsqrt(var + eps) * g + b


def _gelu(x):
    # TODO(synk): HF BERT uses exact (erf) GELU; tanh approximation kept for
    # guaranteed Mosaic lowering (~1e-3 relative difference).
    c = math.sqrt(2.0 / math.pi)
    return 0.5 * x * (1.0 + jnp.tanh(c * (x + 0.044715 * x * x * x)))


def _mm(a, b):
    # MXU matmul: bf16 operands, f32 accumulation.
    return jnp.dot(a.astype(jnp.bfloat16), b.astype(jnp.bfloat16),
                   preferred_element_type=jnp.float32)


# --------------------------- fused encoder kernel ---------------------------
def fused_encoder_kernel(x_ref, mbias_ref, embln_ref,
                         wqkv_ref, wo_ref, w1_ref, w2_ref, vec_ref, o_ref):
    B, S, H, I = BATCH, SEQ, HIDDEN, INTERMEDIATE
    HD, NH = HEAD_DIM, NUM_HEADS
    R = B * S
    scale = 1.0 / math.sqrt(HD)

    # Fold batch into rows: projections / FFN / LayerNorms run once on the
    # (B*S, H) slab (double sublane occupancy, half the small-op count).
    x = x_ref[...].reshape(R, H)                    # (B*S, H) f32 embeddings
    embln = embln_ref[...]                          # (2, H)
    x = _layernorm(x, embln[0:1, :], embln[1:2, :])

    # Additive key-mask bias per batch element, broadcast to (S, S) ONCE and
    # hoisted out of the layer/head loops (f32 keeps -1e9 masking exact).
    mbias = [jnp.broadcast_to(mbias_ref[b], (S, S)) for b in range(B)]

    for l in range(NUM_LAYERS):                     # static unroll, weights VMEM
        vecs = vec_ref[l]                           # (8, 3H) packed bias/LN slab
        b_qkv = vecs[0:1, :]                        # (1, 3H)
        bo    = vecs[1:2, :H]
        ln1g  = vecs[2:3, :H]
        ln1b  = vecs[3:4, :H]
        b1    = vecs[4:5, :I]
        b2    = vecs[5:6, :H]
        ln2g  = vecs[6:7, :H]
        ln2b  = vecs[7:8, :H]
        wo = wo_ref[l]                              # (H, H) bf16

        # ---- self attention: fused QKV projection over all B*S rows ----
        qkv = _mm(x, wqkv_ref[l]) + b_qkv           # (R, 3H) f32
        qkv_b = qkv.astype(jnp.bfloat16)            # single bf16 cast per layer

        attn_rows = []
        for b in range(B):                          # tiny static loops
            r0 = b * S
            attn_b = None
            for h in range(NH):
                lo = h * HD
                qh = qkv_b[r0:r0 + S, lo:lo + HD]
                kh = qkv_b[r0:r0 + S, H + lo:H + lo + HD]
                vh = qkv_b[r0:r0 + S, 2 * H + lo:2 * H + lo + HD]
                # q @ k^T without explicit transpose (contract last dims).
                s = jax.lax.dot_general(
                    qh, kh, (((1,), (1,)), ((), ())),
                    preferred_element_type=jnp.float32) * scale
                s = s + mbias[b]                    # masking stays in f32
                m = jnp.max(s, axis=-1, keepdims=True)
                e = jnp.exp(s - m)
                p = e * pl.reciprocal(jnp.sum(e, axis=-1, keepdims=True),
                                      approx=True)
                ctx_h = jnp.dot(p.astype(jnp.bfloat16), vh,
                                preferred_element_type=jnp.float32)
                # Fuse this head's slice of the output projection (sublane
                # row-slice of Wo) and accumulate in f32 — no ctx scratch,
                # no lane-offset masked stores.
                contrib = jnp.dot(ctx_h.astype(jnp.bfloat16),
                                  wo[lo:lo + HD, :],
                                  preferred_element_type=jnp.float32)
                attn_b = contrib if attn_b is None else attn_b + contrib
            attn_rows.append(attn_b)
        attn = jnp.concatenate(attn_rows, axis=0)   # (R, H)

        h1 = _layernorm(x + attn + bo, ln1g, ln1b)

        if l == NUM_LAYERS - 1:
            # Only the CLS rows feed the output: restrict the last layer's
            # FFN + LayerNorm (the largest matmuls here) to those B rows.
            h1 = jnp.concatenate(
                [h1[b * S:b * S + 1, :] for b in range(B)], axis=0)  # (B, H)

        # ---- feed-forward ----
        ff = _mm(h1, w1_ref[l]) + b1
        ff = _gelu(ff)
        ff = _mm(ff, w2_ref[l]) + b2
        x = _layernorm(h1 + ff, ln2g, ln2b)

    o_ref[...] = x                                  # (B, H) CLS embeddings


def fused_encoder(emb, mask_bias, params):
    B, S, H = emb.shape
    L, I = NUM_LAYERS, INTERMEDIATE
    whole = lambda *shape: pl.BlockSpec(shape, lambda i: (0,) * len(shape))
    return pl.pallas_call(
        fused_encoder_kernel,
        out_shape=jax.ShapeDtypeStruct((B, H), jnp.float32),
        grid=(1,),                                  # single step, batch folded
        in_specs=[
            whole(B, S, H),                         # embeddings (whole batch)
            whole(B, 1, S),                         # additive mask bias
            whole(2, H),                            # emb LN gamma/beta
            whole(L, H, 3 * H),                     # fused QKV weights
            whole(L, H, H),                         # attn output weights
            whole(L, H, I),                         # FFN w1
            whole(L, I, H),                         # FFN w2
            whole(L, 8, VEC_W),                     # packed bias/LN slab
        ],
        out_specs=whole(B, H),
        compiler_params=pltpu.CompilerParams(
            dimension_semantics=("arbitrary",)),
    )(emb, mask_bias, params["emb_ln"], params["w_qkv"], params["w_o"],
      params["w_1"], params["w_2"], params["vecs"])


# ------------------------------ parameters ------------------------------
def init_params(key):
    # TODO(synk): real HFEncoder loads pretrained weights via
    # AutoModel.from_pretrained; here deterministic random BERT-style weights.
    def normal(k, shape, scale=0.02):
        return scale * jax.random.normal(k, shape, dtype=jnp.float32)

    keys = jax.random.split(key, 3 + NUM_LAYERS)
    params = {
        "word_emb": normal(keys[0], (VOCAB, HIDDEN)),
        "pos_emb": normal(keys[1], (MAX_POS, HIDDEN)),
        "type_emb": normal(keys[2], (TYPE_VOCAB, HIDDEN)),
        "emb_ln": jnp.stack([jnp.ones(HIDDEN), jnp.zeros(HIDDEN)]
                            ).astype(jnp.float32),            # (2, H)
    }

    def pad_vec(v):
        return jnp.pad(v, (0, VEC_W - v.shape[0]))

    w_qkv, w_o, w_1, w_2, vecs = [], [], [], [], []
    for l in range(NUM_LAYERS):
        lk = jax.random.split(keys[3 + l], 6)
        wq = normal(lk[0], (HIDDEN, HIDDEN))
        wk = normal(lk[1], (HIDDEN, HIDDEN))
        wv = normal(lk[2], (HIDDEN, HIDDEN))
        wo = normal(lk[3], (HIDDEN, HIDDEN))
        w1 = normal(lk[4], (HIDDEN, INTERMEDIATE))
        w2 = normal(lk[5], (INTERMEDIATE, HIDDEN))
        w_qkv.append(jnp.concatenate([wq, wk, wv], axis=1))   # (H, 3H)
        w_o.append(wo)
        w_1.append(w1)
        w_2.append(w2)
        vecs.append(jnp.stack([
            jnp.zeros(VEC_W),                    # fused QKV bias
            pad_vec(jnp.zeros(HIDDEN)),          # attn output bias
            pad_vec(jnp.ones(HIDDEN)),           # ln1 gamma
            pad_vec(jnp.zeros(HIDDEN)),          # ln1 beta
            pad_vec(jnp.zeros(INTERMEDIATE)),    # FFN bias 1
            pad_vec(jnp.zeros(HIDDEN)),          # FFN bias 2
            pad_vec(jnp.ones(HIDDEN)),           # ln2 gamma
            pad_vec(jnp.zeros(HIDDEN)),          # ln2 beta
        ]).astype(jnp.float32))                  # (8, 3H)

    # Weights stored bf16 (MXU-native operands); vectors stay f32.
    params["w_qkv"] = jnp.stack(w_qkv).astype(jnp.bfloat16)
    params["w_o"] = jnp.stack(w_o).astype(jnp.bfloat16)
    params["w_1"] = jnp.stack(w_1).astype(jnp.bfloat16)
    params["w_2"] = jnp.stack(w_2).astype(jnp.bfloat16)
    params["vecs"] = jnp.stack(vecs)
    return params


# ------------------------------ forward pass ------------------------------
@functools.partial(jax.jit, static_argnames=())
def hf_encoder_forward(input_ids, attention_mask, params):
    """Equivalent of HFEncoder.forward: returns last_hidden_state[:, 0, :]."""
    B, S = input_ids.shape
    # Embedding gathers are plain-JAX glue; everything after runs in one kernel.
    emb = (params["word_emb"][input_ids]
           + params["pos_emb"][jnp.arange(S)][None, :, :]
           + params["type_emb"][0][None, None, :])
    mask_bias = ((1.0 - attention_mask.astype(jnp.float32))
                 * (-1e9)).reshape(B, 1, S)
    return fused_encoder(emb, mask_bias, params)    # (B, H) CLS


# ----------------------------------- main -----------------------------------
if __name__ == "__main__":
    key = jax.random.PRNGKey(0)
    pkey, ikey = jax.random.split(key)
    params = init_params(pkey)

    input_ids = jax.random.randint(ikey, (BATCH, SEQ), 0, VOCAB, dtype=jnp.int32)
    attention_mask = jnp.ones((BATCH, SEQ), dtype=jnp.int32)
    attention_mask = attention_mask.at[1, -2:].set(0)   # exercise key masking

    cls = hf_encoder_forward(input_ids, attention_mask, params)
    jax.block_until_ready(cls)
    assert cls.shape == (BATCH, HIDDEN) and cls.dtype == jnp.float32
    assert bool(jnp.all(jnp.isfinite(cls)))
    print("KERNEL_OK")
</pallas_src>

<mosaic_0001>
module attributes {stable_mosaic.version = 11 : i64} {
  func.func @fused_encoder_kernel(%arg0: i32, %arg1: memref<2x8x32xf32, #tpu.memory_space<vmem>>, %arg2: memref<2x1x8xf32, #tpu.memory_space<vmem>>, %arg3: memref<2x32xf32, #tpu.memory_space<vmem>>, %arg4: memref<2x32x96xbf16, #tpu.memory_space<vmem>>, %arg5: memref<2x32x32xbf16, #tpu.memory_space<vmem>>, %arg6: memref<2x32x64xbf16, #tpu.memory_space<vmem>>, %arg7: memref<2x64x32xbf16, #tpu.memory_space<vmem>>, %arg8: memref<2x8x96xf32, #tpu.memory_space<vmem>>, %arg9: memref<2x32xf32, #tpu.memory_space<vmem>>) attributes {dimension_semantics = [#tpu.dimension_semantics<arbitrary>], iteration_bounds = array<i64: 1>, scalar_prefetch = 0 : i64, scratch_operands = 0 : i64, tpu.core_type = #tpu.core_type<tc>, window_params = [{pipeline_mode = #tpu.pipeline_mode<synchronous>, transform_indices = @transform_0, window_bounds = array<i64: 2, 8, 32>}, {pipeline_mode = #tpu.pipeline_mode<synchronous>, transform_indices = @transform_1, window_bounds = array<i64: 2, 1, 8>}, {pipeline_mode = #tpu.pipeline_mode<synchronous>, transform_indices = @transform_2, window_bounds = array<i64: 2, 32>}, {pipeline_mode = #tpu.pipeline_mode<synchronous>, transform_indices = @transform_3, window_bounds = array<i64: 2, 32, 96>}, {pipeline_mode = #tpu.pipeline_mode<synchronous>, transform_indices = @transform_4, window_bounds = array<i64: 2, 32, 32>}, {pipeline_mode = #tpu.pipeline_mode<synchronous>, transform_indices = @transform_5, window_bounds = array<i64: 2, 32, 64>}, {pipeline_mode = #tpu.pipeline_mode<synchronous>, transform_indices = @transform_6, window_bounds = array<i64: 2, 64, 32>}, {pipeline_mode = #tpu.pipeline_mode<synchronous>, transform_indices = @transform_7, window_bounds = array<i64: 2, 8, 96>}, {pipeline_mode = #tpu.pipeline_mode<synchronous>, transform_indices = @transform_8, window_bounds = array<i64: 2, 32>}]} {
    %c0 = arith.constant 0 : index
    %c0_0 = arith.constant 0 : index
    %c0_1 = arith.constant 0 : index
    %0 = vector.load %arg1[%c0, %c0_0, %c0_1] : memref<2x8x32xf32, #tpu.memory_space<vmem>>, vector<2x8x32xf32>
    %1 = vector.shape_cast %0 : vector<2x8x32xf32> to vector<16x32xf32>
    %c0_2 = arith.constant 0 : index
    %c0_3 = arith.constant 0 : index
    %2 = vector.load %arg3[%c0_2, %c0_3] : memref<2x32xf32, #tpu.memory_space<vmem>>, vector<2x32xf32>
    %3 = vector.extract_strided_slice %2 {offsets = [0, 0], sizes = [1, 32], strides = [1, 1]} : vector<2x32xf32> to vector<1x32xf32>
    %4 = vector.extract_strided_slice %2 {offsets = [1, 0], sizes = [1, 32], strides = [1, 1]} : vector<2x32xf32> to vector<1x32xf32>
    %cst = arith.constant dense<0.000000e+00> : vector<16xf32>
    %5 = vector.multi_reduction <add>, %1, %cst [1] : vector<16x32xf32> to vector<16xf32>
    %6 = vector.shape_cast %5 : vector<16xf32> to vector<16x1xf32>
    %cst_4 = arith.constant 3.200000e+01 : f32
    %7 = vector.broadcast %cst_4 : f32 to vector<16x1xf32>
    %8 = arith.divf %6, %7 : vector<16x1xf32>
    %9 = vector.broadcast %8 : vector<16x1xf32> to vector<16x32xf32>
    %10 = arith.subf %1, %9 : vector<16x32xf32>
    %11 = arith.mulf %10, %10 : vector<16x32xf32>
    %cst_5 = arith.constant dense<0.000000e+00> : vector<16xf32>
    %12 = vector.multi_reduction <add>, %11, %cst_5 [1] : vector<16x32xf32> to vector<16xf32>
    %13 = vector.shape_cast %12 : vector<16xf32> to vector<16x1xf32>
    %cst_6 = arith.constant 3.200000e+01 : f32
    %14 = vector.broadcast %cst_6 : f32 to vector<16x1xf32>
    %15 = arith.divf %13, %14 : vector<16x1xf32>
    %cst_7 = arith.constant 9.99999996E-13 : f32
    %16 = vector.broadcast %cst_7 : f32 to vector<16x1xf32>
    %17 = arith.addf %15, %16 : vector<16x1xf32>
    %18 = math.rsqrt %17 : vector<16x1xf32>
    %19 = vector.broadcast %18 : vector<16x1xf32> to vector<16x32xf32>
    %20 = arith.mulf %10, %19 : vector<16x32xf32>
    %21 = vector.broadcast %3 : vector<1x32xf32> to vector<16x32xf32>
    %22 = arith.mulf %20, %21 : vector<16x32xf32>
    %23 = vector.broadcast %4 : vector<1x32xf32> to vector<16x32xf32>
    %24 = arith.addf %22, %23 : vector<16x32xf32>
    %c0_8 = arith.constant 0 : index
    %c0_9 = arith.constant 0 : index
    %c0_10 = arith.constant 0 : index
    %25 = vector.load %arg2[%c0_8, %c0_9, %c0_10] : memref<2x1x8xf32, #tpu.memory_space<vmem>>, vector<1x1x8xf32>
    %26 = vector.shape_cast %25 : vector<1x1x8xf32> to vector<1x8xf32>
    %27 = vector.shape_cast %26 : vector<1x8xf32> to vector<1x8xf32>
    %28 = vector.broadcast %27 : vector<1x8xf32> to vector<8x8xf32>
    %c1 = arith.constant 1 : index
    %c0_11 = arith.constant 0 : index
    %c0_12 = arith.constant 0 : index
    %29 = vector.load %arg2[%c1, %c0_11, %c0_12] : memref<2x1x8xf32, #tpu.memory_space<vmem>>, vector<1x1x8xf32>
    %30 = vector.shape_cast %29 : vector<1x1x8xf32> to vector<1x8xf32>
    %31 = vector.shape_cast %30 : vector<1x8xf32> to vector<1x8xf32>
    %32 = vector.broadcast %31 : vector<1x8xf32> to vector<8x8xf32>
    %c0_13 = arith.constant 0 : index
    %c0_14 = arith.constant 0 : index
    %c0_15 = arith.constant 0 : index
    %33 = vector.load %arg8[%c0_13, %c0_14, %c0_15] : memref<2x8x96xf32, #tpu.memory_space<vmem>>, vector<1x8x96xf32>
    %34 = vector.shape_cast %33 : vector<1x8x96xf32> to vector<8x96xf32>
    %35 = vector.extract_strided_slice %34 {offsets = [0, 0], sizes = [1, 96], strides = [1, 1]} : vector<8x96xf32> to vector<1x96xf32>
    %36 = vector.extract_strided_slice %34 {offsets = [1, 0], sizes = [1, 32], strides = [1, 1]} : vector<8x96xf32> to vector<1x32xf32>
    %37 = vector.extract_strided_slice %34 {offsets = [2, 0], sizes = [1, 32], strides = [1, 1]} : vector<8x96xf32> to vector<1x32xf32>
    %38 = vector.extract_strided_slice %34 {offsets = [3, 0], sizes = [1, 32], strides = [1, 1]} : vector<8x96xf32> to vector<1x32xf32>
    %39 = vector.extract_strided_slice %34 {offsets = [4, 0], sizes = [1, 64], strides = [1, 1]} : vector<8x96xf32> to vector<1x64xf32>
    %40 = vector.extract_strided_slice %34 {offsets = [5, 0], sizes = [1, 32], strides = [1, 1]} : vector<8x96xf32> to vector<1x32xf32>
    %41 = vector.extract_strided_slice %34 {offsets = [6, 0], sizes = [1, 32], strides = [1, 1]} : vector<8x96xf32> to vector<1x32xf32>
    %42 = vector.extract_strided_slice %34 {offsets = [7, 0], sizes = [1, 32], strides = [1, 1]} : vector<8x96xf32> to vector<1x32xf32>
    %c0_16 = arith.constant 0 : index
    %c0_17 = arith.constant 0 : index
    %c0_18 = arith.constant 0 : index
    %43 = vector.load %arg5[%c0_16, %c0_17, %c0_18] : memref<2x32x32xbf16, #tpu.memory_space<vmem>>, vector<1x32x32xbf16>
    %44 = vector.shape_cast %43 : vector<1x32x32xbf16> to vector<32x32xbf16>
    %c0_19 = arith.constant 0 : index
    %c0_20 = arith.constant 0 : index
    %c0_21 = arith.constant 0 : index
    %45 = vector.load %arg4[%c0_19, %c0_20, %c0_21] : memref<2x32x96xbf16, #tpu.memory_space<vmem>>, vector<1x32x96xbf16>
    %46 = vector.shape_cast %45 : vector<1x32x96xbf16> to vector<32x96xbf16>
    %47 = arith.truncf %24 : vector<16x32xf32> to vector<16x32xbf16>
    %cst_22 = arith.constant dense<0.000000e+00> : vector<16x96xf32>
    %48 = tpu.matmul %47, %46, %cst_22 {dimension_numbers = #tpu.dot_dimension_numbers<[1], [0], [0], [1], [0, 0, 1, 1], [], []>} : vector<16x32xbf16>, vector<32x96xbf16>, vector<16x96xf32> -> vector<16x96xf32>
    %49 = vector.broadcast %35 : vector<1x96xf32> to vector<16x96xf32>
    %50 = arith.addf %48, %49 : vector<16x96xf32>
    %51 = arith.truncf %50 : vector<16x96xf32> to vector<16x96xbf16>
    %52 = vector.extract_strided_slice %51 {offsets = [0, 0], sizes = [8, 8], strides = [1, 1]} : vector<16x96xbf16> to vector<8x8xbf16>
    %53 = vector.extract_strided_slice %51 {offsets = [0, 32], sizes = [8, 8], strides = [1, 1]} : vector<16x96xbf16> to vector<8x8xbf16>
    %54 = vector.extract_strided_slice %51 {offsets = [0, 64], sizes = [8, 8], strides = [1, 1]} : vector<16x96xbf16> to vector<8x8xbf16>
    %cst_23 = arith.constant dense<0.000000e+00> : vector<8x8xf32>
    %55 = tpu.matmul %52, %53, %cst_23 {dimension_numbers = #tpu.dot_dimension_numbers<[1], [1], [0], [0], [0, 0, 1, 0], [], []>} : vector<8x8xbf16>, vector<8x8xbf16>, vector<8x8xf32> -> vector<8x8xf32>
    %cst_24 = arith.constant 0.353553385 : f32
    %56 = vector.broadcast %cst_24 : f32 to vector<8x8xf32>
    %57 = arith.mulf %55, %56 : vector<8x8xf32>
    %58 = arith.addf %57, %28 : vector<8x8xf32>
    %cst_25 = arith.constant dense<0xFF800000> : vector<8xf32>
    %59 = vector.multi_reduction <maximumf>, %58, %cst_25 [1] : vector<8x8xf32> to vector<8xf32>
    %60 = vector.shape_cast %59 : vector<8xf32> to vector<8x1xf32>
    %61 = vector.broadcast %60 : vector<8x1xf32> to vector<8x8xf32>
    %62 = arith.subf %58, %61 : vector<8x8xf32>
    %63 = math.exp %62 : vector<8x8xf32>
    %cst_26 = arith.constant dense<0.000000e+00> : vector<8xf32>
    %64 = vector.multi_reduction <add>, %63, %cst_26 [1] : vector<8x8xf32> to vector<8xf32>
    %65 = vector.shape_cast %64 : vector<8xf32> to vector<8x1xf32>
    %66 = tpu.reciprocal %65 {approx = true} : vector<8x1xf32> -> vector<8x1xf32>
    %67 = vector.broadcast %66 : vector<8x1xf32> to vector<8x8xf32>
    %68 = arith.mulf %63, %67 : vector<8x8xf32>
    %69 = arith.truncf %68 : vector<8x8xf32> to vector<8x8xbf16>
    %cst_27 = arith.constant dense<0.000000e+00> : vector<8x8xf32>
    %70 = tpu.matmul %69, %54, %cst_27 {dimension_numbers = #tpu.dot_dimension_numbers<[1], [0], [0], [1], [0, 0, 1, 1], [], []>} : vector<8x8xbf16>, vector<8x8xbf16>, vector<8x8xf32> -> vector<8x8xf32>
    %71 = arith.truncf %70 : vector<8x8xf32> to vector<8x8xbf16>
    %72 = vector.extract_strided_slice %44 {offsets = [0, 0], sizes = [8, 32], strides = [1, 1]} : vector<32x32xbf16> to vector<8x32xbf16>
    %cst_28 = arith.constant dense<0.000000e+00> : vector<8x32xf32>
    %73 = tpu.matmul %71, %72, %cst_28 {dimension_numbers = #tpu.dot_dimension_numbers<[1], [0], [0], [1], [0, 0, 1, 1], [], []>} : vector<8x8xbf16>, vector<8x32xbf16>, vector<8x32xf32> -> vector<8x32xf32>
    %74 = vector.extract_strided_slice %51 {offsets = [0, 8], sizes = [8, 8], strides = [1, 1]} : vector<16x96xbf16> to vector<8x8xbf16>
    %75 = vector.extract_strided_slice %51 {offsets = [0, 40], sizes = [8, 8], strides = [1, 1]} : vector<16x96xbf16> to vector<8x8xbf16>
    %76 = vector.extract_strided_slice %51 {offsets = [0, 72], sizes = [8, 8], strides = [1, 1]} : vector<16x96xbf16> to vector<8x8xbf16>
    %cst_29 = arith.constant dense<0.000000e+00> : vector<8x8xf32>
    %77 = tpu.matmul %74, %75, %cst_29 {dimension_numbers = #tpu.dot_dimension_numbers<[1], [1], [0], [0], [0, 0, 1, 0], [], []>} : vector<8x8xbf16>, vector<8x8xbf16>, vector<8x8xf32> -> vector<8x8xf32>
    %cst_30 = arith.constant 0.353553385 : f32
    %78 = vector.broadcast %cst_30 : f32 to vector<8x8xf32>
    %79 = arith.mulf %77, %78 : vector<8x8xf32>
    %80 = arith.addf %79, %28 : vector<8x8xf32>
    %cst_31 = arith.constant dense<0xFF800000> : vector<8xf32>
    %81 = vector.multi_reduction <maximumf>, %80, %cst_31 [1] : vector<8x8xf32> to vector<8xf32>
    %82 = vector.shape_cast %81 : vector<8xf32> to vector<8x1xf32>
    %83 = vector.broadcast %82 : vector<8x1xf32> to vector<8x8xf32>
    %84 = arith.subf %80, %83 : vector<8x8xf32>
    %85 = math.exp %84 : vector<8x8xf32>
    %cst_32 = arith.constant dense<0.000000e+00> : vector<8xf32>
    %86 = vector.multi_reduction <add>, %85, %cst_32 [1] : vector<8x8xf32> to vector<8xf32>
    %87 = vector.shape_cast %86 : vector<8xf32> to vector<8x1xf32>
    %88 = tpu.reciprocal %87 {approx = true} : vector<8x1xf32> -> vector<8x1xf32>
    %89 = vector.broadcast %88 : vector<8x1xf32> to vector<8x8xf32>
    %90 = arith.mulf %85, %89 : vector<8x8xf32>
    %91 = arith.truncf %90 : vector<8x8xf32> to vector<8x8xbf16>
    %cst_33 = arith.constant dense<0.000000e+00> : vector<8x8xf32>
    %92 = tpu.matmul %91, %76, %cst_33 {dimension_numbers = #tpu.dot_dimension_numbers<[1], [0], [0], [1], [0, 0, 1, 1], [], []>} : vector<8x8xbf16>, vector<8x8xbf16>, vector<8x8xf32> -> vector<8x8xf32>
    %93 = arith.truncf %92 : vector<8x8xf32> to vector<8x8xbf16>
    %94 = vector.extract_strided_slice %44 {offsets = [8, 0], sizes = [8, 32], strides = [1, 1]} : vector<32x32xbf16> to vector<8x32xbf16>
    %cst_34 = arith.constant dense<0.000000e+00> : vector<8x32xf32>
    %95 = tpu.matmul %93, %94, %cst_34 {dimension_numbers = #tpu.dot_dimension_numbers<[1], [0], [0], [1], [0, 0, 1, 1], [], []>} : vector<8x8xbf16>, vector<8x32xbf16>, vector<8x32xf32> -> vector<8x32xf32>
    %96 = arith.addf %73, %95 : vector<8x32xf32>
    %97 = vector.extract_strided_slice %51 {offsets = [0, 16], sizes = [8, 8], strides = [1, 1]} : vector<16x96xbf16> to vector<8x8xbf16>
    %98 = vector.extract_strided_slice %51 {offsets = [0, 48], sizes = [8, 8], strides = [1, 1]} : vector<16x96xbf16> to vector<8x8xbf16>
    %99 = vector.extract_strided_slice %51 {offsets = [0, 80], sizes = [8, 8], strides = [1, 1]} : vector<16x96xbf16> to vector<8x8xbf16>
    %cst_35 = arith.constant dense<0.000000e+00> : vector<8x8xf32>
    %100 = tpu.matmul %97, %98, %cst_35 {dimension_numbers = #tpu.dot_dimension_numbers<[1], [1], [0], [0], [0, 0, 1, 0], [], []>} : vector<8x8xbf16>, vector<8x8xbf16>, vector<8x8xf32> -> vector<8x8xf32>
    %cst_36 = arith.constant 0.353553385 : f32
    %101 = vector.broadcast %cst_36 : f32 to vector<8x8xf32>
    %102 = arith.mulf %100, %101 : vector<8x8xf32>
    %103 = arith.addf %102, %28 : vector<8x8xf32>
    %cst_37 = arith.constant dense<0xFF800000> : vector<8xf32>
    %104 = vector.multi_reduction <maximumf>, %103, %cst_37 [1] : vector<8x8xf32> to vector<8xf32>
    %105 = vector.shape_cast %104 : vector<8xf32> to vector<8x1xf32>
    %106 = vector.broadcast %105 : vector<8x1xf32> to vector<8x8xf32>
    %107 = arith.subf %103, %106 : vector<8x8xf32>
    %108 = math.exp %107 : vector<8x8xf32>
    %cst_38 = arith.constant dense<0.000000e+00> : vector<8xf32>
    %109 = vector.multi_reduction <add>, %108, %cst_38 [1] : vector<8x8xf32> to vector<8xf32>
    %110 = vector.shape_cast %109 : vector<8xf32> to vector<8x1xf32>
    %111 = tpu.reciprocal %110 {approx = true} : vector<8x1xf32> -> vector<8x1xf32>
    %112 = vector.broadcast %111 : vector<8x1xf32> to vector<8x8xf32>
    %113 = arith.mulf %108, %112 : vector<8x8xf32>
    %114 = arith.truncf %113 : vector<8x8xf32> to vector<8x8xbf16>
    %cst_39 = arith.constant dense<0.000000e+00> : vector<8x8xf32>
    %115 = tpu.matmul %114, %99, %cst_39 {dimension_numbers = #tpu.dot_dimension_numbers<[1], [0], [0], [1], [0, 0, 1, 1], [], []>} : vector<8x8xbf16>, vector<8x8xbf16>, vector<8x8xf32> -> vector<8x8xf32>
    %116 = arith.truncf %115 : vector<8x8xf32> to vector<8x8xbf16>
    %117 = vector.extract_strided_slice %44 {offsets = [16, 0], sizes = [8, 32], strides = [1, 1]} : vector<32x32xbf16> to vector<8x32xbf16>
    %cst_40 = arith.constant dense<0.000000e+00> : vector<8x32xf32>
    %118 = tpu.matmul %116, %117, %cst_40 {dimension_numbers = #tpu.dot_dimension_numbers<[1], [0], [0], [1], [0, 0, 1, 1], [], []>} : vector<8x8xbf16>, vector<8x32xbf16>, vector<8x32xf32> -> vector<8x32xf32>
    %119 = arith.addf %96, %118 : vector<8x32xf32>
    %120 = vector.extract_strided_slice %51 {offsets = [0, 24], sizes = [8, 8], strides = [1, 1]} : vector<16x96xbf16> to vector<8x8xbf16>
    %121 = vector.extract_strided_slice %51 {offsets = [0, 56], sizes = [8, 8], strides = [1, 1]} : vector<16x96xbf16> to vector<8x8xbf16>
    %122 = vector.extract_strided_slice %51 {offsets = [0, 88], sizes = [8, 8], strides = [1, 1]} : vector<16x96xbf16> to vector<8x8xbf16>
    %cst_41 = arith.constant dense<0.000000e+00> : vector<8x8xf32>
    %123 = tpu.matmul %120, %121, %cst_41 {dimension_numbers = #tpu.dot_dimension_numbers<[1], [1], [0], [0], [0, 0, 1, 0], [], []>} : vector<8x8xbf16>, vector<8x8xbf16>, vector<8x8xf32> -> vector<8x8xf32>
    %cst_42 = arith.constant 0.353553385 : f32
    %124 = vector.broadcast %cst_42 : f32 to vector<8x8xf32>
    %125 = arith.mulf %123, %124 : vector<8x8xf32>
    %126 = arith.addf %125, %28 : vector<8x8xf32>
    %cst_43 = arith.constant dense<0xFF800000> : vector<8xf32>
    %127 = vector.multi_reduction <maximumf>, %126, %cst_43 [1] : vector<8x8xf32> to vector<8xf32>
    %128 = vector.shape_cast %127 : vector<8xf32> to vector<8x1xf32>
    %129 = vector.broadcast %128 : vector<8x1xf32> to vector<8x8xf32>
    %130 = arith.subf %126, %129 : vector<8x8xf32>
    %131 = math.exp %130 : vector<8x8xf32>
    %cst_44 = arith.constant dense<0.000000e+00> : vector<8xf32>
    %132 = vector.multi_reduction <add>, %131, %cst_44 [1] : vector<8x8xf32> to vector<8xf32>
    %133 = vector.shape_cast %132 : vector<8xf32> to vector<8x1xf32>
    %134 = tpu.reciprocal %133 {approx = true} : vector<8x1xf32> -> vector<8x1xf32>
    %135 = vector.broadcast %134 : vector<8x1xf32> to vector<8x8xf32>
    %136 = arith.mulf %131, %135 : vector<8x8xf32>
    %137 = arith.truncf %136 : vector<8x8xf32> to vector<8x8xbf16>
    %cst_45 = arith.constant dense<0.000000e+00> : vector<8x8xf32>
    %138 = tpu.matmul %137, %122, %cst_45 {dimension_numbers = #tpu.dot_dimension_numbers<[1], [0], [0], [1], [0, 0, 1, 1], [], []>} : vector<8x8xbf16>, vector<8x8xbf16>, vector<8x8xf32> -> vector<8x8xf32>
    %139 = arith.truncf %138 : vector<8x8xf32> to vector<8x8xbf16>
    %140 = vector.extract_strided_slice %44 {offsets = [24, 0], sizes = [8, 32], strides = [1, 1]} : vector<32x32xbf16> to vector<8x32xbf16>
    %cst_46 = arith.constant dense<0.000000e+00> : vector<8x32xf32>
    %141 = tpu.matmul %139, %140, %cst_46 {dimension_numbers = #tpu.dot_dimension_numbers<[1], [0], [0], [1], [0, 0, 1, 1], [], []>} : vector<8x8xbf16>, vector<8x32xbf16>, vector<8x32xf32> -> vector<8x32xf32>
    %142 = arith.addf %119, %141 : vector<8x32xf32>
    %143 = vector.extract_strided_slice %51 {offsets = [8, 0], sizes = [8, 8], strides = [1, 1]} : vector<16x96xbf16> to vector<8x8xbf16>
    %144 = vector.extract_strided_slice %51 {offsets = [8, 32], sizes = [8, 8], strides = [1, 1]} : vector<16x96xbf16> to vector<8x8xbf16>
    %145 = vector.extract_strided_slice %51 {offsets = [8, 64], sizes = [8, 8], strides = [1, 1]} : vector<16x96xbf16> to vector<8x8xbf16>
    %cst_47 = arith.constant dense<0.000000e+00> : vector<8x8xf32>
    %146 = tpu.matmul %143, %144, %cst_47 {dimension_numbers = #tpu.dot_dimension_numbers<[1], [1], [0], [0], [0, 0, 1, 0], [], []>} : vector<8x8xbf16>, vector<8x8xbf16>, vector<8x8xf32> -> vector<8x8xf32>
    %cst_48 = arith.constant 0.353553385 : f32
    %147 = vector.broadcast %cst_48 : f32 to vector<8x8xf32>
    %148 = arith.mulf %146, %147 : vector<8x8xf32>
    %149 = arith.addf %148, %32 : vector<8x8xf32>
    %cst_49 = arith.constant dense<0xFF800000> : vector<8xf32>
    %150 = vector.multi_reduction <maximumf>, %149, %cst_49 [1] : vector<8x8xf32> to vector<8xf32>
    %151 = vector.shape_cast %150 : vector<8xf32> to vector<8x1xf32>
    %152 = vector.broadcast %151 : vector<8x1xf32> to vector<8x8xf32>
    %153 = arith.subf %149, %152 : vector<8x8xf32>
    %154 = math.exp %153 : vector<8x8xf32>
    %cst_50 = arith.constant dense<0.000000e+00> : vector<8xf32>
    %155 = vector.multi_reduction <add>, %154, %cst_50 [1] : vector<8x8xf32> to vector<8xf32>
    %156 = vector.shape_cast %155 : vector<8xf32> to vector<8x1xf32>
    %157 = tpu.reciprocal %156 {approx = true} : vector<8x1xf32> -> vector<8x1xf32>
    %158 = vector.broadcast %157 : vector<8x1xf32> to vector<8x8xf32>
    %159 = arith.mulf %154, %158 : vector<8x8xf32>
    %160 = arith.truncf %159 : vector<8x8xf32> to vector<8x8xbf16>
    %cst_51 = arith.constant dense<0.000000e+00> : vector<8x8xf32>
    %161 = tpu.matmul %160, %145, %cst_51 {dimension_numbers = #tpu.dot_dimension_numbers<[1], [0], [0], [1], [0, 0, 1, 1], [], []>} : vector<8x8xbf16>, vector<8x8xbf16>, vector<8x8xf32> -> vector<8x8xf32>
    %162 = arith.truncf %161 : vector<8x8xf32> to vector<8x8xbf16>
    %163 = vector.extract_strided_slice %44 {offsets = [0, 0], sizes = [8, 32], strides = [1, 1]} : vector<32x32xbf16> to vector<8x32xbf16>
    %cst_52 = arith.constant dense<0.000000e+00> : vector<8x32xf32>
    %164 = tpu.matmul %162, %163, %cst_52 {dimension_numbers = #tpu.dot_dimension_numbers<[1], [0], [0], [1], [0, 0, 1, 1], [], []>} : vector<8x8xbf16>, vector<8x32xbf16>, vector<8x32xf32> -> vector<8x32xf32>
    %165 = vector.extract_strided_slice %51 {offsets = [8, 8], sizes = [8, 8], strides = [1, 1]} : vector<16x96xbf16> to vector<8x8xbf16>
    %166 = vector.extract_strided_slice %51 {offsets = [8, 40], sizes = [8, 8], strides = [1, 1]} : vector<16x96xbf16> to vector<8x8xbf16>
    %167 = vector.extract_strided_slice %51 {offsets = [8, 72], sizes = [8, 8], strides = [1, 1]} : vector<16x96xbf16> to vector<8x8xbf16>
    %cst_53 = arith.constant dense<0.000000e+00> : vector<8x8xf32>
    %168 = tpu.matmul %165, %166, %cst_53 {dimension_numbers = #tpu.dot_dimension_numbers<[1], [1], [0], [0], [0, 0, 1, 0], [], []>} : vector<8x8xbf16>, vector<8x8xbf16>, vector<8x8xf32> -> vector<8x8xf32>
    %cst_54 = arith.constant 0.353553385 : f32
    %169 = vector.broadcast %cst_54 : f32 to vector<8x8xf32>
    %170 = arith.mulf %168, %169 : vector<8x8xf32>
    %171 = arith.addf %170, %32 : vector<8x8xf32>
    %cst_55 = arith.constant dense<0xFF800000> : vector<8xf32>
    %172 = vector.multi_reduction <maximumf>, %171, %cst_55 [1] : vector<8x8xf32> to vector<8xf32>
    %173 = vector.shape_cast %172 : vector<8xf32> to vector<8x1xf32>
    %174 = vector.broadcast %173 : vector<8x1xf32> to vector<8x8xf32>
    %175 = arith.subf %171, %174 : vector<8x8xf32>
    %176 = math.exp %175 : vector<8x8xf32>
    %cst_56 = arith.constant dense<0.000000e+00> : vector<8xf32>
    %177 = vector.multi_reduction <add>, %176, %cst_56 [1] : vector<8x8xf32> to vector<8xf32>
    %178 = vector.shape_cast %177 : vector<8xf32> to vector<8x1xf32>
    %179 = tpu.reciprocal %178 {approx = true} : vector<8x1xf32> -> vector<8x1xf32>
    %180 = vector.broadcast %179 : vector<8x1xf32> to vector<8x8xf32>
    %181 = arith.mulf %176, %180 : vector<8x8xf32>
    %182 = arith.truncf %181 : vector<8x8xf32> to vector<8x8xbf16>
    %cst_57 = arith.constant dense<0.000000e+00> : vector<8x8xf32>
    %183 = tpu.matmul %182, %167, %cst_57 {dimension_numbers = #tpu.dot_dimension_numbers<[1], [0], [0], [1], [0, 0, 1, 1], [], []>} : vector<8x8xbf16>, vector<8x8xbf16>, vector<8x8xf32> -> vector<8x8xf32>
    %184 = arith.truncf %183 : vector<8x8xf32> to vector<8x8xbf16>
    %185 = vector.extract_strided_slice %44 {offsets = [8, 0], sizes = [8, 32], strides = [1, 1]} : vector<32x32xbf16> to vector<8x32xbf16>
    %cst_58 = arith.constant dense<0.000000e+00> : vector<8x32xf32>
    %186 = tpu.matmul %184, %185, %cst_58 {dimension_numbers = #tpu.dot_dimension_numbers<[1], [0], [0], [1], [0, 0, 1, 1], [], []>} : vector<8x8xbf16>, vector<8x32xbf16>, vector<8x32xf32> -> vector<8x32xf32>
    %187 = arith.addf %164, %186 : vector<8x32xf32>
    %188 = vector.extract_strided_slice %51 {offsets = [8, 16], sizes = [8, 8], strides = [1, 1]} : vector<16x96xbf16> to vector<8x8xbf16>
    %189 = vector.extract_strided_slice %51 {offsets = [8, 48], sizes = [8, 8], strides = [1, 1]} : vector<16x96xbf16> to vector<8x8xbf16>
    %190 = vector.extract_strided_slice %51 {offsets = [8, 80], sizes = [8, 8], strides = [1, 1]} : vector<16x96xbf16> to vector<8x8xbf16>
    %cst_59 = arith.constant dense<0.000000e+00> : vector<8x8xf32>
    %191 = tpu.matmul %188, %189, %cst_59 {dimension_numbers = #tpu.dot_dimension_numbers<[1], [1], [0], [0], [0, 0, 1, 0], [], []>} : vector<8x8xbf16>, vector<8x8xbf16>, vector<8x8xf32> -> vector<8x8xf32>
    %cst_60 = arith.constant 0.353553385 : f32
    %192 = vector.broadcast %cst_60 : f32 to vector<8x8xf32>
    %193 = arith.mulf %191, %192 : vector<8x8xf32>
    %194 = arith.addf %193, %32 : vector<8x8xf32>
    %cst_61 = arith.constant dense<0xFF800000> : vector<8xf32>
    %195 = vector.multi_reduction <maximumf>, %194, %cst_61 [1] : vector<8x8xf32> to vector<8xf32>
    %196 = vector.shape_cast %195 : vector<8xf32> to vector<8x1xf32>
    %197 = vector.broadcast %196 : vector<8x1xf32> to vector<8x8xf32>
    %198 = arith.subf %194, %197 : vector<8x8xf32>
    %199 = math.exp %198 : vector<8x8xf32>
    %cst_62 = arith.constant dense<0.000000e+00> : vector<8xf32>
    %200 = vector.multi_reduction <add>, %199, %cst_62 [1] : vector<8x8xf32> to vector<8xf32>
    %201 = vector.shape_cast %200 : vector<8xf32> to vector<8x1xf32>
    %202 = tpu.reciprocal %201 {approx = true} : vector<8x1xf32> -> vector<8x1xf32>
    %203 = vector.broadcast %202 : vector<8x1xf32> to vector<8x8xf32>
    %204 = arith.mulf %199, %203 : vector<8x8xf32>
    %205 = arith.truncf %204 : vector<8x8xf32> to vector<8x8xbf16>
    %cst_63 = arith.constant dense<0.000000e+00> : vector<8x8xf32>
    %206 = tpu.matmul %205, %190, %cst_63 {dimension_numbers = #tpu.dot_dimension_numbers<[1], [0], [0], [1], [0, 0, 1, 1], [], []>} : vector<8x8xbf16>, vector<8x8xbf16>, vector<8x8xf32> -> vector<8x8xf32>
    %207 = arith.truncf %206 : vector<8x8xf32> to vector<8x8xbf16>
    %208 = vector.extract_strided_slice %44 {offsets = [16, 0], sizes = [8, 32], strides = [1, 1]} : vector<32x32xbf16> to vector<8x32xbf16>
    %cst_64 = arith.constant dense<0.000000e+00> : vector<8x32xf32>
    %209 = tpu.matmul %207, %208, %cst_64 {dimension_numbers = #tpu.dot_dimension_numbers<[1], [0], [0], [1], [0, 0, 1, 1], [], []>} : vector<8x8xbf16>, vector<8x32xbf16>, vector<8x32xf32> -> vector<8x32xf32>
    %210 = arith.addf %187, %209 : vector<8x32xf32>
    %211 = vector.extract_strided_slice %51 {offsets = [8, 24], sizes = [8, 8], strides = [1, 1]} : vector<16x96xbf16> to vector<8x8xbf16>
    %212 = vector.extract_strided_slice %51 {offsets = [8, 56], sizes = [8, 8], strides = [1, 1]} : vector<16x96xbf16> to vector<8x8xbf16>
    %213 = vector.extract_strided_slice %51 {offsets = [8, 88], sizes = [8, 8], strides = [1, 1]} : vector<16x96xbf16> to vector<8x8xbf16>
    %cst_65 = arith.constant dense<0.000000e+00> : vector<8x8xf32>
    %214 = tpu.matmul %211, %212, %cst_65 {dimension_numbers = #tpu.dot_dimension_numbers<[1], [1], [0], [0], [0, 0, 1, 0], [], []>} : vector<8x8xbf16>, vector<8x8xbf16>, vector<8x8xf32> -> vector<8x8xf32>
    %cst_66 = arith.constant 0.353553385 : f32
    %215 = vector.broadcast %cst_66 : f32 to vector<8x8xf32>
    %216 = arith.mulf %214, %215 : vector<8x8xf32>
    %217 = arith.addf %216, %32 : vector<8x8xf32>
    %cst_67 = arith.constant dense<0xFF800000> : vector<8xf32>
    %218 = vector.multi_reduction <maximumf>, %217, %cst_67 [1] : vector<8x8xf32> to vector<8xf32>
    %219 = vector.shape_cast %218 : vector<8xf32> to vector<8x1xf32>
    %220 = vector.broadcast %219 : vector<8x1xf32> to vector<8x8xf32>
    %221 = arith.subf %217, %220 : vector<8x8xf32>
    %222 = math.exp %221 : vector<8x8xf32>
    %cst_68 = arith.constant dense<0.000000e+00> : vector<8xf32>
    %223 = vector.multi_reduction <add>, %222, %cst_68 [1] : vector<8x8xf32> to vector<8xf32>
    %224 = vector.shape_cast %223 : vector<8xf32> to vector<8x1xf32>
    %225 = tpu.reciprocal %224 {approx = true} : vector<8x1xf32> -> vector<8x1xf32>
    %226 = vector.broadcast %225 : vector<8x1xf32> to vector<8x8xf32>
    %227 = arith.mulf %222, %226 : vector<8x8xf32>
    %228 = arith.truncf %227 : vector<8x8xf32> to vector<8x8xbf16>
    %cst_69 = arith.constant dense<0.000000e+00> : vector<8x8xf32>
    %229 = tpu.matmul %228, %213, %cst_69 {dimension_numbers = #tpu.dot_dimension_numbers<[1], [0], [0], [1], [0, 0, 1, 1], [], []>} : vector<8x8xbf16>, vector<8x8xbf16>, vector<8x8xf32> -> vector<8x8xf32>
    %230 = arith.truncf %229 : vector<8x8xf32> to vector<8x8xbf16>
    %231 = vector.extract_strided_slice %44 {offsets = [24, 0], sizes = [8, 32], strides = [1, 1]} : vector<32x32xbf16> to vector<8x32xbf16>
    %cst_70 = arith.constant dense<0.000000e+00> : vector<8x32xf32>
    %232 = tpu.matmul %230, %231, %cst_70 {dimension_numbers = #tpu.dot_dimension_numbers<[1], [0], [0], [1], [0, 0, 1, 1], [], []>} : vector<8x8xbf16>, vector<8x32xbf16>, vector<8x32xf32> -> vector<8x32xf32>
    %233 = arith.addf %210, %232 : vector<8x32xf32>
    %234 = tpu.concatenate %142, %233 in 0 : vector<8x32xf32>, vector<8x32xf32> -> vector<16x32xf32>
    %235 = arith.addf %24, %234 : vector<16x32xf32>
    %236 = vector.broadcast %36 : vector<1x32xf32> to vector<16x32xf32>
    %237 = arith.addf %235, %236 : vector<16x32xf32>
    %cst_71 = arith.constant dense<0.000000e+00> : vector<16xf32>
    %238 = vector.multi_reduction <add>, %237, %cst_71 [1] : vector<16x32xf32> to vector<16xf32>
    %239 = vector.shape_cast %238 : vector<16xf32> to vector<16x1xf32>
    %cst_72 = arith.constant 3.200000e+01 : f32
    %240 = vector.broadcast %cst_72 : f32 to vector<16x1xf32>
    %241 = arith.divf %239, %240 : vector<16x1xf32>
    %242 = vector.broadcast %241 : vector<16x1xf32> to vector<16x32xf32>
    %243 = arith.subf %237, %242 : vector<16x32xf32>
    %244 = arith.mulf %243, %243 : vector<16x32xf32>
    %cst_73 = arith.constant dense<0.000000e+00> : vector<16xf32>
    %245 = vector.multi_reduction <add>, %244, %cst_73 [1] : vector<16x32xf32> to vector<16xf32>
    %246 = vector.shape_cast %245 : vector<16xf32> to vector<16x1xf32>
    %cst_74 = arith.constant 3.200000e+01 : f32
    %247 = vector.broadcast %cst_74 : f32 to vector<16x1xf32>
    %248 = arith.divf %246, %247 : vector<16x1xf32>
    %cst_75 = arith.constant 9.99999996E-13 : f32
    %249 = vector.broadcast %cst_75 : f32 to vector<16x1xf32>
    %250 = arith.addf %248, %249 : vector<16x1xf32>
    %251 = math.rsqrt %250 : vector<16x1xf32>
    %252 = vector.broadcast %251 : vector<16x1xf32> to vector<16x32xf32>
    %253 = arith.mulf %243, %252 : vector<16x32xf32>
    %254 = vector.broadcast %37 : vector<1x32xf32> to vector<16x32xf32>
    %255 = arith.mulf %253, %254 : vector<16x32xf32>
    %256 = vector.broadcast %38 : vector<1x32xf32> to vector<16x32xf32>
    %257 = arith.addf %255, %256 : vector<16x32xf32>
    %c0_76 = arith.constant 0 : index
    %c0_77 = arith.constant 0 : index
    %c0_78 = arith.constant 0 : index
    %258 = vector.load %arg6[%c0_76, %c0_77, %c0_78] : memref<2x32x64xbf16, #tpu.memory_space<vmem>>, vector<1x32x64xbf16>
    %259 = vector.shape_cast %258 : vector<1x32x64xbf16> to vector<32x64xbf16>
    %260 = arith.truncf %257 : vector<16x32xf32> to vector<16x32xbf16>
    %cst_79 = arith.constant dense<0.000000e+00> : vector<16x64xf32>
    %261 = tpu.matmul %260, %259, %cst_79 {dimension_numbers = #tpu.dot_dimension_numbers<[1], [0], [0], [1], [0, 0, 1, 1], [], []>} : vector<16x32xbf16>, vector<32x64xbf16>, vector<16x64xf32> -> vector<16x64xf32>
    %262 = vector.broadcast %39 : vector<1x64xf32> to vector<16x64xf32>
    %263 = arith.addf %261, %262 : vector<16x64xf32>
    %cst_80 = arith.constant 5.000000e-01 : f32
    %264 = vector.broadcast %cst_80 : f32 to vector<16x64xf32>
    %265 = arith.mulf %264, %263 : vector<16x64xf32>
    %cst_81 = arith.constant 4.471500e-02 : f32
    %266 = vector.broadcast %cst_81 : f32 to vector<16x64xf32>
    %267 = arith.mulf %266, %263 : vector<16x64xf32>
    %268 = arith.mulf %267, %263 : vector<16x64xf32>
    %269 = arith.mulf %268, %263 : vector<16x64xf32>
    %270 = arith.addf %263, %269 : vector<16x64xf32>
    %cst_82 = arith.constant 0.797884583 : f32
    %271 = vector.broadcast %cst_82 : f32 to vector<16x64xf32>
    %272 = arith.mulf %271, %270 : vector<16x64xf32>
    %273 = math.tanh %272 : vector<16x64xf32>
    %cst_83 = arith.constant 1.000000e+00 : f32
    %274 = vector.broadcast %cst_83 : f32 to vector<16x64xf32>
    %275 = arith.addf %274, %273 : vector<16x64xf32>
    %276 = arith.mulf %265, %275 : vector<16x64xf32>
    %c0_84 = arith.constant 0 : index
    %c0_85 = arith.constant 0 : index
    %c0_86 = arith.constant 0 : index
    %277 = vector.load %arg7[%c0_84, %c0_85, %c0_86] : memref<2x64x32xbf16, #tpu.memory_space<vmem>>, vector<1x64x32xbf16>
    %278 = vector.shape_cast %277 : vector<1x64x32xbf16> to vector<64x32xbf16>
    %279 = arith.truncf %276 : vector<16x64xf32> to vector<16x64xbf16>
    %cst_87 = arith.constant dense<0.000000e+00> : vector<16x32xf32>
    %280 = tpu.matmul %279, %278, %cst_87 {dimension_numbers = #tpu.dot_dimension_numbers<[1], [0], [0], [1], [0, 0, 1, 1], [], []>} : vector<16x64xbf16>, vector<64x32xbf16>, vector<16x32xf32> -> vector<16x32xf32>
    %281 = vector.broadcast %40 : vector<1x32xf32> to vector<16x32xf32>
    %282 = arith.addf %280, %281 : vector<16x32xf32>
    %283 = arith.addf %257, %282 : vector<16x32xf32>
    %cst_88 = arith.constant dense<0.000000e+00> : vector<16xf32>
    %284 = vector.multi_reduction <add>, %283, %cst_88 [1] : vector<16x32xf32> to vector<16xf32>
    %285 = vector.shape_cast %284 : vector<16xf32> to vector<16x1xf32>
    %cst_89 = arith.constant 3.200000e+01 : f32
    %286 = vector.broadcast %cst_89 : f32 to vector<16x1xf32>
    %287 = arith.divf %285, %286 : vector<16x1xf32>
    %288 = vector.broadcast %287 : vector<16x1xf32> to vector<16x32xf32>
    %289 = arith.subf %283, %288 : vector<16x32xf32>
    %290 = arith.mulf %289, %289 : vector<16x32xf32>
    %cst_90 = arith.constant dense<0.000000e+00> : vector<16xf32>
    %291 = vector.multi_reduction <add>, %290, %cst_90 [1] : vector<16x32xf32> to vector<16xf32>
    %292 = vector.shape_cast %291 : vector<16xf32> to vector<16x1xf32>
    %cst_91 = arith.constant 3.200000e+01 : f32
    %293 = vector.broadcast %cst_91 : f32 to vector<16x1xf32>
    %294 = arith.divf %292, %293 : vector<16x1xf32>
    %cst_92 = arith.constant 9.99999996E-13 : f32
    %295 = vector.broadcast %cst_92 : f32 to vector<16x1xf32>
    %296 = arith.addf %294, %295 : vector<16x1xf32>
    %297 = math.rsqrt %296 : vector<16x1xf32>
    %298 = vector.broadcast %297 : vector<16x1xf32> to vector<16x32xf32>
    %299 = arith.mulf %289, %298 : vector<16x32xf32>
    %300 = vector.broadcast %41 : vector<1x32xf32> to vector<16x32xf32>
    %301 = arith.mulf %299, %300 : vector<16x32xf32>
    %302 = vector.broadcast %42 : vector<1x32xf32> to vector<16x32xf32>
    %303 = arith.addf %301, %302 : vector<16x32xf32>
    %c1_93 = arith.constant 1 : index
    %c0_94 = arith.constant 0 : index
    %c0_95 = arith.constant 0 : index
    %304 = vector.load %arg8[%c1_93, %c0_94, %c0_95] : memref<2x8x96xf32, #tpu.memory_space<vmem>>, vector<1x8x96xf32>
    %305 = vector.shape_cast %304 : vector<1x8x96xf32> to vector<8x96xf32>
    %306 = vector.extract_strided_slice %305 {offsets = [0, 0], sizes = [1, 96], strides = [1, 1]} : vector<8x96xf32> to vector<1x96xf32>
    %307 = vector.extract_strided_slice %305 {offsets = [1, 0], sizes = [1, 32], strides = [1, 1]} : vector<8x96xf32> to vector<1x32xf32>
    %308 = vector.extract_strided_slice %305 {offsets = [2, 0], sizes = [1, 32], strides = [1, 1]} : vector<8x96xf32> to vector<1x32xf32>
    %309 = vector.extract_strided_slice %305 {offsets = [3, 0], sizes = [1, 32], strides = [1, 1]} : vector<8x96xf32> to vector<1x32xf32>
    %310 = vector.extract_strided_slice %305 {offsets = [4, 0], sizes = [1, 64], strides = [1, 1]} : vector<8x96xf32> to vector<1x64xf32>
    %311 = vector.extract_strided_slice %305 {offsets = [5, 0], sizes = [1, 32], strides = [1, 1]} : vector<8x96xf32> to vector<1x32xf32>
    %312 = vector.extract_strided_slice %305 {offsets = [6, 0], sizes = [1, 32], strides = [1, 1]} : vector<8x96xf32> to vector<1x32xf32>
    %313 = vector.extract_strided_slice %305 {offsets = [7, 0], sizes = [1, 32], strides = [1, 1]} : vector<8x96xf32> to vector<1x32xf32>
    %c1_96 = arith.constant 1 : index
    %c0_97 = arith.constant 0 : index
    %c0_98 = arith.constant 0 : index
    %314 = vector.load %arg5[%c1_96, %c0_97, %c0_98] : memref<2x32x32xbf16, #tpu.memory_space<vmem>>, vector<1x32x32xbf16>
    %315 = vector.shape_cast %314 : vector<1x32x32xbf16> to vector<32x32xbf16>
    %c1_99 = arith.constant 1 : index
    %c0_100 = arith.constant 0 : index
    %c0_101 = arith.constant 0 : index
    %316 = vector.load %arg4[%c1_99, %c0_100, %c0_101] : memref<2x32x96xbf16, #tpu.memory_space<vmem>>, vector<1x32x96xbf16>
    %317 = vector.shape_cast %316 : vector<1x32x96xbf16> to vector<32x96xbf16>
    %318 = arith.truncf %303 : vector<16x32xf32> to vector<16x32xbf16>
    %cst_102 = arith.constant dense<0.000000e+00> : vector<16x96xf32>
    %319 = tpu.matmul %318, %317, %cst_102 {dimension_numbers = #tpu.dot_dimension_numbers<[1], [0], [0], [1], [0, 0, 1, 1], [], []>} : vector<16x32xbf16>, vector<32x96xbf16>, vector<16x96xf32> -> vector<16x96xf32>
    %320 = vector.broadcast %306 : vector<1x96xf32> to vector<16x96xf32>
    %321 = arith.addf %319, %320 : vector<16x96xf32>
    %322 = arith.truncf %321 : vector<16x96xf32> to vector<16x96xbf16>
    %323 = vector.extract_strided_slice %322 {offsets = [0, 0], sizes = [8, 8], strides = [1, 1]} : vector<16x96xbf16> to vector<8x8xbf16>
    %324 = vector.extract_strided_slice %322 {offsets = [0, 32], sizes = [8, 8], strides = [1, 1]} : vector<16x96xbf16> to vector<8x8xbf16>
    %325 = vector.extract_strided_slice %322 {offsets = [0, 64], sizes = [8, 8], strides = [1, 1]} : vector<16x96xbf16> to vector<8x8xbf16>
    %cst_103 = arith.constant dense<0.000000e+00> : vector<8x8xf32>
    %326 = tpu.matmul %323, %324, %cst_103 {dimension_numbers = #tpu.dot_dimension_numbers<[1], [1], [0], [0], [0, 0, 1, 0], [], []>} : vector<8x8xbf16>, vector<8x8xbf16>, vector<8x8xf32> -> vector<8x8xf32>
    %cst_104 = arith.constant 0.353553385 : f32
    %327 = vector.broadcast %cst_104 : f32 to vector<8x8xf32>
    %328 = arith.mulf %326, %327 : vector<8x8xf32>
    %329 = arith.addf %328, %28 : vector<8x8xf32>
    %cst_105 = arith.constant dense<0xFF800000> : vector<8xf32>
    %330 = vector.multi_reduction <maximumf>, %329, %cst_105 [1] : vector<8x8xf32> to vector<8xf32>
    %331 = vector.shape_cast %330 : vector<8xf32> to vector<8x1xf32>
    %332 = vector.broadcast %331 : vector<8x1xf32> to vector<8x8xf32>
    %333 = arith.subf %329, %332 : vector<8x8xf32>
    %334 = math.exp %333 : vector<8x8xf32>
    %cst_106 = arith.constant dense<0.000000e+00> : vector<8xf32>
    %335 = vector.multi_reduction <add>, %334, %cst_106 [1] : vector<8x8xf32> to vector<8xf32>
    %336 = vector.shape_cast %335 : vector<8xf32> to vector<8x1xf32>
    %337 = tpu.reciprocal %336 {approx = true} : vector<8x1xf32> -> vector<8x1xf32>
    %338 = vector.broadcast %337 : vector<8x1xf32> to vector<8x8xf32>
    %339 = arith.mulf %334, %338 : vector<8x8xf32>
    %340 = arith.truncf %339 : vector<8x8xf32> to vector<8x8xbf16>
    %cst_107 = arith.constant dense<0.000000e+00> : vector<8x8xf32>
    %341 = tpu.matmul %340, %325, %cst_107 {dimension_numbers = #tpu.dot_dimension_numbers<[1], [0], [0], [1], [0, 0, 1, 1], [], []>} : vector<8x8xbf16>, vector<8x8xbf16>, vector<8x8xf32> -> vector<8x8xf32>
    %342 = arith.truncf %341 : vector<8x8xf32> to vector<8x8xbf16>
    %343 = vector.extract_strided_slice %315 {offsets = [0, 0], sizes = [8, 32], strides = [1, 1]} : vector<32x32xbf16> to vector<8x32xbf16>
    %cst_108 = arith.constant dense<0.000000e+00> : vector<8x32xf32>
    %344 = tpu.matmul %342, %343, %cst_108 {dimension_numbers = #tpu.dot_dimension_numbers<[1], [0], [0], [1], [0, 0, 1, 1], [], []>} : vector<8x8xbf16>, vector<8x32xbf16>, vector<8x32xf32> -> vector<8x32xf32>
    %345 = vector.extract_strided_slice %322 {offsets = [0, 8], sizes = [8, 8], strides = [1, 1]} : vector<16x96xbf16> to vector<8x8xbf16>
    %346 = vector.extract_strided_slice %322 {offsets = [0, 40], sizes = [8, 8], strides = [1, 1]} : vector<16x96xbf16> to vector<8x8xbf16>
    %347 = vector.extract_strided_slice %322 {offsets = [0, 72], sizes = [8, 8], strides = [1, 1]} : vector<16x96xbf16> to vector<8x8xbf16>
    %cst_109 = arith.constant dense<0.000000e+00> : vector<8x8xf32>
    %348 = tpu.matmul %345, %346, %cst_109 {dimension_numbers = #tpu.dot_dimension_numbers<[1], [1], [0], [0], [0, 0, 1, 0], [], []>} : vector<8x8xbf16>, vector<8x8xbf16>, vector<8x8xf32> -> vector<8x8xf32>
    %cst_110 = arith.constant 0.353553385 : f32
    %349 = vector.broadcast %cst_110 : f32 to vector<8x8xf32>
    %350 = arith.mulf %348, %349 : vector<8x8xf32>
    %351 = arith.addf %350, %28 : vector<8x8xf32>
    %cst_111 = arith.constant dense<0xFF800000> : vector<8xf32>
    %352 = vector.multi_reduction <maximumf>, %351, %cst_111 [1] : vector<8x8xf32> to vector<8xf32>
    %353 = vector.shape_cast %352 : vector<8xf32> to vector<8x1xf32>
    %354 = vector.broadcast %353 : vector<8x1xf32> to vector<8x8xf32>
    %355 = arith.subf %351, %354 : vector<8x8xf32>
    %356 = math.exp %355 : vector<8x8xf32>
    %cst_112 = arith.constant dense<0.000000e+00> : vector<8xf32>
    %357 = vector.multi_reduction <add>, %356, %cst_112 [1] : vector<8x8xf32> to vector<8xf32>
    %358 = vector.shape_cast %357 : vector<8xf32> to vector<8x1xf32>
    %359 = tpu.reciprocal %358 {approx = true} : vector<8x1xf32> -> vector<8x1xf32>
    %360 = vector.broadcast %359 : vector<8x1xf32> to vector<8x8xf32>
    %361 = arith.mulf %356, %360 : vector<8x8xf32>
    %362 = arith.truncf %361 : vector<8x8xf32> to vector<8x8xbf16>
    %cst_113 = arith.constant dense<0.000000e+00> : vector<8x8xf32>
    %363 = tpu.matmul %362, %347, %cst_113 {dimension_numbers = #tpu.dot_dimension_numbers<[1], [0], [0], [1], [0, 0, 1, 1], [], []>} : vector<8x8xbf16>, vector<8x8xbf16>, vector<8x8xf32> -> vector<8x8xf32>
    %364 = arith.truncf %363 : vector<8x8xf32> to vector<8x8xbf16>
    %365 = vector.extract_strided_slice %315 {offsets = [8, 0], sizes = [8, 32], strides = [1, 1]} : vector<32x32xbf16> to vector<8x32xbf16>
    %cst_114 = arith.constant dense<0.000000e+00> : vector<8x32xf32>
    %366 = tpu.matmul %364, %365, %cst_114 {dimension_numbers = #tpu.dot_dimension_numbers<[1], [0], [0], [1], [0, 0, 1, 1], [], []>} : vector<8x8xbf16>, vector<8x32xbf16>, vector<8x32xf32> -> vector<8x32xf32>
    %367 = arith.addf %344, %366 : vector<8x32xf32>
    %368 = vector.extract_strided_slice %322 {offsets = [0, 16], sizes = [8, 8], strides = [1, 1]} : vector<16x96xbf16> to vector<8x8xbf16>
    %369 = vector.extract_strided_slice %322 {offsets = [0, 48], sizes = [8, 8], strides = [1, 1]} : vector<16x96xbf16> to vector<8x8xbf16>
    %370 = vector.extract_strided_slice %322 {offsets = [0, 80], sizes = [8, 8], strides = [1, 1]} : vector<16x96xbf16> to vector<8x8xbf16>
    %cst_115 = arith.constant dense<0.000000e+00> : vector<8x8xf32>
    %371 = tpu.matmul %368, %369, %cst_115 {dimension_numbers = #tpu.dot_dimension_numbers<[1], [1], [0], [0], [0, 0, 1, 0], [], []>} : vector<8x8xbf16>, vector<8x8xbf16>, vector<8x8xf32> -> vector<8x8xf32>
    %cst_116 = arith.constant 0.353553385 : f32
    %372 = vector.broadcast %cst_116 : f32 to vector<8x8xf32>
    %373 = arith.mulf %371, %372 : vector<8x8xf32>
    %374 = arith.addf %373, %28 : vector<8x8xf32>
    %cst_117 = arith.constant dense<0xFF800000> : vector<8xf32>
    %375 = vector.multi_reduction <maximumf>, %374, %cst_117 [1] : vector<8x8xf32> to vector<8xf32>
    %376 = vector.shape_cast %375 : vector<8xf32> to vector<8x1xf32>
    %377 = vector.broadcast %376 : vector<8x1xf32> to vector<8x8xf32>
    %378 = arith.subf %374, %377 : vector<8x8xf32>
    %379 = math.exp %378 : vector<8x8xf32>
    %cst_118 = arith.constant dense<0.000000e+00> : vector<8xf32>
    %380 = vector.multi_reduction <add>, %379, %cst_118 [1] : vector<8x8xf32> to vector<8xf32>
    %381 = vector.shape_cast %380 : vector<8xf32> to vector<8x1xf32>
    %382 = tpu.reciprocal %381 {approx = true} : vector<8x1xf32> -> vector<8x1xf32>
    %383 = vector.broadcast %382 : vector<8x1xf32> to vector<8x8xf32>
    %384 = arith.mulf %379, %383 : vector<8x8xf32>
    %385 = arith.truncf %384 : vector<8x8xf32> to vector<8x8xbf16>
    %cst_119 = arith.constant dense<0.000000e+00> : vector<8x8xf32>
    %386 = tpu.matmul %385, %370, %cst_119 {dimension_numbers = #tpu.dot_dimension_numbers<[1], [0], [0], [1], [0, 0, 1, 1], [], []>} : vector<8x8xbf16>, vector<8x8xbf16>, vector<8x8xf32> -> vector<8x8xf32>
    %387 = arith.truncf %386 : vector<8x8xf32> to vector<8x8xbf16>
    %388 = vector.extract_strided_slice %315 {offsets = [16, 0], sizes = [8, 32], strides = [1, 1]} : vector<32x32xbf16> to vector<8x32xbf16>
    %cst_120 = arith.constant dense<0.000000e+00> : vector<8x32xf32>
    %389 = tpu.matmul %387, %388, %cst_120 {dimension_numbers = #tpu.dot_dimension_numbers<[1], [0], [0], [1], [0, 0, 1, 1], [], []>} : vector<8x8xbf16>, vector<8x32xbf16>, vector<8x32xf32> -> vector<8x32xf32>
    %390 = arith.addf %367, %389 : vector<8x32xf32>
    %391 = vector.extract_strided_slice %322 {offsets = [0, 24], sizes = [8, 8], strides = [1, 1]} : vector<16x96xbf16> to vector<8x8xbf16>
    %392 = vector.extract_strided_slice %322 {offsets = [0, 56], sizes = [8, 8], strides = [1, 1]} : vector<16x96xbf16> to vector<8x8xbf16>
    %393 = vector.extract_strided_slice %322 {offsets = [0, 88], sizes = [8, 8], strides = [1, 1]} : vector<16x96xbf16> to vector<8x8xbf16>
    %cst_121 = arith.constant dense<0.000000e+00> : vector<8x8xf32>
    %394 = tpu.matmul %391, %392, %cst_121 {dimension_numbers = #tpu.dot_dimension_numbers<[1], [1], [0], [0], [0, 0, 1, 0], [], []>} : vector<8x8xbf16>, vector<8x8xbf16>, vector<8x8xf32> -> vector<8x8xf32>
    %cst_122 = arith.constant 0.353553385 : f32
    %395 = vector.broadcast %cst_122 : f32 to vector<8x8xf32>
    %396 = arith.mulf %394, %395 : vector<8x8xf32>
    %397 = arith.addf %396, %28 : vector<8x8xf32>
    %cst_123 = arith.constant dense<0xFF800000> : vector<8xf32>
    %398 = vector.multi_reduction <maximumf>, %397, %cst_123 [1] : vector<8x8xf32> to vector<8xf32>
    %399 = vector.shape_cast %398 : vector<8xf32> to vector<8x1xf32>
    %400 = vector.broadcast %399 : vector<8x1xf32> to vector<8x8xf32>
    %401 = arith.subf %397, %400 : vector<8x8xf32>
    %402 = math.exp %401 : vector<8x8xf32>
    %cst_124 = arith.constant dense<0.000000e+00> : vector<8xf32>
    %403 = vector.multi_reduction <add>, %402, %cst_124 [1] : vector<8x8xf32> to vector<8xf32>
    %404 = vector.shape_cast %403 : vector<8xf32> to vector<8x1xf32>
    %405 = tpu.reciprocal %404 {approx = true} : vector<8x1xf32> -> vector<8x1xf32>
    %406 = vector.broadcast %405 : vector<8x1xf32> to vector<8x8xf32>
    %407 = arith.mulf %402, %406 : vector<8x8xf32>
    %408 = arith.truncf %407 : vector<8x8xf32> to vector<8x8xbf16>
    %cst_125 = arith.constant dense<0.000000e+00> : vector<8x8xf32>
    %409 = tpu.matmul %408, %393, %cst_125 {dimension_numbers = #tpu.dot_dimension_numbers<[1], [0], [0], [1], [0, 0, 1, 1], [], []>} : vector<8x8xbf16>, vector<8x8xbf16>, vector<8x8xf32> -> vector<8x8xf32>
    %410 = arith.truncf %409 : vector<8x8xf32> to vector<8x8xbf16>
    %411 = vector.extract_strided_slice %315 {offsets = [24, 0], sizes = [8, 32], strides = [1, 1]} : vector<32x32xbf16> to vector<8x32xbf16>
    %cst_126 = arith.constant dense<0.000000e+00> : vector<8x32xf32>
    %412 = tpu.matmul %410, %411, %cst_126 {dimension_numbers = #tpu.dot_dimension_numbers<[1], [0], [0], [1], [0, 0, 1, 1], [], []>} : vector<8x8xbf16>, vector<8x32xbf16>, vector<8x32xf32> -> vector<8x32xf32>
    %413 = arith.addf %390, %412 : vector<8x32xf32>
    %414 = vector.extract_strided_slice %322 {offsets = [8, 0], sizes = [8, 8], strides = [1, 1]} : vector<16x96xbf16> to vector<8x8xbf16>
    %415 = vector.extract_strided_slice %322 {offsets = [8, 32], sizes = [8, 8], strides = [1, 1]} : vector<16x96xbf16> to vector<8x8xbf16>
    %416 = vector.extract_strided_slice %322 {offsets = [8, 64], sizes = [8, 8], strides = [1, 1]} : vector<16x96xbf16> to vector<8x8xbf16>
    %cst_127 = arith.constant dense<0.000000e+00> : vector<8x8xf32>
    %417 = tpu.matmul %414, %415, %cst_127 {dimension_numbers = #tpu.dot_dimension_numbers<[1], [1], [0], [0], [0, 0, 1, 0], [], []>} : vector<8x8xbf16>, vector<8x8xbf16>, vector<8x8xf32> -> vector<8x8xf32>
    %cst_128 = arith.constant 0.353553385 : f32
    %418 = vector.broadcast %cst_128 : f32 to vector<8x8xf32>
    %419 = arith.mulf %417, %418 : vector<8x8xf32>
    %420 = arith.addf %419, %32 : vector<8x8xf32>
    %cst_129 = arith.constant dense<0xFF800000> : vector<8xf32>
    %421 = vector.multi_reduction <maximumf>, %420, %cst_129 [1] : vector<8x8xf32> to vector<8xf32>
    %422 = vector.shape_cast %421 : vector<8xf32> to vector<8x1xf32>
    %423 = vector.broadcast %422 : vector<8x1xf32> to vector<8x8xf32>
    %424 = arith.subf %420, %423 : vector<8x8xf32>
    %425 = math.exp %424 : vector<8x8xf32>
    %cst_130 = arith.constant dense<0.000000e+00> : vector<8xf32>
    %426 = vector.multi_reduction <add>, %425, %cst_130 [1] : vector<8x8xf32> to vector<8xf32>
    %427 = vector.shape_cast %426 : vector<8xf32> to vector<8x1xf32>
    %428 = tpu.reciprocal %427 {approx = true} : vector<8x1xf32> -> vector<8x1xf32>
    %429 = vector.broadcast %428 : vector<8x1xf32> to vector<8x8xf32>
    %430 = arith.mulf %425, %429 : vector<8x8xf32>
    %431 = arith.truncf %430 : vector<8x8xf32> to vector<8x8xbf16>
    %cst_131 = arith.constant dense<0.000000e+00> : vector<8x8xf32>
    %432 = tpu.matmul %431, %416, %cst_131 {dimension_numbers = #tpu.dot_dimension_numbers<[1], [0], [0], [1], [0, 0, 1, 1], [], []>} : vector<8x8xbf16>, vector<8x8xbf16>, vector<8x8xf32> -> vector<8x8xf32>
    %433 = arith.truncf %432 : vector<8x8xf32> to vector<8x8xbf16>
    %434 = vector.extract_strided_slice %315 {offsets = [0, 0], sizes = [8, 32], strides = [1, 1]} : vector<32x32xbf16> to vector<8x32xbf16>
    %cst_132 = arith.constant dense<0.000000e+00> : vector<8x32xf32>
    %435 = tpu.matmul %433, %434, %cst_132 {dimension_numbers = #tpu.dot_dimension_numbers<[1], [0], [0], [1], [0, 0, 1, 1], [], []>} : vector<8x8xbf16>, vector<8x32xbf16>, vector<8x32xf32> -> vector<8x32xf32>
    %436 = vector.extract_strided_slice %322 {offsets = [8, 8], sizes = [8, 8], strides = [1, 1]} : vector<16x96xbf16> to vector<8x8xbf16>
    %437 = vector.extract_strided_slice %322 {offsets = [8, 40], sizes = [8, 8], strides = [1, 1]} : vector<16x96xbf16> to vector<8x8xbf16>
    %438 = vector.extract_strided_slice %322 {offsets = [8, 72], sizes = [8, 8], strides = [1, 1]} : vector<16x96xbf16> to vector<8x8xbf16>
    %cst_133 = arith.constant dense<0.000000e+00> : vector<8x8xf32>
    %439 = tpu.matmul %436, %437, %cst_133 {dimension_numbers = #tpu.dot_dimension_numbers<[1], [1], [0], [0], [0, 0, 1, 0], [], []>} : vector<8x8xbf16>, vector<8x8xbf16>, vector<8x8xf32> -> vector<8x8xf32>
    %cst_134 = arith.constant 0.353553385 : f32
    %440 = vector.broadcast %cst_134 : f32 to vector<8x8xf32>
    %441 = arith.mulf %439, %440 : vector<8x8xf32>
    %442 = arith.addf %441, %32 : vector<8x8xf32>
    %cst_135 = arith.constant dense<0xFF800000> : vector<8xf32>
    %443 = vector.multi_reduction <maximumf>, %442, %cst_135 [1] : vector<8x8xf32> to vector<8xf32>
    %444 = vector.shape_cast %443 : vector<8xf32> to vector<8x1xf32>
    %445 = vector.broadcast %444 : vector<8x1xf32> to vector<8x8xf32>
    %446 = arith.subf %442, %445 : vector<8x8xf32>
    %447 = math.exp %446 : vector<8x8xf32>
    %cst_136 = arith.constant dense<0.000000e+00> : vector<8xf32>
    %448 = vector.multi_reduction <add>, %447, %cst_136 [1] : vector<8x8xf32> to vector<8xf32>
    %449 = vector.shape_cast %448 : vector<8xf32> to vector<8x1xf32>
    %450 = tpu.reciprocal %449 {approx = true} : vector<8x1xf32> -> vector<8x1xf32>
    %451 = vector.broadcast %450 : vector<8x1xf32> to vector<8x8xf32>
    %452 = arith.mulf %447, %451 : vector<8x8xf32>
    %453 = arith.truncf %452 : vector<8x8xf32> to vector<8x8xbf16>
    %cst_137 = arith.constant dense<0.000000e+00> : vector<8x8xf32>
    %454 = tpu.matmul %453, %438, %cst_137 {dimension_numbers = #tpu.dot_dimension_numbers<[1], [0], [0], [1], [0, 0, 1, 1], [], []>} : vector<8x8xbf16>, vector<8x8xbf16>, vector<8x8xf32> -> vector<8x8xf32>
    %455 = arith.truncf %454 : vector<8x8xf32> to vector<8x8xbf16>
    %456 = vector.extract_strided_slice %315 {offsets = [8, 0], sizes = [8, 32], strides = [1, 1]} : vector<32x32xbf16> to vector<8x32xbf16>
    %cst_138 = arith.constant dense<0.000000e+00> : vector<8x32xf32>
    %457 = tpu.matmul %455, %456, %cst_138 {dimension_numbers = #tpu.dot_dimension_numbers<[1], [0], [0], [1], [0, 0, 1, 1], [], []>} : vector<8x8xbf16>, vector<8x32xbf16>, vector<8x32xf32> -> vector<8x32xf32>
    %458 = arith.addf %435, %457 : vector<8x32xf32>
    %459 = vector.extract_strided_slice %322 {offsets = [8, 16], sizes = [8, 8], strides = [1, 1]} : vector<16x96xbf16> to vector<8x8xbf16>
    %460 = vector.extract_strided_slice %322 {offsets = [8, 48], sizes = [8, 8], strides = [1, 1]} : vector<16x96xbf16> to vector<8x8xbf16>
    %461 = vector.extract_strided_slice %322 {offsets = [8, 80], sizes = [8, 8], strides = [1, 1]} : vector<16x96xbf16> to vector<8x8xbf16>
    %cst_139 = arith.constant dense<0.000000e+00> : vector<8x8xf32>
    %462 = tpu.matmul %459, %460, %cst_139 {dimension_numbers = #tpu.dot_dimension_numbers<[1], [1], [0], [0], [0, 0, 1, 0], [], []>} : vector<8x8xbf16>, vector<8x8xbf16>, vector<8x8xf32> -> vector<8x8xf32>
    %cst_140 = arith.constant 0.353553385 : f32
    %463 = vector.broadcast %cst_140 : f32 to vector<8x8xf32>
    %464 = arith.mulf %462, %463 : vector<8x8xf32>
    %465 = arith.addf %464, %32 : vector<8x8xf32>
    %cst_141 = arith.constant dense<0xFF800000> : vector<8xf32>
    %466 = vector.multi_reduction <maximumf>, %465, %cst_141 [1] : vector<8x8xf32> to vector<8xf32>
    %467 = vector.shape_cast %466 : vector<8xf32> to vector<8x1xf32>
    %468 = vector.broadcast %467 : vector<8x1xf32> to vector<8x8xf32>
    %469 = arith.subf %465, %468 : vector<8x8xf32>
    %470 = math.exp %469 : vector<8x8xf32>
    %cst_142 = arith.constant dense<0.000000e+00> : vector<8xf32>
    %471 = vector.multi_reduction <add>, %470, %cst_142 [1] : vector<8x8xf32> to vector<8xf32>
    %472 = vector.shape_cast %471 : vector<8xf32> to vector<8x1xf32>
    %473 = tpu.reciprocal %472 {approx = true} : vector<8x1xf32> -> vector<8x1xf32>
    %474 = vector.broadcast %473 : vector<8x1xf32> to vector<8x8xf32>
    %475 = arith.mulf %470, %474 : vector<8x8xf32>
    %476 = arith.truncf %475 : vector<8x8xf32> to vector<8x8xbf16>
    %cst_143 = arith.constant dense<0.000000e+00> : vector<8x8xf32>
    %477 = tpu.matmul %476, %461, %cst_143 {dimension_numbers = #tpu.dot_dimension_numbers<[1], [0], [0], [1], [0, 0, 1, 1], [], []>} : vector<8x8xbf16>, vector<8x8xbf16>, vector<8x8xf32> -> vector<8x8xf32>
    %478 = arith.truncf %477 : vector<8x8xf32> to vector<8x8xbf16>
    %479 = vector.extract_strided_slice %315 {offsets = [16, 0], sizes = [8, 32], strides = [1, 1]} : vector<32x32xbf16> to vector<8x32xbf16>
    %cst_144 = arith.constant dense<0.000000e+00> : vector<8x32xf32>
    %480 = tpu.matmul %478, %479, %cst_144 {dimension_numbers = #tpu.dot_dimension_numbers<[1], [0], [0], [1], [0, 0, 1, 1], [], []>} : vector<8x8xbf16>, vector<8x32xbf16>, vector<8x32xf32> -> vector<8x32xf32>
    %481 = arith.addf %458, %480 : vector<8x32xf32>
    %482 = vector.extract_strided_slice %322 {offsets = [8, 24], sizes = [8, 8], strides = [1, 1]} : vector<16x96xbf16> to vector<8x8xbf16>
    %483 = vector.extract_strided_slice %322 {offsets = [8, 56], sizes = [8, 8], strides = [1, 1]} : vector<16x96xbf16> to vector<8x8xbf16>
    %484 = vector.extract_strided_slice %322 {offsets = [8, 88], sizes = [8, 8], strides = [1, 1]} : vector<16x96xbf16> to vector<8x8xbf16>
    %cst_145 = arith.constant dense<0.000000e+00> : vector<8x8xf32>
    %485 = tpu.matmul %482, %483, %cst_145 {dimension_numbers = #tpu.dot_dimension_numbers<[1], [1], [0], [0], [0, 0, 1, 0], [], []>} : vector<8x8xbf16>, vector<8x8xbf16>, vector<8x8xf32> -> vector<8x8xf32>
    %cst_146 = arith.constant 0.353553385 : f32
    %486 = vector.broadcast %cst_146 : f32 to vector<8x8xf32>
    %487 = arith.mulf %485, %486 : vector<8x8xf32>
    %488 = arith.addf %487, %32 : vector<8x8xf32>
    %cst_147 = arith.constant dense<0xFF800000> : vector<8xf32>
    %489 = vector.multi_reduction <maximumf>, %488, %cst_147 [1] : vector<8x8xf32> to vector<8xf32>
    %490 = vector.shape_cast %489 : vector<8xf32> to vector<8x1xf32>
    %491 = vector.broadcast %490 : vector<8x1xf32> to vector<8x8xf32>
    %492 = arith.subf %488, %491 : vector<8x8xf32>
    %493 = math.exp %492 : vector<8x8xf32>
    %cst_148 = arith.constant dense<0.000000e+00> : vector<8xf32>
    %494 = vector.multi_reduction <add>, %493, %cst_148 [1] : vector<8x8xf32> to vector<8xf32>
    %495 = vector.shape_cast %494 : vector<8xf32> to vector<8x1xf32>
    %496 = tpu.reciprocal %495 {approx = true} : vector<8x1xf32> -> vector<8x1xf32>
    %497 = vector.broadcast %496 : vector<8x1xf32> to vector<8x8xf32>
    %498 = arith.mulf %493, %497 : vector<8x8xf32>
    %499 = arith.truncf %498 : vector<8x8xf32> to vector<8x8xbf16>
    %cst_149 = arith.constant dense<0.000000e+00> : vector<8x8xf32>
    %500 = tpu.matmul %499, %484, %cst_149 {dimension_numbers = #tpu.dot_dimension_numbers<[1], [0], [0], [1], [0, 0, 1, 1], [], []>} : vector<8x8xbf16>, vector<8x8xbf16>, vector<8x8xf32> -> vector<8x8xf32>
    %501 = arith.truncf %500 : vector<8x8xf32> to vector<8x8xbf16>
    %502 = vector.extract_strided_slice %315 {offsets = [24, 0], sizes = [8, 32], strides = [1, 1]} : vector<32x32xbf16> to vector<8x32xbf16>
    %cst_150 = arith.constant dense<0.000000e+00> : vector<8x32xf32>
    %503 = tpu.matmul %501, %502, %cst_150 {dimension_numbers = #tpu.dot_dimension_numbers<[1], [0], [0], [1], [0, 0, 1, 1], [], []>} : vector<8x8xbf16>, vector<8x32xbf16>, vector<8x32xf32> -> vector<8x32xf32>
    %504 = arith.addf %481, %503 : vector<8x32xf32>
    %505 = tpu.concatenate %413, %504 in 0 : vector<8x32xf32>, vector<8x32xf32> -> vector<16x32xf32>
    %506 = arith.addf %303, %505 : vector<16x32xf32>
    %507 = vector.broadcast %307 : vector<1x32xf32> to vector<16x32xf32>
    %508 = arith.addf %506, %507 : vector<16x32xf32>
    %cst_151 = arith.constant dense<0.000000e+00> : vector<16xf32>
    %509 = vector.multi_reduction <add>, %508, %cst_151 [1] : vector<16x32xf32> to vector<16xf32>
    %510 = vector.shape_cast %509 : vector<16xf32> to vector<16x1xf32>
    %cst_152 = arith.constant 3.200000e+01 : f32
    %511 = vector.broadcast %cst_152 : f32 to vector<16x1xf32>
    %512 = arith.divf %510, %511 : vector<16x1xf32>
    %513 = vector.broadcast %512 : vector<16x1xf32> to vector<16x32xf32>
    %514 = arith.subf %508, %513 : vector<16x32xf32>
    %515 = arith.mulf %514, %514 : vector<16x32xf32>
    %cst_153 = arith.constant dense<0.000000e+00> : vector<16xf32>
    %516 = vector.multi_reduction <add>, %515, %cst_153 [1] : vector<16x32xf32> to vector<16xf32>
    %517 = vector.shape_cast %516 : vector<16xf32> to vector<16x1xf32>
    %cst_154 = arith.constant 3.200000e+01 : f32
    %518 = vector.broadcast %cst_154 : f32 to vector<16x1xf32>
    %519 = arith.divf %517, %518 : vector<16x1xf32>
    %cst_155 = arith.constant 9.99999996E-13 : f32
    %520 = vector.broadcast %cst_155 : f32 to vector<16x1xf32>
    %521 = arith.addf %519, %520 : vector<16x1xf32>
    %522 = math.rsqrt %521 : vector<16x1xf32>
    %523 = vector.broadcast %522 : vector<16x1xf32> to vector<16x32xf32>
    %524 = arith.mulf %514, %523 : vector<16x32xf32>
    %525 = vector.broadcast %308 : vector<1x32xf32> to vector<16x32xf32>
    %526 = arith.mulf %524, %525 : vector<16x32xf32>
    %527 = vector.broadcast %309 : vector<1x32xf32> to vector<16x32xf32>
    %528 = arith.addf %526, %527 : vector<16x32xf32>
    %529 = vector.extract_strided_slice %528 {offsets = [0, 0], sizes = [1, 32], strides = [1, 1]} : vector<16x32xf32> to vector<1x32xf32>
    %530 = vector.extract_strided_slice %528 {offsets = [8, 0], sizes = [1, 32], strides = [1, 1]} : vector<16x32xf32> to vector<1x32xf32>
    %531 = tpu.concatenate %529, %530 in 0 : vector<1x32xf32>, vector<1x32xf32> -> vector<2x32xf32>
    %c1_156 = arith.constant 1 : index
    %c0_157 = arith.constant 0 : index
    %c0_158 = arith.constant 0 : index
    %532 = vector.load %arg6[%c1_156, %c0_157, %c0_158] : memref<2x32x64xbf16, #tpu.memory_space<vmem>>, vector<1x32x64xbf16>
    %533 = vector.shape_cast %532 : vector<1x32x64xbf16> to vector<32x64xbf16>
    %534 = arith.truncf %531 : vector<2x32xf32> to vector<2x32xbf16>
    %cst_159 = arith.constant dense<0.000000e+00> : vector<2x64xf32>
    %535 = tpu.matmul %534, %533, %cst_159 {dimension_numbers = #tpu.dot_dimension_numbers<[1], [0], [0], [1], [0, 0, 1, 1], [], []>} : vector<2x32xbf16>, vector<32x64xbf16>, vector<2x64xf32> -> vector<2x64xf32>
    %536 = vector.broadcast %310 : vector<1x64xf32> to vector<2x64xf32>
    %537 = arith.addf %535, %536 : vector<2x64xf32>
    %cst_160 = arith.constant 5.000000e-01 : f32
    %538 = vector.broadcast %cst_160 : f32 to vector<2x64xf32>
    %539 = arith.mulf %538, %537 : vector<2x64xf32>
    %cst_161 = arith.constant 4.471500e-02 : f32
    %540 = vector.broadcast %cst_161 : f32 to vector<2x64xf32>
    %541 = arith.mulf %540, %537 : vector<2x64xf32>
    %542 = arith.mulf %541, %537 : vector<2x64xf32>
    %543 = arith.mulf %542, %537 : vector<2x64xf32>
    %544 = arith.addf %537, %543 : vector<2x64xf32>
    %cst_162 = arith.constant 0.797884583 : f32
    %545 = vector.broadcast %cst_162 : f32 to vector<2x64xf32>
    %546 = arith.mulf %545, %544 : vector<2x64xf32>
    %547 = math.tanh %546 : vector<2x64xf32>
    %cst_163 = arith.constant 1.000000e+00 : f32
    %548 = vector.broadcast %cst_163 : f32 to vector<2x64xf32>
    %549 = arith.addf %548, %547 : vector<2x64xf32>
    %550 = arith.mulf %539, %549 : vector<2x64xf32>
    %c1_164 = arith.constant 1 : index
    %c0_165 = arith.constant 0 : index
    %c0_166 = arith.constant 0 : index
    %551 = vector.load %arg7[%c1_164, %c0_165, %c0_166] : memref<2x64x32xbf16, #tpu.memory_space<vmem>>, vector<1x64x32xbf16>
    %552 = vector.shape_cast %551 : vector<1x64x32xbf16> to vector<64x32xbf16>
    %553 = arith.truncf %550 : vector<2x64xf32> to vector<2x64xbf16>
    %cst_167 = arith.constant dense<0.000000e+00> : vector<2x32xf32>
    %554 = tpu.matmul %553, %552, %cst_167 {dimension_numbers = #tpu.dot_dimension_numbers<[1], [0], [0], [1], [0, 0, 1, 1], [], []>} : vector<2x64xbf16>, vector<64x32xbf16>, vector<2x32xf32> -> vector<2x32xf32>
    %555 = vector.broadcast %311 : vector<1x32xf32> to vector<2x32xf32>
    %556 = arith.addf %554, %555 : vector<2x32xf32>
    %557 = arith.addf %531, %556 : vector<2x32xf32>
    %cst_168 = arith.constant dense<0.000000e+00> : vector<2xf32>
    %558 = vector.multi_reduction <add>, %557, %cst_168 [1] : vector<2x32xf32> to vector<2xf32>
    %559 = vector.shape_cast %558 : vector<2xf32> to vector<2x1xf32>
    %cst_169 = arith.constant 3.200000e+01 : f32
    %560 = vector.broadcast %cst_169 : f32 to vector<2x1xf32>
    %561 = arith.divf %559, %560 : vector<2x1xf32>
    %562 = vector.broadcast %561 : vector<2x1xf32> to vector<2x32xf32>
    %563 = arith.subf %557, %562 : vector<2x32xf32>
    %564 = arith.mulf %563, %563 : vector<2x32xf32>
    %cst_170 = arith.constant dense<0.000000e+00> : vector<2xf32>
    %565 = vector.multi_reduction <add>, %564, %cst_170 [1] : vector<2x32xf32> to vector<2xf32>
    %566 = vector.shape_cast %565 : vector<2xf32> to vector<2x1xf32>
    %cst_171 = arith.constant 3.200000e+01 : f32
    %567 = vector.broadcast %cst_171 : f32 to vector<2x1xf32>
    %568 = arith.divf %566, %567 : vector<2x1xf32>
    %cst_172 = arith.constant 9.99999996E-13 : f32
    %569 = vector.broadcast %cst_172 : f32 to vector<2x1xf32>
    %570 = arith.addf %568, %569 : vector<2x1xf32>
    %571 = math.rsqrt %570 : vector<2x1xf32>
    %572 = vector.broadcast %571 : vector<2x1xf32> to vector<2x32xf32>
    %573 = arith.mulf %563, %572 : vector<2x32xf32>
    %574 = vector.broadcast %312 : vector<1x32xf32> to vector<2x32xf32>
    %575 = arith.mulf %573, %574 : vector<2x32xf32>
    %576 = vector.broadcast %313 : vector<1x32xf32> to vector<2x32xf32>
    %577 = arith.addf %575, %576 : vector<2x32xf32>
    %c0_173 = arith.constant 0 : index
    %c0_174 = arith.constant 0 : index
    %578 = vector.load %arg9[%c0_173, %c0_174] : memref<2x32xf32, #tpu.memory_space<vmem>>, vector<2x32xf32>
    tpu.vector_store %arg9[%c0_173, %c0_174], %577 {strides = array<i32>} : memref<2x32xf32, #tpu.memory_space<vmem>>, vector<2x32xf32>,
    return
  }
  func.func @transform_0(%arg0: i32) -> (i32, i32, i32) {
    %c0_i32 = arith.constant 0 : i32
    %c0_i32_0 = arith.constant 0 : i32
    %c0_i32_1 = arith.constant 0 : i32
    %c0_i32_2 = arith.constant 0 : i32
    return %c0_i32, %c0_i32_0, %c0_i32_1 : i32, i32, i32
  }
  func.func @transform_1(%arg0: i32) -> (i32, i32, i32) {
    %c0_i32 = arith.constant 0 : i32
    %c0_i32_0 = arith.constant 0 : i32
    %c0_i32_1 = arith.constant 0 : i32
    %c0_i32_2 = arith.constant 0 : i32
    return %c0_i32, %c0_i32_0, %c0_i32_1 : i32, i32, i32
  }
  func.func @transform_2(%arg0: i32) -> (i32, i32) {
    %c0_i32 = arith.constant 0 : i32
    %c0_i32_0 = arith.constant 0 : i32
    %c0_i32_1 = arith.constant 0 : i32
    return %c0_i32, %c0_i32_0 : i32, i32
  }
  func.func @transform_3(%arg0: i32) -> (i32, i32, i32) {
    %c0_i32 = arith.constant 0 : i32
    %c0_i32_0 = arith.constant 0 : i32
    %c0_i32_1 = arith.constant 0 : i32
    %c0_i32_2 = arith.constant 0 : i32
    return %c0_i32, %c0_i32_0, %c0_i32_1 : i32, i32, i32
  }
  func.func @transform_4(%arg0: i32) -> (i32, i32, i32) {
    %c0_i32 = arith.constant 0 : i32
    %c0_i32_0 = arith.constant 0 : i32
    %c0_i32_1 = arith.constant 0 : i32
    %c0_i32_2 = arith.constant 0 : i32
    return %c0_i32, %c0_i32_0, %c0_i32_1 : i32, i32, i32
  }
  func.func @transform_5(%arg0: i32) -> (i32, i32, i32) {
    %c0_i32 = arith.constant 0 : i32
    %c0_i32_0 = arith.constant 0 : i32
    %c0_i32_1 = arith.constant 0 : i32
    %c0_i32_2 = arith.constant 0 : i32
    return %c0_i32, %c0_i32_0, %c0_i32_1 : i32, i32, i32
  }
  func.func @transform_6(%arg0: i32) -> (i32, i32, i32) {
    %c0_i32 = arith.constant 0 : i32
    %c0_i32_0 = arith.constant 0 : i32
    %c0_i32_1 = arith.constant 0 : i32
    %c0_i32_2 = arith.constant 0 : i32
    return %c0_i32, %c0_i32_0, %c0_i32_1 : i32, i32, i32
  }
  func.func @transform_7(%arg0: i32) -> (i32, i32, i32) {
    %c0_i32 = arith.constant 0 : i32
    %c0_i32_0 = arith.constant 0 : i32
    %c0_i32_1 = arith.constant 0 : i32
    %c0_i32_2 = arith.constant 0 : i32
    return %c0_i32, %c0_i32_0, %c0_i32_1 : i32, i32, i32
  }
  func.func @transform_8(%arg0: i32) -> (i32, i32) {
    %c0_i32 = arith.constant 0 : i32
    %c0_i32_0 = arith.constant 0 : i32
    %c0_i32_1 = arith.constant 0 : i32
    return %c0_i32, %c0_i32_0 : i32, i32
  }
}

</mosaic_0001>

<bundles_post_ra>
// kernel: hf_encoder_forward.1
= control target key start
LH: loop header
LB: loop body
LE: loop exit
PB: predicated region body
PF: predicated region fallthrough
CT: control target
= control target key end

     0   :  { %vm34_vm0 = vcmask 261120   ;;  %s4699_s0 = inlined_call_operand.vmem [shape: f32[2,8,32], index: 0, kind: input, shape index: {}]   ;;  %s4700_s1 = inlined_call_operand.vmem [shape: f32[2,1,8], index: 1, kind: input, shape index: {}]   ;;  %s4701_s2 = inlined_call_operand.vmem [shape: f32[2,32], index: 2, kind: input, shape index: {}]   ;;  %s4702_s3 = inlined_call_operand.vmem [shape: bf16[2,32,96], index: 3, kind: input, shape index: {}]   ;;  %s4703_s4 = inlined_call_operand.vmem [shape: bf16[2,32,32], index: 4, kind: input, shape index: {}]   ;;  %s4704_s5 = inlined_call_operand.vmem [shape: bf16[2,32,64], index: 5, kind: input, shape index: {}]   ;;  %s4705_s6 = inlined_call_operand.vmem [shape: bf16[2,64,32], index: 6, kind: input, shape index: {}]   ;;  %s4706_s7 = inlined_call_operand.vmem [shape: f32[2,8,96], index: 7, kind: input, shape index: {}]   ;;  %s4707_s8 = inlined_call_operand.hbm [shape: f32[2,32], index: 8, kind: output, shape index: {}]  }
   0x1   :  { %v31_v0 = vld [vmem:[%s4699_s0] sm:$0xff]  ;;  %v32_v1 = vld [vmem:[%s4699_s0 + $0x8] sm:$0xff] }
   0x2   :  { %v35_v2 = vsel %vm34_vm0, %v31_v0, 0.0  ;;  %v38_v3 = vsel %vm34_vm0, %v32_v1, 0.0 }
   0x3   :  { %36 = vadd.xlane.f32.xlu0 %v35_v2 }
   0x7   :  { %39 = vadd.xlane.f32.xlu0 %v38_v3 }
   0x8   :  { %13 = vsyncpa [#allocation3], 0  ;;  %v3827_v14 = vld [vmem:[%s4702_s3 + $0x8] sm:$0xff]   ;;  %v3957_v15 = vmov 0.0   ;;  %vm3958_vm1 = vmmov 0   ;;  %v3828_v16 = vld [vmem:[%s4702_s3] sm:$0xff]   ;;  %v62_v23 = vlaneseq }
   0x9   :  { %3469 = vmatprep.subr.bf16.mxu1 %v3957_v15  ;;  %3473 = vmatprep.mubr.msk.bf16.mxu1 %vm3958_vm1, %v3957_v15  ;;  %v33_v26 = vld [vmem:[%s4701_s2] sm:$0x3]  ;;  %s3959_s15 = smov 88   ;;  %s3960_s16 = smov 96   ;;  %vm163_vm2 = vcmask 64512   ;;  %vm229_vm3 = vcmask 1043456  }
   0xa   :  { %3470 = vmatpush3.bf16.msra.mxu1 %v3827_v14  ;;  %3483 = vmatprep.subr.bf16.mxu0 %v3957_v15  ;;  %v4040_v24 = vshrl.u32 %v62_v23, 7  ;;  %v4065_v39 = vld [vmem:[%s4706_s7] sm:$0xff]  ;;  %s3961_s17 = smov 120   ;;  %s3962_s20 = smov 64   ;;  %vm1590_vm4 = vcmask 523264   ;;  %vm3060_vm5 = vcmask 1040384  }
   0xb   :  { %3471 = vmatprep.subr.bf16.mxu1 %v3957_v15  ;;  %3485 = vmatprep.mubr.msk.bf16.mxu0 %vm3958_vm1, %v3957_v15  ;;  %v4091_v54 = vld [vmem:[%s4700_s1] ss:$0 sm:$0xff]  ;;  %s3963_s21 = smov 80   ;;  %s3964_s22 = smov 112   ;;  %vm3218_vm6 = vcmask 254976  }
   0xc   :  { %v4043_v25 = vsub.s32 0, %v4040_v24  ;;  %v4050_v30 = vsub.s32 1, %v4040_v24  ;;  %s3965_s23 = smov 56   ;;  %s3966_s28 = smov 72  }
   0xd   :  { %s3967_s29 = smov 104   ;;  %s3968_s30 = smov 48  }
   0xe   :  { %3472 = vmatpush3.bf16.msra.mxu1 %v3828_v16  ;;  %v65_v29 = vrot.slane %v33_v26, %v4043_v25  ;;  %v71_v34 = vrot.slane %v33_v26, %v4050_v30  ;;  %v102_v41 = vrot.slane %v4065_v39, %v4043_v25  ;;  %s3969_s10 = smov 40   ;;  %s3970_s25 = smov [#allocation2]  }
   0xf   :  { %3477 = vmatprep.subr.bf16.mxu1 %v3957_v15 }
  0x8c   :  { %v37_v4 = vpop.xlane.xlu0 %36 }
  0x8d   :  { %v42_v5 = vmul.f32 0.03125, %v37_v4 }
  0x8f   :  { %v44_v6 = vsub.f32 %v31_v0, %v42_v5 }
  0x90   :  { %v40_v7 = vpop.xlane.xlu0 %39 }
  0x91   :  { %v43_v8 = vmul.f32 0.03125, %v40_v7  ;;  %v46_v9 = vmul.f32 %v44_v6, %v44_v6 }
  0x93   :  { %v45_v10 = vsub.f32 %v32_v1, %v43_v8  ;;  %v48_v11 = vsel %vm34_vm0, %v46_v9, 0.0 }
  0x94   :  { %49 = vadd.xlane.f32.xlu1 %v48_v11 }
  0x95   :  { %v47_v12 = vmul.f32 %v45_v10, %v45_v10 }
  0x97   :  { %v51_v13 = vsel %vm34_vm0, %v47_v12, 0.0 }
  0x98   :  { %52 = vadd.xlane.f32.xlu1 %v51_v13 }
 0x11d   :  { %v50_v17 = vpop.xlane.xlu1 %49 }
 0x11e   :  { %v54_v18 = vmul.f32 0.03125, %v50_v17 }
 0x120   :  { %v56_v19 = vadd.f32 1e-12, %v54_v18 }
 0x121   :  { %v53_v20 = vpop.xlane.xlu1 %52 }
 0x122   :  { %3843 = vrsqrt.f32 %v56_v19  ;;  %v55_v21 = vmul.f32 0.03125, %v53_v20 }
 0x124   :  { %v57_v22 = vadd.f32 1e-12, %v55_v21 }
 0x126   :  { %3845 = vrsqrt.f32 %v57_v22 }
 0x12f   :  { %v3844_v27 = vpop.eup %3843 }
 0x130   :  { %v60_v28 = vmul.f32 %v3844_v27, %v44_v6 }
 0x132   :  { %v66_v33 = vmul.f32 %v65_v29, %v60_v28 }
 0x133   :  { %v3846_v31 = vpop.eup %3845 }
 0x134   :  { %v61_v32 = vmul.f32 %v3846_v31, %v45_v10  ;;  %v4053_v36 = vadd.f32 %v71_v34, %v66_v33 }
 0x136   :  { %v67_v35 = vmul.f32 %v65_v29, %v61_v32  ;;  %v90_v29 = vld [vmem:[%s4703_s4] sm:$0xf]  ;;  %v91_v32 = vld [vmem:[%s4703_s4 + $0x4] sm:$0xf] }
 0x137   :  { %v4121_v31 = vsel %vm229_vm3, %v90_v29, 0  ;;  %v4129_v33 = vsel %vm229_vm3, %v91_v32, 0 }
 0x138   :  { %v4055_v37 = vadd.f32 %v71_v34, %v67_v35 }
 0x13a   :  { %v98_v38 = vpack.c.bf16 %v4055_v37, %v4053_v36 }
 0x13c   :  { %3474 = vmatmul.mubr.msk.bf16.vlgmr.msra.gmra.mxu1 %vm34_vm0, %v98_v38 }
 0x13d   :  { %3479 = vmatprep.mubr.msk.bf16.mxu1 %vm3958_vm1, %v3957_v15 }
 0x1fc   :  { %v152_v40 = vpop.f32.mrf.mxu1 }
 0x1fd   :  { %v153_v44 = vadd.f32 %v152_v40, %v102_v41 }
 0x1fe   :  { %v3475_v42 = vpop.f32.mrf.mxu1 }
 0x200   :  { %v155_v43 = vpop.f32.mrf.mxu1 }
 0x201   :  { %v156_v45 = vadd.f32 %v155_v43, %v102_v41 }
 0x202   :  { %v3476_v46 = vpop.f32.mrf.mxu1 }
 0x203   :  { %v4069_v47 = vpack.c.bf16 %v156_v45, %v153_v44 }
 0x205   :  { %276 = vrot.lane.b32.xlu1 %v4069_v47, %s3959_s15  ;;  %161 = vrot.lane.b32.xlu0 %v4069_v47, %s3960_s16 }
 0x209   :  { %274 = vrot.lane.b32.xlu1 %v4069_v47, %s3961_s17 }
 0x277   :  { %v162_v48 = vpop.permute.xlu0 %161  ;;  %v277_v50 = vpop.permute.xlu1 %276 }
 0x278   :  { %v168_v49 = vsel %vm163_vm2, %v162_v48, 0  ;;  %v282_v51 = vsel %vm163_vm2, %v277_v50, 0 }
 0x279   :  { %3478 = vmatpush3.bf16.xpose.msra.mxu1 %v168_v49 }
 0x27a   :  { %3489 = vmatprep.subr.bf16.mxu1 %v3957_v15 }
 0x27b   :  { %v275_v52 = vpop.permute.xlu1 %274 }
 0x280   :  { %3480 = vmatmul.mubr.msk.bf16.vlgmr.msra.gmra.mxu1 %vm163_vm2, %v4069_v47 }
 0x281   :  { %3490 = vmatpush3.bf16.xpose.msra.mxu1 %v282_v51  ;;  %3491 = vmatprep.mubr.msk.bf16.mxu1 %vm3958_vm1, %v3957_v15 }
 0x282   :  { %3501 = vmatprep.subr.bf16.mxu1 %v3957_v15 }
 0x288   :  { %3492 = vmatmul.mubr.msk.bf16.vlgmr.msra.gmra.mxu1 %vm163_vm2, %v275_v52 }
 0x289   :  { %3503 = vmatprep.mubr.msk.bf16.mxu1 %vm3958_vm1, %v3957_v15  ;;  %3502 = vmatpush3.bf16.msra.mxu1 %v4129_v33 }
 0x28a   :  { %3513 = vmatprep.subr.bf16.mxu1 %v3957_v15 }
 0x340   :  { %v204_v53 = vpop.f32.mrf.mxu1 }
 0x341   :  { %v210_v55 = vmul.f32 0.35355338, %v204_v53 }
 0x342   :  { %v3481_v56 = vpop.f32.mrf.mxu1 }
 0x343   :  { %v211_v57 = vadd.f32 %v4091_v54, %v210_v55 }
 0x344   :  { %v207_v58 = vpop.f32.mrf.mxu1 }
 0x345   :  { %v212_v59 = vsel %vm163_vm2, %v211_v57, -inf }
 0x346   :  { %213 = vmax.xlane.f32.xlu1 %v212_v59  ;;  %v3482_v60 = vpop.f32.mrf.mxu1 }
 0x348   :  { %v318_v61 = vpop.f32.mrf.mxu1 }
 0x349   :  { %v324_v62 = vmul.f32 0.35355338, %v318_v61 }
 0x34a   :  { %v3493_v63 = vpop.f32.mrf.mxu1 }
 0x34b   :  { %v325_v0 = vadd.f32 %v4091_v54, %v324_v62 }
 0x34c   :  { %v321_v1 = vpop.f32.mrf.mxu1 }
 0x34d   :  { %v326_v2 = vsel %vm163_vm2, %v325_v0, -inf }
 0x34e   :  { %327 = vmax.xlane.f32.xlu0 %v326_v2  ;;  %v3494_v3 = vpop.f32.mrf.mxu1 }
 0x357   :  { %224 = vrot.lane.b32.xlu1 %v4069_v47, %s3962_s20 }
 0x35b   :  { %481 = vrot.lane.b32.xlu1 %v4069_v47, %s3963_s21 }
 0x35f   :  { %479 = vrot.lane.b32.xlu1 %v4069_v47, %s3964_s22 }
 0x3cf   :  { %v214_v4 = vpop.xlane.xlu1 %213 }
 0x3d0   :  { %v215_v5 = vsub.f32 %v211_v57, %v214_v4 }
 0x3d2   :  { %v216_v6 = vmul.f32 1.442695, %v215_v5 }
 0x3d3   :  { %v225_v7 = vpop.permute.xlu1 %224 }
 0x3d4   :  { %3847 = vpow2.f32 %v216_v6  ;;  %v231_v8 = vsel %vm229_vm3, %v225_v7, 0 }
 0x3d5   :  { %3484 = vmatpush3.bf16.msra.mxu0 %v231_v8 }
 0x3d6   :  { %3495 = vmatprep.subr.bf16.mxu0 %v3957_v15 }
 0x3d7   :  { %v328_v9 = vpop.xlane.xlu0 %327  ;;  %v482_v42 = vpop.permute.xlu1 %481 }
 0x3d8   :  { %v329_v10 = vsub.f32 %v325_v0, %v328_v9  ;;  %v487_v46 = vsel %vm163_vm2, %v482_v42, 0 }
 0x3da   :  { %v330_v11 = vmul.f32 1.442695, %v329_v10 }
 0x3db   :  { %v480_v50 = vpop.permute.xlu1 %479 }
 0x3dc   :  { %3849 = vpow2.f32 %v330_v11 }
 0x3e1   :  { %v3848_v12 = vpop.eup %3847 }
 0x3e2   :  { %v218_v13 = vsel %vm163_vm2, %v3848_v12, 0.0 }
 0x3e3   :  { %219 = vadd.xlane.f32.xlu0 %v218_v13 }
 0x3e9   :  { %v3850_v14 = vpop.eup %3849 }
 0x3ea   :  { %v332_v16 = vsel %vm163_vm2, %v3850_v14, 0.0 }
 0x3eb   :  { %333 = vadd.xlane.f32.xlu0 %v332_v16 }
 0x401   :  { %338 = vrot.lane.b32.xlu0 %v4069_v47, %s3965_s23 }
 0x46c   :  { %v220_v17 = vpop.xlane.xlu0 %219 }
 0x46d   :  { %3851 = vrcp.f32 %v220_v17 }
 0x474   :  { %v334_v18 = vpop.xlane.xlu0 %333 }
 0x475   :  { %3853 = vrcp.f32 %v334_v18 }
 0x478   :  { %v339_v21 = vpop.permute.xlu0 %338 }
 0x479   :  { %v344_v23 = vsel %vm229_vm3, %v339_v21, 0 }
 0x47a   :  { %v3852_v19 = vpop.eup %3851 }
 0x47b   :  { %v222_v20 = vmul.f32 %v3852_v19, %v3848_v12  ;;  %v92_v19 = vld [vmem:[%s4703_s4 + $0x8] sm:$0xf] }
 0x47d   :  { %v223_v22 = vpack.c.bf16 %v222_v20, %v222_v20  ;;  %v4169_v20 = vsel %vm229_vm3, %v92_v19, 0 }
 0x47f   :  { %3486 = vmatmul.mubr.msk.bf16.vlgmr.msra.gmra.mxu0 %vm163_vm2, %v223_v22 }
 0x480   :  { %3496 = vmatpush3.bf16.msra.mxu0 %v344_v23  ;;  %3497 = vmatprep.mubr.msk.bf16.mxu0 %vm3958_vm1, %v3957_v15 }
 0x481   :  { %3507 = vmatprep.subr.bf16.mxu0 %v3957_v15 }
 0x482   :  { %v3854_v26 = vpop.eup %3853 }
 0x483   :  { %v336_v27 = vmul.f32 %v3854_v26, %v3850_v14 }
 0x485   :  { %v337_v28 = vpack.c.bf16 %v336_v27, %v336_v27 }
 0x487   :  { %3498 = vmatmul.mubr.msk.bf16.vlgmr.msra.gmra.mxu0 %vm163_vm2, %v337_v28 }
 0x488   :  { %3509 = vmatprep.mubr.msk.bf16.mxu0 %vm3958_vm1, %v3957_v15  ;;  %3508 = vmatpush3.bf16.msra.mxu0 %v4121_v31 }
 0x489   :  { %3519 = vmatprep.subr.bf16.mxu0 %v3957_v15 }
 0x53f   :  { %v267_v34 = vpop.f32.mrf.mxu0 }
 0x540   :  { %v273_v35 = vpack.c.bf16 %v267_v34, %v267_v34 }
 0x541   :  { %v3487_v38 = vpop.f32.mrf.mxu0 }
 0x542   :  { %3510 = vmatmul.mubr.msk.bf16.vlgmr.msra.gmra.mxu0 %vm163_vm2, %v273_v35 }
 0x543   :  { %v270_v40 = vpop.f32.mrf.mxu0  ;;  %3521 = vmatprep.mubr.msk.bf16.mxu0 %vm3958_vm1, %v3957_v15 }
 0x545   :  { %v3488_v41 = vpop.f32.mrf.mxu0 }
 0x546   :  { %v4181_v41 = vrot.slane %v4069_v47, 4 }
 0x547   :  { %v380_v43 = vpop.f32.mrf.mxu0 }
 0x548   :  { %v386_v44 = vpack.c.bf16 %v380_v43, %v380_v43 }
 0x549   :  { %v3499_v45 = vpop.f32.mrf.mxu0 }
 0x54a   :  { %3504 = vmatmul.mubr.msk.bf16.vlgmr.msra.gmra.mxu1 %vm163_vm2, %v386_v44 }
 0x54b   :  { %3514 = vmatpush3.bf16.xpose.msra.mxu1 %v487_v46  ;;  %v383_v48 = vpop.f32.mrf.mxu0  ;;  %3515 = vmatprep.mubr.msk.bf16.mxu1 %vm3958_vm1, %v3957_v15 }
 0x54c   :  { %3525 = vmatprep.subr.bf16.mxu1 %v3957_v15 }
 0x54d   :  { %v3500_v49 = vpop.f32.mrf.mxu0 }
 0x552   :  { %3516 = vmatmul.mubr.msk.bf16.vlgmr.msra.gmra.mxu1 %vm163_vm2, %v480_v50 }
 0x553   :  { %3527 = vmatprep.mubr.msk.bf16.mxu1 %vm3958_vm1, %v3957_v15  ;;  %3526 = vmatpush3.bf16.msra.mxu1 %v4169_v20 }
 0x554   :  { %3537 = vmatprep.subr.bf16.mxu1 %v3957_v15 }
 0x602   :  { %v473_v51 = vpop.f32.mrf.mxu0 }
 0x604   :  { %v3511_v52 = vpop.f32.mrf.mxu0 }
 0x606   :  { %v476_v53 = vpop.f32.mrf.mxu0 }
 0x608   :  { %v3512_v55 = vpop.f32.mrf.mxu0 }
 0x60a   :  { %v427_v56 = vpop.f32.mrf.mxu1 }
 0x60b   :  { %v4144_v57 = vadd.f32 %v473_v51, %v427_v56 }
 0x60c   :  { %v3505_v58 = vpop.f32.mrf.mxu1 }
 0x60e   :  { %v430_v59 = vpop.f32.mrf.mxu1 }
 0x610   :  { %v3506_v60 = vpop.f32.mrf.mxu1 }
 0x612   :  { %v523_v61 = vpop.f32.mrf.mxu1 }
 0x613   :  { %v529_v62 = vmul.f32 0.35355338, %v523_v61 }
 0x614   :  { %v3517_v63 = vpop.f32.mrf.mxu1 }
 0x615   :  { %v530_v0 = vadd.f32 %v4091_v54, %v529_v62  ;;  %v93_v63 = vld [vmem:[%s4703_s4 + $0xc] sm:$0xf] }
 0x616   :  { %v526_v1 = vpop.f32.mrf.mxu1 }
 0x617   :  { %v531_v2 = vsel %vm163_vm2, %v530_v0, -inf }
 0x618   :  { %532 = vmax.xlane.f32.xlu1 %v531_v2  ;;  %v3518_v3 = vpop.f32.mrf.mxu1 }
 0x629   :  { %641 = vrot.lane.b32.xlu1 %v4069_v47, %s3966_s28 }
 0x62d   :  { %639 = vrot.lane.b32.xlu1 %v4069_v47, %s3967_s29 }
 0x6a1   :  { %v533_v4 = vpop.xlane.xlu1 %532 }
 0x6a2   :  { %v534_v5 = vsub.f32 %v530_v0, %v533_v4  ;;  %v4215_v0 = vsel %vm229_vm3, %v93_v63, 0 }
 0x6a4   :  { %v535_v6 = vmul.f32 1.442695, %v534_v5 }
 0x6a5   :  { %v642_v14 = vpop.permute.xlu1 %641 }
 0x6a6   :  { %3855 = vpow2.f32 %v535_v6  ;;  %v647_v17 = vsel %vm163_vm2, %v642_v14, 0  ;;  %v4225_v6 = vld [vmem:[%s4700_s1 + $0x1] ss:$0 sm:$0xff] }
 0x6a9   :  { %v640_v18 = vpop.permute.xlu1 %639 }
 0x6b3   :  { %v3856_v7 = vpop.eup %3855 }
 0x6b4   :  { %v537_v8 = vsel %vm163_vm2, %v3856_v7, 0.0 }
 0x6b5   :  { %538 = vadd.xlane.f32.xlu0 %v537_v8 }
 0x6cb   :  { %543 = vrot.lane.b32.xlu0 %v4069_v47, %s3968_s30 }
 0x73e   :  { %v539_v9 = vpop.xlane.xlu0 %538 }
 0x73f   :  { %3857 = vrcp.f32 %v539_v9 }
 0x742   :  { %v544_v10 = vpop.permute.xlu0 %543 }
 0x743   :  { %v549_v11 = vsel %vm229_vm3, %v544_v10, 0 }
 0x744   :  { %3520 = vmatpush3.bf16.msra.mxu0 %v549_v11 }
 0x745   :  { %3531 = vmatprep.subr.bf16.mxu0 %v3957_v15 }
 0x74c   :  { %v3858_v12 = vpop.eup %3857 }
 0x74d   :  { %v541_v13 = vmul.f32 %v3858_v12, %v3856_v7 }
 0x74f   :  { %v542_v16 = vpack.c.bf16 %v541_v13, %v541_v13 }
 0x751   :  { %3522 = vmatmul.mubr.msk.bf16.vlgmr.msra.gmra.mxu0 %vm163_vm2, %v542_v16 }
 0x752   :  { %3532 = vmatpush3.bf16.xpose.msra.mxu0 %v647_v17  ;;  %3533 = vmatprep.mubr.msk.bf16.mxu0 %vm3958_vm1, %v3957_v15 }
 0x753   :  { %3543 = vmatprep.subr.bf16.mxu0 %v3957_v15 }
 0x759   :  { %3534 = vmatmul.mubr.msk.bf16.vlgmr.msra.gmra.mxu0 %vm163_vm2, %v640_v18 }
 0x75a   :  { %3545 = vmatprep.mubr.msk.bf16.mxu0 %vm3958_vm1, %v3957_v15  ;;  %3544 = vmatpush3.bf16.msra.mxu0 %v4215_v0 }
 0x75b   :  { %3555 = vmatprep.subr.bf16.mxu0 %v3957_v15 }
 0x811   :  { %v585_v21 = vpop.f32.mrf.mxu0 }
 0x812   :  { %v591_v22 = vpack.c.bf16 %v585_v21, %v585_v21 }
 0x813   :  { %v3523_v23 = vpop.f32.mrf.mxu0 }
 0x814   :  { %3528 = vmatmul.mubr.msk.bf16.vlgmr.msra.gmra.mxu1 %vm163_vm2, %v591_v22 }
 0x815   :  { %v588_v26 = vpop.f32.mrf.mxu0  ;;  %3539 = vmatprep.mubr.msk.bf16.mxu1 %vm3958_vm1, %v3957_v15 }
 0x817   :  { %v3524_v27 = vpop.f32.mrf.mxu0 }
 0x819   :  { %v683_v28 = vpop.f32.mrf.mxu0 }
 0x81a   :  { %v689_v29 = vmul.f32 0.35355338, %v683_v28 }
 0x81b   :  { %v3535_v32 = vpop.f32.mrf.mxu0 }
 0x81c   :  { %v690_v34 = vadd.f32 %v4091_v54, %v689_v29 }
 0x81d   :  { %v686_v35 = vpop.f32.mrf.mxu0 }
 0x81e   :  { %v691_v38 = vsel %vm163_vm2, %v690_v34, -inf }
 0x81f   :  { %692 = vmax.xlane.f32.xlu0 %v691_v38  ;;  %v3536_v40 = vpop.f32.mrf.mxu0 }
 0x835   :  { %703 = vrot.lane.b32.xlu0 %v4069_v47, %s3969_s10 }
 0x839   :  { %913 = vrot.lane.b32.xlu0 %v4181_v41, %s3959_s15 }
 0x8a8   :  { %v693_v42 = vpop.xlane.xlu0 %692 }
 0x8a9   :  { %v694_v43 = vsub.f32 %v690_v34, %v693_v42 }
 0x8ab   :  { %v695_v44 = vmul.f32 1.442695, %v694_v43 }
 0x8ac   :  { %v704_v45 = vpop.permute.xlu0 %703 }
 0x8ad   :  { %3859 = vpow2.f32 %v695_v44  ;;  %v709_v54 = vsel %vm229_vm3, %v704_v45, 0 }
 0x8ae   :  { %3538 = vmatpush3.bf16.msra.mxu1 %v709_v54 }
 0x8af   :  { %3549 = vmatprep.subr.bf16.mxu1 %v3957_v15 }
 0x8ba   :  { %v3860_v46 = vpop.eup %3859 }
 0x8bb   :  { %v697_v48 = vsel %vm163_vm2, %v3860_v46, 0.0 }
 0x8bc   :  { %698 = vadd.xlane.f32.xlu1 %v697_v48 }
 0x8cd   :  { %800 = vrot.lane.b32.xlu1 %v4181_v41, %s3960_s16 }
 0x8d1   :  { %911 = vrot.lane.b32.xlu1 %v4181_v41, %s3961_s17 }
 0x8d4   :  { %v632_v47 = vpop.f32.mrf.mxu1 }
 0x8d5   :  { %v4193_v49 = vadd.f32 %v632_v47, %v4144_v57  ;;  %v914_v57 = vpop.permute.xlu0 %913 }
 0x8d6   :  { %v3529_v50 = vpop.f32.mrf.mxu1  ;;  %v919_v61 = vsel %vm163_vm2, %v914_v57, 0 }
 0x8d8   :  { %v635_v51 = vpop.f32.mrf.mxu1 }
 0x8da   :  { %v3530_v52 = vpop.f32.mrf.mxu1 }
 0x945   :  { %v699_v53 = vpop.xlane.xlu1 %698 }
 0x946   :  { %3861 = vrcp.f32 %v699_v53 }
 0x949   :  { %v801_v58 = vpop.permute.xlu1 %800 }
 0x94a   :  { %v806_v60 = vsel %vm163_vm2, %v801_v58, 0 }
 0x94d   :  { %v912_v62 = vpop.permute.xlu1 %911 }
 0x953   :  { %v3862_v55 = vpop.eup %3861 }
 0x954   :  { %v701_v56 = vmul.f32 %v3862_v55, %v3860_v46 }
 0x956   :  { %v702_v59 = vpack.c.bf16 %v701_v56, %v701_v56 }
 0x958   :  { %3540 = vmatmul.mubr.msk.bf16.vlgmr.msra.gmra.mxu1 %vm163_vm2, %v702_v59 }
 0x959   :  { %3550 = vmatpush3.bf16.xpose.msra.mxu1 %v806_v60  ;;  %3551 = vmatprep.mubr.msk.bf16.mxu1 %vm3958_vm1, %v3957_v15 }
 0x95a   :  { %3561 = vmatprep.subr.bf16.mxu1 %v3957_v15 }
 0x960   :  { %3552 = vmatmul.mubr.msk.bf16.vlgmr.msra.gmra.mxu1 %vm163_vm2, %v4181_v41 }
 0x961   :  { %3562 = vmatpush3.bf16.xpose.msra.mxu1 %v919_v61  ;;  %3563 = vmatprep.mubr.msk.bf16.mxu1 %vm3958_vm1, %v3957_v15 }
 0x962   :  { %3573 = vmatprep.subr.bf16.mxu1 %v3957_v15 }
 0x968   :  { %3564 = vmatmul.mubr.msk.bf16.vlgmr.msra.gmra.mxu1 %vm163_vm2, %v912_v62 }
 0x969   :  { %3574 = vmatpush3.bf16.msra.mxu1 %v4129_v33  ;;  %3575 = vmatprep.mubr.msk.bf16.mxu1 %vm3958_vm1, %v3957_v15 }
 0x96a   :  { %3585 = vmatprep.subr.bf16.mxu1 %v3957_v15 }
 0xa18   :  { %v745_v1 = vpop.f32.mrf.mxu1 }
 0xa19   :  { %v751_v2 = vpack.c.bf16 %v745_v1, %v745_v1 }
 0xa1a   :  { %v3541_v3 = vpop.f32.mrf.mxu1 }
 0xa1b   :  { %3546 = vmatmul.mubr.msk.bf16.vlgmr.msra.gmra.mxu0 %vm163_vm2, %v751_v2 }
 0xa1c   :  { %v748_v33 = vpop.f32.mrf.mxu1  ;;  %3557 = vmatprep.mubr.msk.bf16.mxu0 %vm3958_vm1, %v3957_v15 }
 0xa1e   :  { %v3542_v4 = vpop.f32.mrf.mxu1 }
 0xa20   :  { %v842_v5 = vpop.f32.mrf.mxu1 }
 0xa21   :  { %v848_v7 = vmul.f32 0.35355338, %v842_v5 }
 0xa22   :  { %v3553_v8 = vpop.f32.mrf.mxu1 }
 0xa23   :  { %v849_v9 = vadd.f32 %v4225_v6, %v848_v7 }
 0xa24   :  { %v845_v10 = vpop.f32.mrf.mxu1 }
 0xa25   :  { %v850_v11 = vsel %vm163_vm2, %v849_v9, -inf }
 0xa26   :  { %851 = vmax.xlane.f32.xlu0 %v850_v11  ;;  %v3554_v12 = vpop.f32.mrf.mxu1 }
 0xa28   :  { %v955_v13 = vpop.f32.mrf.mxu1 }
 0xa29   :  { %v961_v14 = vmul.f32 0.35355338, %v955_v13 }
 0xa2a   :  { %v3565_v16 = vpop.f32.mrf.mxu1 }
 0xa2b   :  { %v962_v17 = vadd.f32 %v4225_v6, %v961_v14 }
 0xa2c   :  { %v958_v18 = vpop.f32.mrf.mxu1 }
 0xa2d   :  { %v963_v19 = vsel %vm163_vm2, %v962_v17, -inf }
 0xa2e   :  { %964 = vmax.xlane.f32.xlu1 %v963_v19  ;;  %v3566_v21 = vpop.f32.mrf.mxu1 }
 0xa3f   :  { %975 = vrot.lane.b32.xlu1 %v4181_v41, %s3965_s23 }
 0xa43   :  { %1112 = vrot.lane.b32.xlu1 %v4181_v41, %s3963_s21 }
 0xa47   :  { %1110 = vrot.lane.b32.xlu1 %v4181_v41, %s3964_s22 }
 0xaaf   :  { %v852_v22 = vpop.xlane.xlu0 %851 }
 0xab0   :  { %v853_v23 = vsub.f32 %v849_v9, %v852_v22 }
 0xab2   :  { %v854_v26 = vmul.f32 1.442695, %v853_v23 }
 0xab4   :  { %3863 = vpow2.f32 %v854_v26 }
 0xab7   :  { %v965_v27 = vpop.xlane.xlu1 %964 }
 0xab8   :  { %v966_v28 = vsub.f32 %v962_v17, %v965_v27 }
 0xaba   :  { %v967_v29 = vmul.f32 1.442695, %v966_v28 }
 0xabc   :  { %3865 = vpow2.f32 %v967_v29 }
 0xac1   :  { %v3864_v32 = vpop.eup %3863 }
 0xac2   :  { %v856_v34 = vsel %vm163_vm2, %v3864_v32, 0.0 }
 0xac3   :  { %857 = vadd.xlane.f32.xlu0 %v856_v34 }
 0xac9   :  { %v3866_v35 = vpop.eup %3865 }
 0xaca   :  { %v969_v38 = vsel %vm163_vm2, %v3866_v35, 0.0 }
 0xacb   :  { %970 = vadd.xlane.f32.xlu0 %v969_v38 }
 0xadb   :  { %v792_v40 = vpop.f32.mrf.mxu0 }
 0xadc   :  { %v4240_v42 = vadd.f32 %v792_v40, %v4193_v49  ;;  %v976_v49 = vpop.permute.xlu1 %975 }
 0xadd   :  { %v3547_v43 = vpop.f32.mrf.mxu0  ;;  %v981_v53 = vsel %vm229_vm3, %v976_v49, 0 }
 0xadf   :  { %v795_v44 = vpop.f32.mrf.mxu0 }
 0xae0   :  { %v1113_v63 = vpop.permute.xlu1 %1112 }
 0xae1   :  { %v3548_v45 = vpop.f32.mrf.mxu0  ;;  %862 = vrot.lane.b32.xlu0 %v4181_v41, %s3962_s20 }
 0xae4   :  { %v1111_v5 = vpop.permute.xlu1 %1110 }
 0xb4c   :  { %v858_v54 = vpop.xlane.xlu0 %857 }
 0xb4d   :  { %3867 = vrcp.f32 %v858_v54 }
 0xb54   :  { %v971_v46 = vpop.xlane.xlu0 %970 }
 0xb55   :  { %3869 = vrcp.f32 %v971_v46 }
 0xb58   :  { %v863_v48 = vpop.permute.xlu0 %862 }
 0xb59   :  { %v868_v47 = vsel %vm229_vm3, %v863_v48, 0 }
 0xb5a   :  { %v3868_v50 = vpop.eup %3867  ;;  %3556 = vmatpush3.bf16.msra.mxu0 %v868_v47 }
 0xb5b   :  { %3567 = vmatprep.subr.bf16.mxu0 %v3957_v15  ;;  %v860_v51 = vmul.f32 %v3868_v50, %v3864_v32 }
 0xb5d   :  { %v861_v52 = vpack.c.bf16 %v860_v51, %v860_v51 }
 0xb5f   :  { %3558 = vmatmul.mubr.msk.bf16.vlgmr.msra.gmra.mxu0 %vm163_vm2, %v861_v52 }
 0xb60   :  { %3568 = vmatpush3.bf16.msra.mxu0 %v981_v53  ;;  %3569 = vmatprep.mubr.msk.bf16.mxu0 %vm3958_vm1, %v3957_v15  ;;  %v1424_v53 = vadd.f32 %v4240_v42, %v4053_v36 }
 0xb61   :  { %3579 = vmatprep.subr.bf16.mxu0 %v3957_v15 }
 0xb62   :  { %v3870_v55 = vpop.eup %3869 }
 0xb63   :  { %v973_v56 = vmul.f32 %v3870_v55, %v3866_v35  ;;  %v1429_v55 = vrot.slane %v4065_v39, %v4050_v30 }
 0xb65   :  { %v974_v58 = vpack.c.bf16 %v973_v56, %v973_v56 }
 0xb67   :  { %3570 = vmatmul.mubr.msk.bf16.vlgmr.msra.gmra.mxu0 %vm163_vm2, %v974_v58 }
 0xb68   :  { %3580 = vmatpush3.bf16.msra.mxu0 %v4121_v31  ;;  %3581 = vmatprep.mubr.msk.bf16.mxu0 %vm3958_vm1, %v3957_v15  ;;  %v1118_v31 = vsel %vm163_vm2, %v1113_v63, 0 }
 0xb69   :  { %3591 = vmatprep.subr.bf16.mxu0 %v3957_v15 }
 0xc1f   :  { %v904_v59 = vpop.f32.mrf.mxu0 }
 0xc20   :  { %v910_v60 = vpack.c.bf16 %v904_v59, %v904_v59 }
 0xc21   :  { %v3559_v57 = vpop.f32.mrf.mxu0 }
 0xc22   :  { %3582 = vmatmul.mubr.msk.bf16.vlgmr.msra.gmra.mxu0 %vm163_vm2, %v910_v60  ;;  %v1430_v57 = vadd.f32 %v1429_v55, %v1424_v53 }
 0xc23   :  { %v907_v61 = vpop.f32.mrf.mxu0  ;;  %3593 = vmatprep.mubr.msk.bf16.mxu0 %vm3958_vm1, %v3957_v15 }
 0xc25   :  { %v3560_v62 = vpop.f32.mrf.mxu0 }
 0xc26   :  { %v1432_v62 = vsel %vm34_vm0, %v1430_v57, 0.0 }
 0xc27   :  { %v1017_v1 = vpop.f32.mrf.mxu0 }
 0xc28   :  { %v1023_v2 = vpack.c.bf16 %v1017_v1, %v1017_v1 }
 0xc29   :  { %v3571_v3 = vpop.f32.mrf.mxu0 }
 0xc2a   :  { %3576 = vmatmul.mubr.msk.bf16.vlgmr.msra.gmra.mxu1 %vm163_vm2, %v1023_v2 }
 0xc2b   :  { %3586 = vmatpush3.bf16.xpose.msra.mxu1 %v1118_v31  ;;  %v1020_v33 = vpop.f32.mrf.mxu0  ;;  %3587 = vmatprep.mubr.msk.bf16.mxu1 %vm3958_vm1, %v3957_v15 }
 0xc2c   :  { %3597 = vmatprep.subr.bf16.mxu1 %v3957_v15 }
 0xc2d   :  { %v3572_v4 = vpop.f32.mrf.mxu0 }
 0xc32   :  { %3588 = vmatmul.mubr.msk.bf16.vlgmr.msra.gmra.mxu1 %vm163_vm2, %v1111_v5 }
 0xc33   :  { %3598 = vmatpush3.bf16.msra.mxu1 %v4169_v20  ;;  %3599 = vmatprep.mubr.msk.bf16.mxu1 %vm3958_vm1, %v3957_v15 }
 0xc34   :  { %3609 = vmatprep.subr.bf16.mxu1 %v3957_v15 }
 0xce2   :  { %v1104_v7 = vpop.f32.mrf.mxu0 }
 0xce4   :  { %v3583_v8 = vpop.f32.mrf.mxu0 }
 0xce6   :  { %v1107_v9 = vpop.f32.mrf.mxu0 }
 0xce8   :  { %v3584_v10 = vpop.f32.mrf.mxu0 }
 0xcea   :  { %v1061_v11 = vpop.f32.mrf.mxu1 }
 0xceb   :  { %v4269_v12 = vadd.f32 %v1104_v7, %v1061_v11 }
 0xcec   :  { %v3577_v13 = vpop.f32.mrf.mxu1 }
 0xcee   :  { %v1064_v14 = vpop.f32.mrf.mxu1 }
 0xcf0   :  { %v3578_v16 = vpop.f32.mrf.mxu1 }
 0xcf2   :  { %v1154_v17 = vpop.f32.mrf.mxu1 }
 0xcf3   :  { %v1160_v18 = vmul.f32 0.35355338, %v1154_v17 }
 0xcf4   :  { %v3589_v19 = vpop.f32.mrf.mxu1 }
 0xcf5   :  { %v1161_v20 = vadd.f32 %v4225_v6, %v1160_v18 }
 0xcf6   :  { %v1157_v21 = vpop.f32.mrf.mxu1 }
 0xcf7   :  { %v1162_v22 = vsel %vm163_vm2, %v1161_v20, -inf }
 0xcf8   :  { %1163 = vmax.xlane.f32.xlu0 %v1162_v22  ;;  %v3590_v23 = vpop.f32.mrf.mxu1 }
 0xd0e   :  { %1174 = vrot.lane.b32.xlu0 %v4181_v41, %s3968_s30 }
 0xd12   :  { %1267 = vrot.lane.b32.xlu0 %v4181_v41, %s3967_s29 }
 0xd81   :  { %v1164_v26 = vpop.xlane.xlu0 %1163 }
 0xd82   :  { %v1165_v27 = vsub.f32 %v1161_v20, %v1164_v26 }
 0xd84   :  { %v1166_v28 = vmul.f32 1.442695, %v1165_v27 }
 0xd85   :  { %v1175_v29 = vpop.permute.xlu0 %1174 }
 0xd86   :  { %3871 = vpow2.f32 %v1166_v28  ;;  %v1180_v32 = vsel %vm229_vm3, %v1175_v29, 0 }
 0xd87   :  { %3592 = vmatpush3.bf16.msra.mxu0 %v1180_v32 }
 0xd88   :  { %3603 = vmatprep.subr.bf16.mxu0 %v3957_v15 }
 0xd89   :  { %v1268_v46 = vpop.permute.xlu0 %1267 }
 0xd93   :  { %v3872_v34 = vpop.eup %3871 }
 0xd94   :  { %v1168_v35 = vsel %vm163_vm2, %v3872_v34, 0.0 }
 0xd95   :  { %1169 = vadd.xlane.f32.xlu1 %v1168_v35 }
 0xda6   :  { %1269 = vrot.lane.b32.xlu1 %v4181_v41, %s3966_s28 }
 0xe1e   :  { %v1170_v38 = vpop.xlane.xlu1 %1169 }
 0xe1f   :  { %3873 = vrcp.f32 %v1170_v38 }
 0xe22   :  { %v1270_v44 = vpop.permute.xlu1 %1269 }
 0xe23   :  { %v1275_v54 = vsel %vm163_vm2, %v1270_v44, 0 }
 0xe2c   :  { %v3874_v40 = vpop.eup %3873 }
 0xe2d   :  { %v1172_v43 = vmul.f32 %v3874_v40, %v3872_v34 }
 0xe2f   :  { %v1173_v45 = vpack.c.bf16 %v1172_v43, %v1172_v43 }
 0xe31   :  { %3594 = vmatmul.mubr.msk.bf16.vlgmr.msra.gmra.mxu0 %vm163_vm2, %v1173_v45  ;;  %v3830_v45 = vld [vmem:[%s4704_s5] sm:$0xff]  }
 0xe32   :  { %3604 = vmatpush3.bf16.xpose.msra.mxu0 %v1275_v54  ;;  %3605 = vmatprep.mubr.msk.bf16.mxu0 %vm3958_vm1, %v3957_v15 }
 0xe33   :  { %3615 = vmatprep.subr.bf16.mxu0 %v3957_v15 }
 0xe39   :  { %3606 = vmatmul.mubr.msk.bf16.vlgmr.msra.gmra.mxu0 %vm163_vm2, %v1268_v46 }
 0xe3a   :  { %3616 = vmatpush3.bf16.msra.mxu0 %v4215_v0  ;;  %3617 = vmatprep.mubr.msk.bf16.mxu0 %vm3958_vm1, %v3957_v15 }
 0xe3b   :  { %3629 = vmatprep.subr.bf16.mxu0 %v3957_v15 }
 0xef1   :  { %v1216_v48 = vpop.f32.mrf.mxu0 }
 0xef2   :  { %v1222_v47 = vpack.c.bf16 %v1216_v48, %v1216_v48 }
 0xef3   :  { %v3595_v50 = vpop.f32.mrf.mxu0 }
 0xef4   :  { %3600 = vmatmul.mubr.msk.bf16.vlgmr.msra.gmra.mxu1 %vm163_vm2, %v1222_v47 }
 0xef5   :  { %v1219_v51 = vpop.f32.mrf.mxu0  ;;  %3611 = vmatprep.mubr.msk.bf16.mxu1 %vm3958_vm1, %v3957_v15 }
 0xef7   :  { %v3596_v49 = vpop.f32.mrf.mxu0 }
 0xef8   :  { %v1460_v49 = vsub.s32 2, %v4040_v24 }
 0xef9   :  { %v1311_v52 = vpop.f32.mrf.mxu0 }
 0xefa   :  { %v1317_v0 = vmul.f32 0.35355338, %v1311_v52 }
 0xefb   :  { %v3607_v56 = vpop.f32.mrf.mxu0 }
 0xefc   :  { %v1318_v58 = vadd.f32 %v4225_v6, %v1317_v0  ;;  %v1461_v0 = vrot.slane %v4065_v39, %v1460_v49 }
 0xefd   :  { %v1314_v59 = vpop.f32.mrf.mxu0 }
 0xefe   :  { %v1319_v60 = vsel %vm163_vm2, %v1318_v58, -inf }
 0xeff   :  { %1320 = vmax.xlane.f32.xlu1 %v1319_v60  ;;  %v3608_v61 = vpop.f32.mrf.mxu0 }
 0xf03   :  { %1433 = vadd.xlane.f32.xlu1 %v1432_v62 }
 0xf88   :  { %v1321_v63 = vpop.xlane.xlu1 %1320 }
 0xf89   :  { %v1322_v1 = vsub.f32 %v1318_v58, %v1321_v63 }
 0xf8b   :  { %v1323_v2 = vmul.f32 1.442695, %v1322_v1  ;;  %v3831_v1 = vld [vmem:[%s4705_s6 + $0x18] sm:$0xff]  }
 0xf8c   :  { %v1434_v17 = vpop.xlane.xlu1 %1433 }
 0xf8d   :  { %3875 = vpow2.f32 %v1323_v2  ;;  %v1438_v18 = vmul.f32 0.03125, %v1434_v17  ;;  %v3832_v2 = vld [vmem:[%s4705_s6 + $0x10] sm:$0xff]  }
 0xf8f   :  { %v1440_v22 = vsub.f32 %v1430_v57, %v1438_v18 }
 0xf91   :  { %v1442_v32 = vmul.f32 %v1440_v22, %v1440_v22 }
 0xf93   :  { %v1444_v34 = vsel %vm34_vm0, %v1442_v32, 0.0  ;;  %v3931_v32 = vld [vmem:[%s4706_s7] sm:$0xff] }
 0xf9a   :  { %v3876_v36 = vpop.eup %3875 }
 0xf9b   :  { %v1325_v42 = vsel %vm163_vm2, %v3876_v36, 0.0 }
 0xf9c   :  { %1326 = vadd.xlane.f32.xlu0 %v1325_v42  ;;  %v3834_v42 = vld [vmem:[%s4705_s6] sm:$0xff]  }
 0xfb2   :  { %1331 = vrot.lane.b32.xlu0 %v4181_v41, %s3969_s10 }
 0xfb4   :  { %v1260_v6 = vpop.f32.mrf.mxu1 }
 0xfb5   :  { %v1266_v3 = vadd.f32 %v1260_v6, %v4269_v12  ;;  %v1477_v6 = vsub.s32 4, %v4040_v24 }
 0xfb6   :  { %v3601_v31 = vpop.f32.mrf.mxu1 }
 0xfb8   :  { %v1263_v33 = vpop.f32.mrf.mxu1 }
 0xfba   :  { %v3602_v4 = vpop.f32.mrf.mxu1 }
0x1025   :  { %v1327_v5 = vpop.xlane.xlu0 %1326 }
0x1026   :  { %3877 = vrcp.f32 %v1327_v5 }
0x1029   :  { %v1332_v7 = vpop.permute.xlu0 %1331 }
0x102a   :  { %v1337_v8 = vsel %vm229_vm3, %v1332_v7, 0 }
0x102b   :  { %3610 = vmatpush3.bf16.msra.mxu1 %v1337_v8 }
0x102c   :  { %3621 = vmatprep.subr.bf16.mxu1 %v3957_v15 }
0x1033   :  { %v3878_v9 = vpop.eup %3877 }
0x1034   :  { %v1329_v10 = vmul.f32 %v3878_v9, %v3876_v36  ;;  %v3833_v36 = vld [vmem:[%s4705_s6 + $0x8] sm:$0xff]  }
0x1036   :  { %v1330_v11 = vpack.c.bf16 %v1329_v10, %v1329_v10 }
0x1038   :  { %3612 = vmatmul.mubr.msk.bf16.vlgmr.msra.gmra.mxu1 %vm163_vm2, %v1330_v11 }
0x1039   :  { %3625 = vmatprep.mubr.msk.bf16.mxu1 %vm3958_vm1, %v3957_v15 }
0x10f8   :  { %v1373_v41 = vpop.f32.mrf.mxu1 }
0x10f9   :  { %v1379_v12 = vpack.c.bf16 %v1373_v41, %v1373_v41 }
0x10fa   :  { %v3613_v13 = vpop.f32.mrf.mxu1 }
0x10fb   :  { %3618 = vmatmul.mubr.msk.bf16.vlgmr.msra.gmra.mxu0 %vm163_vm2, %v1379_v12 }
0x10fc   :  { %v1376_v14 = vpop.f32.mrf.mxu1  ;;  %3637 = vmatprep.mubr.msk.bf16.mxu0 %vm3958_vm1, %v3957_v15  ;;  %3630 = vmatpush3.bf16.msra.mxu0 %v3831_v1 }
0x10fd   :  { %3631 = vmatprep.subr.bf16.mxu0 %v3957_v15 }
0x10fe   :  { %v3614_v16 = vpop.f32.mrf.mxu1 }
0x1100   :  { %3632 = vmatpush3.bf16.msra.mxu0 %v3832_v2 }
0x1101   :  { %3633 = vmatprep.subr.bf16.mxu0 %v3957_v15 }
0x1104   :  { %3634 = vmatpush3.bf16.msra.mxu0 %v3833_v36 }
0x1105   :  { %3635 = vmatprep.subr.bf16.mxu0 %v3957_v15 }
0x1108   :  { %3636 = vmatpush3.bf16.msra.mxu0 %v3834_v42 }
0x1109   :  { %3655 = vmatprep.subr.bf16.mxu0 %v3957_v15 }
0x11bb   :  { %v1417_v19 = vpop.f32.mrf.mxu0 }
0x11bc   :  { %v1423_v20 = vadd.f32 %v1417_v19, %v1266_v3  ;;  %v1478_v3 = vrot.slane %v4065_v39, %v1477_v6 }
0x11bd   :  { %v3619_v21 = vpop.f32.mrf.mxu0 }
0x11be   :  { %v1425_v23 = vadd.f32 %v1423_v20, %v4055_v37  ;;  %v3829_v37 = vld [vmem:[%s4704_s5 + $0x8] sm:$0xff]  }
0x11bf   :  { %v1420_v26 = vpop.f32.mrf.mxu0  ;;  %3622 = vmatpush3.bf16.msra.mxu1 %v3829_v37 }
0x11c0   :  { %v1431_v27 = vadd.f32 %v1429_v55, %v1425_v23  ;;  %3623 = vmatprep.subr.bf16.mxu1 %v3957_v15  ;;  %v1466_v55 = vsub.s32 3, %v4040_v24 }
0x11c1   :  { %v3620_v28 = vpop.f32.mrf.mxu0 }
0x11c2   :  { %v1435_v29 = vsel %vm34_vm0, %v1431_v27, 0.0  ;;  %v1467_v60 = vrot.slane %v4065_v39, %v1466_v55 }
0x11c3   :  { %1436 = vadd.xlane.f32.xlu1 %v1435_v29  ;;  %3624 = vmatpush3.bf16.msra.mxu1 %v3830_v45  ;;  %v1564_v29 = vsub.s32 5, %v4040_v24 }
0x11c4   :  { %3641 = vmatprep.subr.bf16.mxu1 %v3957_v15 }
0x11c7   :  { %1445 = vadd.xlane.f32.xlu1 %v1444_v34  ;;  %v1565_v34 = vrot.slane %v3931_v32, %v1564_v29 }
0x124c   :  { %v1437_v35 = vpop.xlane.xlu1 %1436 }
0x124d   :  { %v1439_v38 = vmul.f32 0.03125, %v1437_v35 }
0x124f   :  { %v1441_v40 = vsub.f32 %v1431_v27, %v1439_v38 }
0x1250   :  { %v1446_v54 = vpop.xlane.xlu1 %1445 }
0x1251   :  { %v1443_v43 = vmul.f32 %v1441_v40, %v1441_v40  ;;  %v1450_v46 = vmul.f32 0.03125, %v1446_v54 }
0x1253   :  { %v1447_v44 = vsel %vm34_vm0, %v1443_v43, 0.0  ;;  %v1452_v48 = vadd.f32 1e-12, %v1450_v46 }
0x1254   :  { %1448 = vadd.xlane.f32.xlu1 %v1447_v44 }
0x1255   :  { %3879 = vrsqrt.f32 %v1452_v48 }
0x1262   :  { %v3880_v52 = vpop.eup %3879 }
0x1263   :  { %v1456_v53 = vmul.f32 %v3880_v52, %v1440_v22 }
0x1265   :  { %v1462_v59 = vmul.f32 %v1461_v0, %v1456_v53 }
0x1267   :  { %v1468_v61 = vadd.f32 %v1467_v60, %v1462_v59 }
0x12dd   :  { %v1449_v47 = vpop.xlane.xlu1 %1448 }
0x12de   :  { %v1451_v50 = vmul.f32 0.03125, %v1449_v47 }
0x12e0   :  { %v1453_v51 = vadd.f32 1e-12, %v1451_v50 }
0x12e2   :  { %3881 = vrsqrt.f32 %v1453_v51 }
0x12ef   :  { %v3882_v56 = vpop.eup %3881 }
0x12f0   :  { %v1457_v58 = vmul.f32 %v3882_v56, %v1441_v40 }
0x12f2   :  { %v1463_v57 = vmul.f32 %v1461_v0, %v1457_v58 }
0x12f4   :  { %v1469_v62 = vadd.f32 %v1467_v60, %v1463_v57  ;;  %v3835_v57 = vld [vmem:[%s4702_s3 + $0x18] sm:$0xff]  }
0x12f6   :  { %v1474_v63 = vpack.c.bf16 %v1469_v62, %v1468_v61 }
0x12f8   :  { %3626 = vmatmul.mubr.msk.bf16.vlgmr.msra.gmra.mxu1 %vm34_vm0, %v1474_v63 }
0x12f9   :  { %3645 = vmatprep.mubr.msk.bf16.mxu1 %vm3958_vm1, %v3957_v15  ;;  %3642 = vmatpush3.bf16.msra.mxu1 %v3835_v57 }
0x12fa   :  { %3643 = vmatprep.subr.bf16.mxu1 %v3957_v15 }
0x13b8   :  { %v1528_v31 = vpop.f32.mrf.mxu1 }
0x13b9   :  { %v1529_v33 = vadd.f32 %v1528_v31, %v1478_v3 }
0x13ba   :  { %v3627_v4 = vpop.f32.mrf.mxu1 }
0x13bb   :  { %v1537_v5 = vmul.f32 0.044715, %v1529_v33  ;;  %v1535_v21 = vmul.f32 0.5, %v1529_v33 }
0x13bc   :  { %v1531_v7 = vpop.f32.mrf.mxu1 }
0x13bd   :  { %v1539_v8 = vmul.f32 %v1537_v5, %v1529_v33  ;;  %v1532_v9 = vadd.f32 %v1531_v7, %v1478_v3  ;;  %v1665_v3 = vsub.s32 6, %v4040_v24  ;;  %v1671_v5 = vsub.s32 7, %v4040_v24 }
0x13be   :  { %v3628_v10 = vpop.f32.mrf.mxu1 }
0x13bf   :  { %v1541_v11 = vmul.f32 %v1539_v8, %v1529_v33  ;;  %v1538_v41 = vmul.f32 0.044715, %v1532_v9  ;;  %v1536_v22 = vmul.f32 0.5, %v1532_v9  ;;  %v1666_v4 = vrot.slane %v3931_v32, %v1665_v3 }
0x13c0   :  { %v1672_v10 = vrot.slane %v3931_v32, %v1671_v5 }
0x13c1   :  { %v1543_v12 = vadd.f32 %v1541_v11, %v1529_v33  ;;  %v1540_v13 = vmul.f32 %v1538_v41, %v1532_v9 }
0x13c3   :  { %v1545_v14 = vmul.f32 0.7978846, %v1543_v12  ;;  %v1542_v16 = vmul.f32 %v1540_v13, %v1532_v9 }
0x13c5   :  { %3883 = vtanh.f32 %v1545_v14  ;;  %v1544_v17 = vadd.f32 %v1542_v16, %v1532_v9  ;;  %v4396_v14 = vld [vmem:[%s4706_s7 + $0x8] sm:$0xff] }
0x13c7   :  { %v1546_v18 = vmul.f32 0.7978846, %v1544_v17  ;;  %v1691_v17 = vrot.slane %v4396_v14, %v4043_v25 }
0x13c9   :  { %3885 = vtanh.f32 %v1546_v18 }
0x13d2   :  { %v3884_v19 = vpop.eup %3883 }
0x13d3   :  { %v1549_v39 = vadd.f32 1.0, %v3884_v19 }
0x13d5   :  { %v1551_v26 = vmul.f32 %v1549_v39, %v1535_v21 }
0x13d6   :  { %v3886_v20 = vpop.eup %3885 }
0x13d7   :  { %v1550_v23 = vadd.f32 1.0, %v3886_v20 }
0x13d9   :  { %v1552_v27 = vmul.f32 %v1550_v23, %v1536_v22 }
0x13db   :  { %v1561_v28 = vpack.c.bf16 %v1552_v27, %v1551_v26 }
0x13dd   :  { %3638 = vmatmul.mubr.msk.bf16.vlgmr.msra.gmra.mxu0 %vm1590_vm4, %v1561_v28 }
0x13de   :  { %3657 = vmatprep.mubr.msk.bf16.mxu0 %vm3958_vm1, %v3957_v15 }
0x149d   :  { %v1628_v35 = vpop.f32.mrf.mxu0 }
0x149e   :  { %v1629_v38 = vadd.f32 %v1628_v35, %v1565_v34 }
0x149f   :  { %v3639_v40 = vpop.f32.mrf.mxu0 }
0x14a0   :  { %v1635_v43 = vadd.f32 %v1629_v38, %v1468_v61  ;;  %v3836_v61 = vld [vmem:[%s4702_s3 + $0x10] sm:$0xff]   ;;  %v4422_v38 = vld [vmem:[%s4700_s1] ss:$0 sm:$0xff]  ;;  %s3249_s3 = sshll.u32 %s3970_s25, 4  ;;  %s3250_s3 = int_to_ptr.vmem [resolvable:$true] %s3249_s3 }
0x14a1   :  { %v1631_v44 = vpop.f32.mrf.mxu0  ;;  %3644 = vmatpush3.bf16.msra.mxu1 %v3836_v61  ;;  %s3935_s26 = scalar_lea.vmem %s3250_s3, 32  ;;  %p3940_p1 = scmp.lt.s32.totalorder %s3250_s3, %s3250_s3 }
0x14a2   :  { %v1632_v37 = vadd.f32 %v1631_v44, %v1565_v34  ;;  %v1637_v45 = vsel %vm34_vm0, %v1635_v43, 0.0  ;;  %3649 = vmatprep.subr.bf16.mxu1 %v3957_v15  ;;  %p3936_p0 = scmp.ne.s32.totalorder %s3250_s3, %s3935_s26  ;;  %p3941_p2 = scmp.lt.s32.totalorder %s3935_s26, %s3935_s26 }
0x14a3   :  { %1638 = vadd.xlane.f32.xlu1 %v1637_v45  ;;  %v3640_v54 = vpop.f32.mrf.mxu0 }
0x14a4   :  { %v1636_v46 = vadd.f32 %v1632_v37, %v1469_v62  ;;  %p3942_p3 = por %p3941_p2, %p3940_p1 }
0x14a6   :  { %v1640_v48 = vsel %vm34_vm0, %v1636_v46, 0.0  ;;  %p3943_p4 = pnand %p3942_p3, %p3936_p0 }
0x14a7   :  { %1641 = vadd.xlane.f32.xlu0 %v1640_v48 }
0x152c   :  { %v1639_v47 = vpop.xlane.xlu1 %1638 }
0x152d   :  { %v1643_v50 = vmul.f32 0.03125, %v1639_v47 }
0x152f   :  { %v1645_v51 = vsub.f32 %v1635_v43, %v1643_v50 }
0x1530   :  { %v1642_v52 = vpop.xlane.xlu0 %1641 }
0x1531   :  { %v1644_v53 = vmul.f32 0.03125, %v1642_v52  ;;  %v1647_v0 = vmul.f32 %v1645_v51, %v1645_v51 }
0x1533   :  { %v1646_v56 = vsub.f32 %v1636_v46, %v1644_v53  ;;  %v1649_v58 = vsel %vm34_vm0, %v1647_v0, 0.0 }
0x1534   :  { %1650 = vadd.xlane.f32.xlu1 %v1649_v58 }
0x1535   :  { %v1648_v59 = vmul.f32 %v1646_v56, %v1646_v56 }
0x1537   :  { %v1652_v60 = vsel %vm34_vm0, %v1648_v59, 0.0 }
0x1538   :  { %1653 = vadd.xlane.f32.xlu1 %v1652_v60 }
0x15bd   :  { %v1651_v62 = vpop.xlane.xlu1 %1650 }
0x15be   :  { %v1655_v63 = vmul.f32 0.03125, %v1651_v62 }
0x15c0   :  { %v1657_v1 = vadd.f32 1e-12, %v1655_v63 }
0x15c1   :  { %v1654_v2 = vpop.xlane.xlu1 %1653 }
0x15c2   :  { %3887 = vrsqrt.f32 %v1657_v1  ;;  %v1656_v36 = vmul.f32 0.03125, %v1654_v2 }
0x15c4   :  { %v1658_v42 = vadd.f32 1e-12, %v1656_v36 }
0x15c6   :  { %3889 = vrsqrt.f32 %v1658_v42 }
0x15cf   :  { %v3888_v31 = vpop.eup %3887 }
0x15d0   :  { %v1661_v33 = vmul.f32 %v3888_v31, %v1645_v51 }
0x15d2   :  { %v1667_v9 = vmul.f32 %v1666_v4, %v1661_v33 }
0x15d3   :  { %v3890_v7 = vpop.eup %3889 }
0x15d4   :  { %v1662_v8 = vmul.f32 %v3890_v7, %v1646_v56  ;;  %v4384_v41 = vadd.f32 %v1672_v10, %v1667_v9 }
0x15d6   :  { %v1668_v11 = vmul.f32 %v1666_v4, %v1662_v8 }
0x15d8   :  { %v4386_v12 = vadd.f32 %v1672_v10, %v1668_v11  ;;  %v3296_v11 = vld [vmem:[%s4703_s4 + $0x10] sm:$0xf] }
0x15da   :  { %v1687_v13 = vpack.c.bf16 %v4386_v12, %v4384_v41 }
0x15dc   :  { %3646 = vmatmul.mubr.msk.bf16.vlgmr.msra.gmra.mxu1 %vm34_vm0, %v1687_v13  ;;  %v4452_v13 = vsel %vm229_vm3, %v3296_v11, 0 }
0x15dd   :  { %3651 = vmatprep.mubr.msk.bf16.mxu1 %vm3958_vm1, %v3957_v15 }
0x169c   :  { %v1741_v16 = vpop.f32.mrf.mxu1 }
0x169d   :  { %v1742_v39 = vadd.f32 %v1741_v16, %v1691_v17  ;;  %v3297_v16 = vld [vmem:[%s4703_s4 + $0x14] sm:$0xf] }
0x169e   :  { %v3647_v18 = vpop.f32.mrf.mxu1 }
0x16a0   :  { %v1744_v19 = vpop.f32.mrf.mxu1 }
0x16a1   :  { %v1745_v20 = vadd.f32 %v1744_v19, %v1691_v17  ;;  %v4460_v17 = vsel %vm229_vm3, %v3297_v16, 0 }
0x16a2   :  { %v3648_v21 = vpop.f32.mrf.mxu1 }
0x16a3   :  { %v4400_v22 = vpack.c.bf16 %v1745_v20, %v1742_v39 }
0x16a5   :  { %1861 = vrot.lane.b32.xlu0 %v4400_v22, %s3961_s17  ;;  %1750 = vrot.lane.b32.xlu1 %v4400_v22, %s3960_s16 }
0x16a9   :  { %1863 = vrot.lane.b32.xlu1 %v4400_v22, %s3959_s15 }
0x1717   :  { %v1751_v23 = vpop.permute.xlu1 %1750  ;;  %v1862_v28 = vpop.permute.xlu0 %1861 }
0x1718   :  { %v1756_v26 = vsel %vm163_vm2, %v1751_v23, 0 }
0x1719   :  { %3650 = vmatpush3.bf16.xpose.msra.mxu1 %v1756_v26 }
0x171a   :  { %3661 = vmatprep.subr.bf16.mxu1 %v3957_v15 }
0x171b   :  { %v1864_v25 = vpop.permute.xlu1 %1863 }
0x171c   :  { %v1869_v27 = vsel %vm163_vm2, %v1864_v25, 0 }
0x1720   :  { %3652 = vmatmul.mubr.msk.bf16.vlgmr.msra.gmra.mxu1 %vm163_vm2, %v4400_v22 }
0x1721   :  { %3662 = vmatpush3.bf16.xpose.msra.mxu1 %v1869_v27  ;;  %3663 = vmatprep.mubr.msk.bf16.mxu1 %vm3958_vm1, %v3957_v15 }
0x1722   :  { %3673 = vmatprep.subr.bf16.mxu1 %v3957_v15 }
0x1728   :  { %3664 = vmatmul.mubr.msk.bf16.vlgmr.msra.gmra.mxu1 %vm163_vm2, %v1862_v28 }
0x1729   :  { %3675 = vmatprep.mubr.msk.bf16.mxu1 %vm3958_vm1, %v3957_v15  ;;  %3674 = vmatpush3.bf16.msra.mxu1 %v4460_v17 }
0x172a   :  { %3685 = vmatprep.subr.bf16.mxu1 %v3957_v15 }
0x17e0   :  { %v1792_v32 = vpop.f32.mrf.mxu1 }
0x17e1   :  { %v1798_v34 = vmul.f32 0.35355338, %v1792_v32 }
0x17e2   :  { %v3653_v35 = vpop.f32.mrf.mxu1 }
0x17e3   :  { %v1799_v40 = vadd.f32 %v4422_v38, %v1798_v34 }
0x17e4   :  { %v1795_v43 = vpop.f32.mrf.mxu1 }
0x17e5   :  { %v1800_v44 = vsel %vm163_vm2, %v1799_v40, -inf }
0x17e6   :  { %1801 = vmax.xlane.f32.xlu1 %v1800_v44  ;;  %v3654_v37 = vpop.f32.mrf.mxu1 }
0x17e8   :  { %v1905_v45 = vpop.f32.mrf.mxu1 }
0x17e9   :  { %v1911_v54 = vmul.f32 0.35355338, %v1905_v45 }
0x17ea   :  { %v3665_v46 = vpop.f32.mrf.mxu1 }
0x17eb   :  { %v1912_v48 = vadd.f32 %v4422_v38, %v1911_v54 }
0x17ec   :  { %v1908_v47 = vpop.f32.mrf.mxu1 }
0x17ed   :  { %v1913_v50 = vsel %vm163_vm2, %v1912_v48, -inf }
0x17ee   :  { %1914 = vmax.xlane.f32.xlu0 %v1913_v50  ;;  %v3666_v51 = vpop.f32.mrf.mxu1 }
0x1804   :  { %1925 = vrot.lane.b32.xlu0 %v4400_v22, %s3965_s23 }
0x186f   :  { %v1802_v52 = vpop.xlane.xlu1 %1801 }
0x1870   :  { %v1803_v53 = vsub.f32 %v1799_v40, %v1802_v52 }
0x1872   :  { %v1804_v0 = vmul.f32 1.442695, %v1803_v53 }
0x1874   :  { %3891 = vpow2.f32 %v1804_v0 }
0x1877   :  { %v1915_v56 = vpop.xlane.xlu0 %1914 }
0x1878   :  { %v1916_v58 = vsub.f32 %v1912_v48, %v1915_v56 }
0x187a   :  { %v1917_v59 = vmul.f32 1.442695, %v1916_v58 }
0x187b   :  { %v1926_v33 = vpop.permute.xlu0 %1925 }
0x187c   :  { %3893 = vpow2.f32 %v1917_v59  ;;  %v1931_v7 = vsel %vm229_vm3, %v1926_v33, 0 }
0x1881   :  { %v3892_v60 = vpop.eup %3891 }
0x1882   :  { %v1806_v57 = vsel %vm163_vm2, %v3892_v60, 0.0 }
0x1883   :  { %1807 = vadd.xlane.f32.xlu1 %v1806_v57 }
0x1889   :  { %v3894_v61 = vpop.eup %3893 }
0x188a   :  { %v1919_v62 = vsel %vm163_vm2, %v3894_v61, 0.0 }
0x188b   :  { %1920 = vadd.xlane.f32.xlu1 %v1919_v62 }
0x189c   :  { %1812 = vrot.lane.b32.xlu1 %v4400_v22, %s3962_s20 }
0x18a0   :  { %2068 = vrot.lane.b32.xlu1 %v4400_v22, %s3963_s21 }
0x18a4   :  { %2066 = vrot.lane.b32.xlu1 %v4400_v22, %s3964_s22 }
0x190c   :  { %v1808_v63 = vpop.xlane.xlu1 %1807 }
0x190d   :  { %3895 = vrcp.f32 %v1808_v63 }
0x1914   :  { %v1921_v1 = vpop.xlane.xlu1 %1920 }
0x1915   :  { %3897 = vrcp.f32 %v1921_v1 }
0x1918   :  { %v1813_v2 = vpop.permute.xlu1 %1812 }
0x1919   :  { %v1818_v36 = vsel %vm229_vm3, %v1813_v2, 0 }
0x191a   :  { %v3896_v42 = vpop.eup %3895  ;;  %3656 = vmatpush3.bf16.msra.mxu0 %v1818_v36 }
0x191b   :  { %3667 = vmatprep.subr.bf16.mxu0 %v3957_v15  ;;  %v1810_v31 = vmul.f32 %v3896_v42, %v3892_v60 }
0x191c   :  { %v2069_v23 = vpop.permute.xlu1 %2068 }
0x191d   :  { %v1811_v4 = vpack.c.bf16 %v1810_v31, %v1810_v31  ;;  %v2074_v28 = vsel %vm163_vm2, %v2069_v23, 0 }
0x191f   :  { %3658 = vmatmul.mubr.msk.bf16.vlgmr.msra.gmra.mxu0 %vm163_vm2, %v1811_v4 }
0x1920   :  { %3668 = vmatpush3.bf16.msra.mxu0 %v1931_v7  ;;  %3669 = vmatprep.mubr.msk.bf16.mxu0 %vm3958_vm1, %v3957_v15  ;;  %v2067_v35 = vpop.permute.xlu1 %2066 }
0x1921   :  { %3679 = vmatprep.subr.bf16.mxu0 %v3957_v15 }
0x1922   :  { %v3898_v8 = vpop.eup %3897 }
0x1923   :  { %v1923_v9 = vmul.f32 %v3898_v8, %v3894_v61  ;;  %v3298_v8 = vld [vmem:[%s4703_s4 + $0x18] sm:$0xf] }
0x1925   :  { %v1924_v10 = vpack.c.bf16 %v1923_v9, %v1923_v9  ;;  %v4500_v9 = vsel %vm229_vm3, %v3298_v8, 0 }
0x1927   :  { %3670 = vmatmul.mubr.msk.bf16.vlgmr.msra.gmra.mxu0 %vm163_vm2, %v1924_v10 }
0x1928   :  { %3681 = vmatprep.mubr.msk.bf16.mxu0 %vm3958_vm1, %v3957_v15  ;;  %3680 = vmatpush3.bf16.msra.mxu0 %v4452_v13 }
0x1929   :  { %3691 = vmatprep.subr.bf16.mxu0 %v3957_v15 }
0x19df   :  { %v1854_v18 = vpop.f32.mrf.mxu0 }
0x19e0   :  { %v1860_v19 = vpack.c.bf16 %v1854_v18, %v1854_v18 }
0x19e1   :  { %v3659_v39 = vpop.f32.mrf.mxu0 }
0x19e2   :  { %3682 = vmatmul.mubr.msk.bf16.vlgmr.msra.gmra.mxu0 %vm163_vm2, %v1860_v19 }
0x19e3   :  { %v1857_v20 = vpop.f32.mrf.mxu0  ;;  %3693 = vmatprep.mubr.msk.bf16.mxu0 %vm3958_vm1, %v3957_v15 }
0x19e5   :  { %v3660_v21 = vpop.f32.mrf.mxu0 }
0x19e7   :  { %v1967_v26 = vpop.f32.mrf.mxu0 }
0x19e8   :  { %v1973_v25 = vpack.c.bf16 %v1967_v26, %v1967_v26 }
0x19e9   :  { %v3671_v27 = vpop.f32.mrf.mxu0 }
0x19ea   :  { %3676 = vmatmul.mubr.msk.bf16.vlgmr.msra.gmra.mxu1 %vm163_vm2, %v1973_v25 }
0x19eb   :  { %3686 = vmatpush3.bf16.xpose.msra.mxu1 %v2074_v28  ;;  %v1970_v32 = vpop.f32.mrf.mxu0  ;;  %3687 = vmatprep.mubr.msk.bf16.mxu1 %vm3958_vm1, %v3957_v15  ;;  %v4510_v28 = vrot.slane %v4400_v22, 4 }
0x19ec   :  { %3697 = vmatprep.subr.bf16.mxu1 %v3957_v15 }
0x19ed   :  { %v3672_v34 = vpop.f32.mrf.mxu0 }
0x19f2   :  { %3688 = vmatmul.mubr.msk.bf16.vlgmr.msra.gmra.mxu1 %vm163_vm2, %v2067_v35 }
0x19f3   :  { %3699 = vmatprep.mubr.msk.bf16.mxu1 %vm3958_vm1, %v3957_v15  ;;  %3698 = vmatpush3.bf16.msra.mxu1 %v4500_v9 }
0x19f4   :  { %3709 = vmatprep.subr.bf16.mxu1 %v3957_v15 }
0x1aa2   :  { %v2060_v40 = vpop.f32.mrf.mxu0 }
0x1aa4   :  { %v3683_v43 = vpop.f32.mrf.mxu0 }
0x1aa6   :  { %v2063_v44 = vpop.f32.mrf.mxu0 }
0x1aa8   :  { %v3684_v37 = vpop.f32.mrf.mxu0 }
0x1aaa   :  { %v2014_v45 = vpop.f32.mrf.mxu1 }
0x1aab   :  { %v4475_v54 = vadd.f32 %v2060_v40, %v2014_v45 }
0x1aac   :  { %v3677_v46 = vpop.f32.mrf.mxu1 }
0x1aae   :  { %v2017_v48 = vpop.f32.mrf.mxu1 }
0x1ab0   :  { %v3678_v47 = vpop.f32.mrf.mxu1 }
0x1ab2   :  { %v2110_v50 = vpop.f32.mrf.mxu1 }
0x1ab3   :  { %v2116_v51 = vmul.f32 0.35355338, %v2110_v50 }
0x1ab4   :  { %v3689_v52 = vpop.f32.mrf.mxu1 }
0x1ab5   :  { %v2117_v53 = vadd.f32 %v4422_v38, %v2116_v51 }
0x1ab6   :  { %v2113_v0 = vpop.f32.mrf.mxu1 }
0x1ab7   :  { %v2118_v56 = vsel %vm163_vm2, %v2117_v53, -inf }
0x1ab8   :  { %2119 = vmax.xlane.f32.xlu1 %v2118_v56  ;;  %v3690_v58 = vpop.f32.mrf.mxu1 }
0x1ac9   :  { %2130 = vrot.lane.b32.xlu1 %v4400_v22, %s3968_s30 }
0x1acd   :  { %2226 = vrot.lane.b32.xlu1 %v4400_v22, %s3967_s29 }
0x1b41   :  { %v2120_v59 = vpop.xlane.xlu1 %2119 }
0x1b42   :  { %v2121_v60 = vsub.f32 %v2117_v53, %v2120_v59  ;;  %v3299_v59 = vld [vmem:[%s4703_s4 + $0x1c] sm:$0xf] }
0x1b44   :  { %v2122_v57 = vmul.f32 1.442695, %v2121_v60  ;;  %v4546_v60 = vsel %vm229_vm3, %v3299_v59, 0 }
0x1b45   :  { %v2131_v61 = vpop.permute.xlu1 %2130 }
0x1b46   :  { %3899 = vpow2.f32 %v2122_v57  ;;  %v2136_v62 = vsel %vm229_vm3, %v2131_v61, 0 }
0x1b47   :  { %3692 = vmatpush3.bf16.msra.mxu0 %v2136_v62 }
0x1b48   :  { %3703 = vmatprep.subr.bf16.mxu0 %v3957_v15 }
0x1b49   :  { %v2227_v7 = vpop.permute.xlu1 %2226 }
0x1b53   :  { %v3900_v63 = vpop.eup %3899 }
0x1b54   :  { %v2124_v1 = vsel %vm163_vm2, %v3900_v63, 0.0 }
0x1b55   :  { %2125 = vadd.xlane.f32.xlu0 %v2124_v1 }
0x1b6b   :  { %2228 = vrot.lane.b32.xlu0 %v4400_v22, %s3966_s28 }
0x1bde   :  { %v2126_v2 = vpop.xlane.xlu0 %2125 }
0x1bdf   :  { %3901 = vrcp.f32 %v2126_v2 }
0x1be2   :  { %v2229_v31 = vpop.permute.xlu0 %2228 }
0x1be3   :  { %v2234_v4 = vsel %vm163_vm2, %v2229_v31, 0 }
0x1bec   :  { %v3902_v36 = vpop.eup %3901 }
0x1bed   :  { %v2128_v42 = vmul.f32 %v3902_v36, %v3900_v63 }
0x1bef   :  { %v2129_v33 = vpack.c.bf16 %v2128_v42, %v2128_v42  ;;  %v4556_v42 = vld [vmem:[%s4700_s1 + $0x1] ss:$0 sm:$0xff] }
0x1bf1   :  { %3694 = vmatmul.mubr.msk.bf16.vlgmr.msra.gmra.mxu0 %vm163_vm2, %v2129_v33 }
0x1bf2   :  { %3704 = vmatpush3.bf16.xpose.msra.mxu0 %v2234_v4  ;;  %3705 = vmatprep.mubr.msk.bf16.mxu0 %vm3958_vm1, %v3957_v15 }
0x1bf3   :  { %3715 = vmatprep.subr.bf16.mxu0 %v3957_v15 }
0x1bf9   :  { %3706 = vmatmul.mubr.msk.bf16.vlgmr.msra.gmra.mxu0 %vm163_vm2, %v2227_v7 }
0x1bfa   :  { %3717 = vmatprep.mubr.msk.bf16.mxu0 %vm3958_vm1, %v3957_v15  ;;  %3716 = vmatpush3.bf16.msra.mxu0 %v4546_v60 }
0x1bfb   :  { %3727 = vmatprep.subr.bf16.mxu0 %v3957_v15 }
0x1cb1   :  { %v2172_v10 = vpop.f32.mrf.mxu0 }
0x1cb2   :  { %v2178_v11 = vpack.c.bf16 %v2172_v10, %v2172_v10 }
0x1cb3   :  { %v3695_v16 = vpop.f32.mrf.mxu0 }
0x1cb4   :  { %3700 = vmatmul.mubr.msk.bf16.vlgmr.msra.gmra.mxu1 %vm163_vm2, %v2178_v11 }
0x1cb5   :  { %v2175_v18 = vpop.f32.mrf.mxu0  ;;  %3711 = vmatprep.mubr.msk.bf16.mxu1 %vm3958_vm1, %v3957_v15 }
0x1cb7   :  { %v3696_v19 = vpop.f32.mrf.mxu0 }
0x1cb9   :  { %v2270_v39 = vpop.f32.mrf.mxu0 }
0x1cba   :  { %v2276_v20 = vmul.f32 0.35355338, %v2270_v39 }
0x1cbb   :  { %v3707_v21 = vpop.f32.mrf.mxu0 }
0x1cbc   :  { %v2277_v23 = vadd.f32 %v4422_v38, %v2276_v20 }
0x1cbd   :  { %v2273_v26 = vpop.f32.mrf.mxu0 }
0x1cbe   :  { %v2278_v25 = vsel %vm163_vm2, %v2277_v23, -inf }
0x1cbf   :  { %2279 = vmax.xlane.f32.xlu1 %v2278_v25  ;;  %v3708_v27 = vpop.f32.mrf.mxu0 }
0x1cd0   :  { %2387 = vrot.lane.b32.xlu1 %v4510_v28, %s3960_s16 }
0x1cd4   :  { %2500 = vrot.lane.b32.xlu1 %v4510_v28, %s3959_s15 }
0x1d48   :  { %v2280_v32 = vpop.xlane.xlu1 %2279 }
0x1d49   :  { %v2281_v34 = vsub.f32 %v2277_v23, %v2280_v32 }
0x1d4b   :  { %v2282_v35 = vmul.f32 1.442695, %v2281_v34 }
0x1d4c   :  { %v2388_v52 = vpop.permute.xlu1 %2387 }
0x1d4d   :  { %3903 = vpow2.f32 %v2282_v35 }
0x1d50   :  { %v2501_v0 = vpop.permute.xlu1 %2500 }
0x1d51   :  { %v2506_v56 = vsel %vm163_vm2, %v2501_v0, 0 }
0x1d5a   :  { %v3904_v40 = vpop.eup %3903 }
0x1d5b   :  { %v2284_v38 = vsel %vm163_vm2, %v3904_v40, 0.0 }
0x1d5c   :  { %2285 = vadd.xlane.f32.xlu0 %v2284_v38 }
0x1d72   :  { %2290 = vrot.lane.b32.xlu0 %v4400_v22, %s3969_s10 }
0x1d74   :  { %v2219_v43 = vpop.f32.mrf.mxu1 }
0x1d75   :  { %v4520_v44 = vadd.f32 %v2219_v43, %v4475_v54  ;;  %v2393_v54 = vsel %vm163_vm2, %v2388_v52, 0 }
0x1d76   :  { %2498 = vrot.lane.b32.xlu0 %v4510_v28, %s3961_s17  ;;  %v3701_v37 = vpop.f32.mrf.mxu1 }
0x1d78   :  { %v2222_v45 = vpop.f32.mrf.mxu1 }
0x1d7a   :  { %v3702_v46 = vpop.f32.mrf.mxu1 }
0x1de5   :  { %v2286_v48 = vpop.xlane.xlu0 %2285 }
0x1de6   :  { %3905 = vrcp.f32 %v2286_v48 }
0x1de9   :  { %v2291_v47 = vpop.permute.xlu0 %2290 }
0x1dea   :  { %v2296_v50 = vsel %vm229_vm3, %v2291_v47, 0 }
0x1deb   :  { %3710 = vmatpush3.bf16.msra.mxu1 %v2296_v50 }
0x1dec   :  { %3721 = vmatprep.subr.bf16.mxu1 %v3957_v15 }
0x1ded   :  { %v2499_v58 = vpop.permute.xlu0 %2498 }
0x1df3   :  { %v3906_v51 = vpop.eup %3905 }
0x1df4   :  { %v2288_v22 = vmul.f32 %v3906_v51, %v3904_v40 }
0x1df6   :  { %v2289_v53 = vpack.c.bf16 %v2288_v22, %v2288_v22 }
0x1df8   :  { %3712 = vmatmul.mubr.msk.bf16.vlgmr.msra.gmra.mxu1 %vm163_vm2, %v2289_v53 }
0x1df9   :  { %3722 = vmatpush3.bf16.xpose.msra.mxu1 %v2393_v54  ;;  %3723 = vmatprep.mubr.msk.bf16.mxu1 %vm3958_vm1, %v3957_v15 }
0x1dfa   :  { %3733 = vmatprep.subr.bf16.mxu1 %v3957_v15 }
0x1e00   :  { %3724 = vmatmul.mubr.msk.bf16.vlgmr.msra.gmra.mxu1 %vm163_vm2, %v4510_v28 }
0x1e01   :  { %3734 = vmatpush3.bf16.xpose.msra.mxu1 %v2506_v56  ;;  %3735 = vmatprep.mubr.msk.bf16.mxu1 %vm3958_vm1, %v3957_v15 }
0x1e02   :  { %3745 = vmatprep.subr.bf16.mxu1 %v3957_v15 }
0x1e08   :  { %3736 = vmatmul.mubr.msk.bf16.vlgmr.msra.gmra.mxu1 %vm163_vm2, %v2499_v58 }
0x1e09   :  { %3746 = vmatpush3.bf16.msra.mxu1 %v4460_v17  ;;  %3747 = vmatprep.mubr.msk.bf16.mxu1 %vm3958_vm1, %v3957_v15 }
0x1e0a   :  { %3757 = vmatprep.subr.bf16.mxu1 %v3957_v15 }
0x1eb8   :  { %v2332_v57 = vpop.f32.mrf.mxu1 }
0x1eb9   :  { %v2338_v61 = vpack.c.bf16 %v2332_v57, %v2332_v57 }
0x1eba   :  { %v3713_v62 = vpop.f32.mrf.mxu1 }
0x1ebb   :  { %3718 = vmatmul.mubr.msk.bf16.vlgmr.msra.gmra.mxu0 %vm163_vm2, %v2338_v61 }
0x1ebc   :  { %v2335_v17 = vpop.f32.mrf.mxu1  ;;  %3729 = vmatprep.mubr.msk.bf16.mxu0 %vm3958_vm1, %v3957_v15 }
0x1ebe   :  { %v3714_v63 = vpop.f32.mrf.mxu1 }
0x1ec0   :  { %v2429_v1 = vpop.f32.mrf.mxu1 }
0x1ec1   :  { %v2435_v2 = vmul.f32 0.35355338, %v2429_v1 }
0x1ec2   :  { %v3725_v36 = vpop.f32.mrf.mxu1 }
0x1ec3   :  { %v2436_v31 = vadd.f32 %v4556_v42, %v2435_v2 }
0x1ec4   :  { %v2432_v33 = vpop.f32.mrf.mxu1 }
0x1ec5   :  { %v2437_v4 = vsel %vm163_vm2, %v2436_v31, -inf }
0x1ec6   :  { %2438 = vmax.xlane.f32.xlu1 %v2437_v4  ;;  %v3726_v7 = vpop.f32.mrf.mxu1 }
0x1ec8   :  { %v2542_v8 = vpop.f32.mrf.mxu1 }
0x1ec9   :  { %v2548_v10 = vmul.f32 0.35355338, %v2542_v8 }
0x1eca   :  { %v3737_v11 = vpop.f32.mrf.mxu1 }
0x1ecb   :  { %v2549_v16 = vadd.f32 %v4556_v42, %v2548_v10 }
0x1ecc   :  { %v2545_v18 = vpop.f32.mrf.mxu1 }
0x1ecd   :  { %v2550_v19 = vsel %vm163_vm2, %v2549_v16, -inf }
0x1ece   :  { %2551 = vmax.xlane.f32.xlu0 %v2550_v19  ;;  %v3738_v39 = vpop.f32.mrf.mxu1 }
0x1f4f   :  { %v2439_v20 = vpop.xlane.xlu1 %2438 }
0x1f50   :  { %v2440_v21 = vsub.f32 %v2436_v31, %v2439_v20 }
0x1f52   :  { %v2441_v23 = vmul.f32 1.442695, %v2440_v21 }
0x1f54   :  { %3907 = vpow2.f32 %v2441_v23 }
0x1f57   :  { %v2552_v26 = vpop.xlane.xlu0 %2551 }
0x1f58   :  { %v2553_v25 = vsub.f32 %v2549_v16, %v2552_v26 }
0x1f5a   :  { %v2554_v27 = vmul.f32 1.442695, %v2553_v25 }
0x1f5c   :  { %3909 = vpow2.f32 %v2554_v27 }
0x1f61   :  { %v3908_v32 = vpop.eup %3907 }
0x1f62   :  { %v2443_v34 = vsel %vm163_vm2, %v3908_v32, 0.0 }
0x1f63   :  { %2444 = vadd.xlane.f32.xlu0 %v2443_v34 }
0x1f69   :  { %v3910_v35 = vpop.eup %3909 }
0x1f6a   :  { %v2556_v40 = vsel %vm163_vm2, %v3910_v35, 0.0 }
0x1f6b   :  { %2557 = vadd.xlane.f32.xlu1 %v2556_v40 }
0x1f79   :  { %2449 = vrot.lane.b32.xlu0 %v4510_v28, %s3962_s20 }
0x1f7b   :  { %v2379_v38 = vpop.f32.mrf.mxu0 }
0x1f7c   :  { %v4567_v43 = vadd.f32 %v2379_v38, %v4520_v44  ;;  %2562 = vrot.lane.b32.xlu1 %v4510_v28, %s3965_s23 }
0x1f7d   :  { %v3719_v37 = vpop.f32.mrf.mxu0  ;;  %2697 = vrot.lane.b32.xlu0 %v4510_v28, %s3964_s22 }
0x1f7f   :  { %v2382_v45 = vpop.f32.mrf.mxu0 }
0x1f80   :  { %2699 = vrot.lane.b32.xlu1 %v4510_v28, %s3963_s21 }
0x1f81   :  { %v3720_v46 = vpop.f32.mrf.mxu0 }
0x1fec   :  { %v2445_v48 = vpop.xlane.xlu0 %2444 }
0x1fed   :  { %3911 = vrcp.f32 %v2445_v48 }
0x1ff0   :  { %v2450_v47 = vpop.permute.xlu0 %2449 }
0x1ff1   :  { %v2455_v50 = vsel %vm229_vm3, %v2450_v47, 0 }
0x1ff2   :  { %3728 = vmatpush3.bf16.msra.mxu0 %v2455_v50 }
0x1ff3   :  { %3739 = vmatprep.subr.bf16.mxu0 %v3957_v15 }
0x1ff4   :  { %v2558_v44 = vpop.xlane.xlu1 %2557  ;;  %v2698_v4 = vpop.permute.xlu0 %2697 }
0x1ff5   :  { %3913 = vrcp.f32 %v2558_v44 }
0x1ff8   :  { %v2563_v52 = vpop.permute.xlu1 %2562 }
0x1ff9   :  { %v2568_v54 = vsel %vm229_vm3, %v2563_v52, 0 }
0x1ffa   :  { %v3912_v51 = vpop.eup %3911 }
0x1ffb   :  { %v2447_v22 = vmul.f32 %v3912_v51, %v3908_v32 }
0x1ffc   :  { %v2700_v63 = vpop.permute.xlu1 %2699 }
0x1ffd   :  { %v2448_v53 = vpack.c.bf16 %v2447_v22, %v2447_v22 }
0x1fff   :  { %3730 = vmatmul.mubr.msk.bf16.vlgmr.msra.gmra.mxu0 %vm163_vm2, %v2448_v53 }
0x2000   :  { %3740 = vmatpush3.bf16.msra.mxu0 %v2568_v54  ;;  %3741 = vmatprep.mubr.msk.bf16.mxu0 %vm3958_vm1, %v3957_v15 }
0x2001   :  { %3751 = vmatprep.subr.bf16.mxu0 %v3957_v15 }
0x2002   :  { %v3914_v0 = vpop.eup %3913 }
0x2003   :  { %v2560_v56 = vmul.f32 %v3914_v0, %v3910_v35 }
0x2005   :  { %v2561_v58 = vpack.c.bf16 %v2560_v56, %v2560_v56 }
0x2007   :  { %3742 = vmatmul.mubr.msk.bf16.vlgmr.msra.gmra.mxu0 %vm163_vm2, %v2561_v58 }
0x2008   :  { %3752 = vmatpush3.bf16.msra.mxu0 %v4452_v13  ;;  %3753 = vmatprep.mubr.msk.bf16.mxu0 %vm3958_vm1, %v3957_v15  ;;  %v2705_v13 = vsel %vm163_vm2, %v2700_v63, 0 }
0x2009   :  { %3763 = vmatprep.subr.bf16.mxu0 %v3957_v15 }
0x20bf   :  { %v2491_v59 = vpop.f32.mrf.mxu0 }
0x20c0   :  { %v2497_v57 = vpack.c.bf16 %v2491_v59, %v2491_v59 }
0x20c1   :  { %v3731_v61 = vpop.f32.mrf.mxu0 }
0x20c2   :  { %3754 = vmatmul.mubr.msk.bf16.vlgmr.msra.gmra.mxu0 %vm163_vm2, %v2497_v57 }
0x20c3   :  { %v2494_v62 = vpop.f32.mrf.mxu0  ;;  %3765 = vmatprep.mubr.msk.bf16.mxu0 %vm3958_vm1, %v3957_v15 }
0x20c5   :  { %v3732_v17 = vpop.f32.mrf.mxu0 }
0x20c7   :  { %v2604_v1 = vpop.f32.mrf.mxu0 }
0x20c8   :  { %v2610_v2 = vpack.c.bf16 %v2604_v1, %v2604_v1 }
0x20c9   :  { %v3743_v36 = vpop.f32.mrf.mxu0 }
0x20ca   :  { %3748 = vmatmul.mubr.msk.bf16.vlgmr.msra.gmra.mxu1 %vm163_vm2, %v2610_v2 }
0x20cb   :  { %3758 = vmatpush3.bf16.xpose.msra.mxu1 %v2705_v13  ;;  %v2607_v31 = vpop.f32.mrf.mxu0  ;;  %3759 = vmatprep.mubr.msk.bf16.mxu1 %vm3958_vm1, %v3957_v15 }
0x20cc   :  { %3769 = vmatprep.subr.bf16.mxu1 %v3957_v15 }
0x20cd   :  { %v3744_v33 = vpop.f32.mrf.mxu0 }
0x20d2   :  { %3760 = vmatmul.mubr.msk.bf16.vlgmr.msra.gmra.mxu1 %vm163_vm2, %v2698_v4 }
0x20d3   :  { %3770 = vmatpush3.bf16.msra.mxu1 %v4500_v9  ;;  %3771 = vmatprep.mubr.msk.bf16.mxu1 %vm3958_vm1, %v3957_v15 }
0x20d4   :  { %3781 = vmatprep.subr.bf16.mxu1 %v3957_v15 }
0x2182   :  { %v2691_v7 = vpop.f32.mrf.mxu0 }
0x2184   :  { %v3755_v8 = vpop.f32.mrf.mxu0 }
0x2186   :  { %v2694_v10 = vpop.f32.mrf.mxu0 }
0x2188   :  { %v3756_v11 = vpop.f32.mrf.mxu0 }
0x218a   :  { %v2648_v16 = vpop.f32.mrf.mxu1 }
0x218b   :  { %v4600_v18 = vadd.f32 %v2691_v7, %v2648_v16 }
0x218c   :  { %v3749_v19 = vpop.f32.mrf.mxu1 }
0x218e   :  { %v2651_v39 = vpop.f32.mrf.mxu1 }
0x2190   :  { %v3750_v20 = vpop.f32.mrf.mxu1 }
0x2192   :  { %v2741_v21 = vpop.f32.mrf.mxu1 }
0x2193   :  { %v2747_v23 = vmul.f32 0.35355338, %v2741_v21 }
0x2194   :  { %v3761_v26 = vpop.f32.mrf.mxu1 }
0x2195   :  { %v2748_v9 = vadd.f32 %v4556_v42, %v2747_v23 }
0x2196   :  { %v2744_v25 = vpop.f32.mrf.mxu1 }
0x2197   :  { %v2749_v27 = vsel %vm163_vm2, %v2748_v9, -inf }
0x2198   :  { %2750 = vmax.xlane.f32.xlu1 %v2749_v27  ;;  %v3762_v32 = vpop.f32.mrf.mxu1 }
0x2199   :  { %v3011_v32 = vadd.f32 %v4567_v43, %v4384_v41 }
0x21a9   :  { %2856 = vrot.lane.b32.xlu1 %v4510_v28, %s3966_s28 }
0x21ad   :  { %2854 = vrot.lane.b32.xlu1 %v4510_v28, %s3967_s29 }
0x2221   :  { %v2751_v34 = vpop.xlane.xlu1 %2750 }
0x2222   :  { %v2752_v35 = vsub.f32 %v2748_v9, %v2751_v34 }
0x2224   :  { %v2753_v40 = vmul.f32 1.442695, %v2752_v35  ;;  %v3016_v35 = vrot.slane %v4396_v14, %v4050_v30 }
0x2225   :  { %v2857_v44 = vpop.permute.xlu1 %2856 }
0x2226   :  { %3915 = vpow2.f32 %v2753_v40  ;;  %v2862_v22 = vsel %vm163_vm2, %v2857_v44, 0 }
0x2229   :  { %v2855_v52 = vpop.permute.xlu1 %2854 }
0x2233   :  { %v3916_v38 = vpop.eup %3915 }
0x2234   :  { %v2755_v37 = vsel %vm163_vm2, %v3916_v38, 0.0 }
0x2235   :  { %2756 = vadd.xlane.f32.xlu0 %v2755_v37 }
0x224b   :  { %2761 = vrot.lane.b32.xlu0 %v4510_v28, %s3968_s30 }
0x22be   :  { %v2757_v45 = vpop.xlane.xlu0 %2756 }
0x22bf   :  { %3917 = vrcp.f32 %v2757_v45 }
0x22c2   :  { %v2762_v46 = vpop.permute.xlu0 %2761 }
0x22c3   :  { %v2767_v48 = vsel %vm229_vm3, %v2762_v46, 0  ;;  %v3017_v46 = vadd.f32 %v3016_v35, %v3011_v32 }
0x22c4   :  { %3764 = vmatpush3.bf16.msra.mxu0 %v2767_v48 }
0x22c5   :  { %3775 = vmatprep.subr.bf16.mxu0 %v3957_v15  ;;  %v3019_v48 = vsel %vm34_vm0, %v3017_v46, 0.0 }
0x22cc   :  { %v3918_v47 = vpop.eup %3917 }
0x22cd   :  { %v2759_v50 = vmul.f32 %v3918_v47, %v3916_v38 }
0x22cf   :  { %v2760_v51 = vpack.c.bf16 %v2759_v50, %v2759_v50 }
0x22d1   :  { %3766 = vmatmul.mubr.msk.bf16.vlgmr.msra.gmra.mxu0 %vm163_vm2, %v2760_v51 }
0x22d2   :  { %3776 = vmatpush3.bf16.xpose.msra.mxu0 %v2862_v22  ;;  %3777 = vmatprep.mubr.msk.bf16.mxu0 %vm3958_vm1, %v3957_v15 }
0x22d3   :  { %3787 = vmatprep.subr.bf16.mxu0 %v3957_v15 }
0x22d9   :  { %3778 = vmatmul.mubr.msk.bf16.vlgmr.msra.gmra.mxu0 %vm163_vm2, %v2855_v52 }
0x22da   :  { %3788 = vmatpush3.bf16.msra.mxu0 %v4546_v60  ;;  %3789 = vmatprep.mubr.msk.bf16.mxu0 %vm3958_vm1, %v3957_v15 }
0x22db   :  { %3801 = vmatprep.subr.bf16.mxu0 %v3957_v15 }
0x2391   :  { %v2803_v53 = vpop.f32.mrf.mxu0 }
0x2392   :  { %v2809_v54 = vpack.c.bf16 %v2803_v53, %v2803_v53  ;;  %v3837_v53 = vld [vmem:[%s4704_s5 + $0x18] sm:$0xff]  }
0x2393   :  { %v3767_v0 = vpop.f32.mrf.mxu0 }
0x2394   :  { %3772 = vmatmul.mubr.msk.bf16.vlgmr.msra.gmra.mxu1 %vm163_vm2, %v2809_v54  ;;  %v3838_v54 = vld [vmem:[%s4704_s5 + $0x10] sm:$0xff]  }
0x2395   :  { %v2806_v56 = vpop.f32.mrf.mxu0  ;;  %3783 = vmatprep.mubr.msk.bf16.mxu1 %vm3958_vm1, %v3957_v15 }
0x2397   :  { %v3768_v58 = vpop.f32.mrf.mxu0 }
0x2399   :  { %v2898_v59 = vpop.f32.mrf.mxu0 }
0x239a   :  { %v2904_v57 = vmul.f32 0.35355338, %v2898_v59 }
0x239b   :  { %v3779_v61 = vpop.f32.mrf.mxu0 }
0x239c   :  { %v2905_v60 = vadd.f32 %v4556_v42, %v2904_v57 }
0x239d   :  { %v2901_v62 = vpop.f32.mrf.mxu0 }
0x239e   :  { %v2906_v17 = vsel %vm163_vm2, %v2905_v60, -inf }
0x239f   :  { %2907 = vmax.xlane.f32.xlu0 %v2906_v17  ;;  %v3780_v63 = vpop.f32.mrf.mxu0 }
0x23a0   :  { %v3054_v63 = vrot.slane %v4396_v14, %v1466_v55  ;;  %v3840_v55 = vld [vmem:[%s4705_s6 + $0x30] sm:$0xff]  }
0x23b5   :  { %2918 = vrot.lane.b32.xlu0 %v4510_v28, %s3969_s10 }
0x2428   :  { %v2908_v1 = vpop.xlane.xlu0 %2907 }
0x2429   :  { %v2909_v2 = vsub.f32 %v2905_v60, %v2908_v1  ;;  %v3048_v60 = vrot.slane %v4396_v14, %v1460_v49  ;;  %v3839_v49 = vld [vmem:[%s4705_s6 + $0x38] sm:$0xff]  }
0x242b   :  { %v2910_v36 = vmul.f32 1.442695, %v2909_v2 }
0x242c   :  { %v2919_v13 = vpop.permute.xlu0 %2918 }
0x242d   :  { %3919 = vpow2.f32 %v2910_v36  ;;  %v2924_v31 = vsel %vm229_vm3, %v2919_v13, 0 }
0x242e   :  { %3782 = vmatpush3.bf16.msra.mxu1 %v2924_v31 }
0x242f   :  { %3793 = vmatprep.subr.bf16.mxu1 %v3957_v15 }
0x243a   :  { %v3920_v33 = vpop.eup %3919 }
0x243b   :  { %v2912_v42 = vsel %vm163_vm2, %v3920_v33, 0.0 }
0x243c   :  { %2913 = vadd.xlane.f32.xlu1 %v2912_v42 }
0x2454   :  { %v2847_v4 = vpop.f32.mrf.mxu1 }
0x2455   :  { %v2853_v7 = vadd.f32 %v2847_v4, %v4600_v18 }
0x2456   :  { %v3773_v8 = vpop.f32.mrf.mxu1 }
0x2457   :  { %v3841_v8 = vld [vmem:[%s4705_s6 + $0x28] sm:$0xff]  }
0x2458   :  { %v2850_v10 = vpop.f32.mrf.mxu1 }
0x2459   :  { %v3842_v10 = vld [vmem:[%s4705_s6 + $0x20] sm:$0xff]  }
0x245a   :  { %v3774_v28 = vpop.f32.mrf.mxu1 }
0x245b   :  { %v3071_v28 = vrot.slane %v4396_v14, %v1477_v6  ;;  %v3149_v6 = vrot.slane %v4396_v14, %v1564_v29 }
0x24c5   :  { %v2914_v11 = vpop.xlane.xlu1 %2913 }
0x24c6   :  { %3921 = vrcp.f32 %v2914_v11 }
0x24d3   :  { %v3922_v16 = vpop.eup %3921 }
0x24d4   :  { %v2916_v19 = vmul.f32 %v3922_v16, %v3920_v33 }
0x24d6   :  { %v2917_v39 = vpack.c.bf16 %v2916_v19, %v2916_v19 }
0x24d8   :  { %3784 = vmatmul.mubr.msk.bf16.vlgmr.msra.gmra.mxu1 %vm163_vm2, %v2917_v39 }
0x24d9   :  { %3797 = vmatprep.mubr.msk.bf16.mxu1 %vm3958_vm1, %v3957_v15  ;;  %3794 = vmatpush3.bf16.msra.mxu1 %v3837_v53  ;;  %v3934_v53 = vld [vmem:[%s4706_s7 + $0x8] sm:$0xff] }
0x24da   :  { %3795 = vmatprep.subr.bf16.mxu1 %v3957_v15 }
0x24dd   :  { %3796 = vmatpush3.bf16.msra.mxu1 %v3838_v54  ;;  %v3240_v54 = vrot.slane %v3934_v53, %v1671_v5 }
0x2598   :  { %v2960_v20 = vpop.f32.mrf.mxu1 }
0x2599   :  { %v2966_v21 = vpack.c.bf16 %v2960_v20, %v2960_v20 }
0x259a   :  { %v3785_v23 = vpop.f32.mrf.mxu1 }
0x259b   :  { %3790 = vmatmul.mubr.msk.bf16.vlgmr.msra.gmra.mxu0 %vm163_vm2, %v2966_v21 }
0x259c   :  { %v2963_v26 = vpop.f32.mrf.mxu1  ;;  %3809 = vmatprep.mubr.msk.bf16.mxu0 %vm3958_vm1, %v3957_v15  ;;  %3802 = vmatpush3.bf16.msra.mxu0 %v3839_v49 }
0x259d   :  { %3803 = vmatprep.subr.bf16.mxu0 %v3957_v15 }
0x259e   :  { %v3786_v18 = vpop.f32.mrf.mxu1 }
0x25a0   :  { %3804 = vmatpush3.bf16.msra.mxu0 %v3840_v55 }
0x25a1   :  { %3805 = vmatprep.subr.bf16.mxu0 %v3957_v15 }
0x25a4   :  { %3806 = vmatpush3.bf16.msra.mxu0 %v3841_v8 }
0x25a5   :  { %3807 = vmatprep.subr.bf16.mxu0 %v3957_v15 }
0x25a8   :  { %3808 = vmatpush3.bf16.msra.mxu0 %v3842_v10 }
0x265b   :  { %v3004_v9 = vpop.f32.mrf.mxu0 }
0x265c   :  { %v3010_v25 = vadd.f32 %v3004_v9, %v2853_v7 }
0x265d   :  { %v3791_v27 = vpop.f32.mrf.mxu0 }
0x265e   :  { %v3012_v34 = vadd.f32 %v3010_v25, %v4386_v12 }
0x265f   :  { %v3007_v40 = vpop.f32.mrf.mxu0 }
0x2660   :  { %v3018_v38 = vadd.f32 %v3016_v35, %v3012_v34 }
0x2661   :  { %v3792_v37 = vpop.f32.mrf.mxu0 }
0x2662   :  { %v3022_v45 = vsel %vm34_vm0, %v3018_v38, 0.0 }
0x2663   :  { %3023 = vadd.xlane.f32.xlu1 %v3022_v45 }
0x2667   :  { %3020 = vadd.xlane.f32.xlu1 %v3019_v48 }
0x26ec   :  { %v3024_v47 = vpop.xlane.xlu1 %3023 }
0x26ed   :  { %v3026_v50 = vmul.f32 0.03125, %v3024_v47 }
0x26ef   :  { %v3028_v44 = vsub.f32 %v3018_v38, %v3026_v50 }
0x26f0   :  { %v3021_v51 = vpop.xlane.xlu1 %3020 }
0x26f1   :  { %v3025_v41 = vmul.f32 0.03125, %v3021_v51  ;;  %v3030_v43 = vmul.f32 %v3028_v44, %v3028_v44 }
0x26f3   :  { %v3027_v12 = vsub.f32 %v3017_v46, %v3025_v41  ;;  %v3034_v22 = vsel %vm34_vm0, %v3030_v43, 0.0 }
0x26f4   :  { %3035 = vadd.xlane.f32.xlu1 %v3034_v22  ;;  %v3235_v22 = vrot.slane %v4396_v14, %v1665_v3 }
0x26f5   :  { %v3029_v30 = vmul.f32 %v3027_v12, %v3027_v12 }
0x26f7   :  { %v3031_v52 = vsel %vm34_vm0, %v3029_v30, 0.0 }
0x26f8   :  { %3032 = vadd.xlane.f32.xlu1 %v3031_v52 }
0x277d   :  { %v3036_v0 = vpop.xlane.xlu1 %3035 }
0x277e   :  { %v3038_v56 = vmul.f32 0.03125, %v3036_v0 }
0x2780   :  { %v3040_v58 = vadd.f32 1e-12, %v3038_v56 }
0x2781   :  { %v3033_v59 = vpop.xlane.xlu1 %3032 }
0x2782   :  { %3923 = vrsqrt.f32 %v3040_v58  ;;  %v3037_v57 = vmul.f32 0.03125, %v3033_v59 }
0x2784   :  { %v3039_v61 = vadd.f32 1e-12, %v3037_v57 }
0x2786   :  { %3925 = vrsqrt.f32 %v3039_v61 }
0x278f   :  { %v3924_v62 = vpop.eup %3923 }
0x2790   :  { %v3044_v17 = vmul.f32 %v3924_v62, %v3028_v44 }
0x2792   :  { %v3050_v1 = vmul.f32 %v3048_v60, %v3044_v17 }
0x2793   :  { %v3926_v2 = vpop.eup %3925 }
0x2794   :  { %v3043_v36 = vmul.f32 %v3926_v2, %v3027_v12  ;;  %v3056_v13 = vadd.f32 %v3054_v63, %v3050_v1 }
0x2796   :  { %v3049_v31 = vmul.f32 %v3048_v60, %v3043_v36  ;;  %v3058_v42 = vrot.slane %v3056_v13, 7 }
0x2798   :  { %v3055_v33 = vadd.f32 %v3054_v63, %v3049_v31 }
0x279a   :  { %v3061_v4 = vsel %vm3060_vm5, %v3055_v33, %v3058_v42 }
0x279b   :  { %v3067_v7 = vpack.c.bf16 %v3061_v4, %v3061_v4 }
0x279d   :  { %3798 = vmatmul.mubr.msk.bf16.vlgmr.msra.gmra.mxu1 %vm34_vm0, %v3067_v7 }
0x285d   :  { %v3121_v11 = vpop.f32.mrf.mxu1 }
0x285e   :  { %v3122_v16 = vadd.f32 %v3121_v11, %v3071_v28 }
0x285f   :  { %v3799_v19 = vpop.f32.mrf.mxu1 }
0x2860   :  { %v3128_v39 = vmul.f32 0.044715, %v3122_v16  ;;  %v3127_v27 = vmul.f32 0.5, %v3122_v16 }
0x2861   :  { %v3124_v20 = vpop.f32.mrf.mxu1 }
0x2862   :  { %v3129_v21 = vmul.f32 %v3128_v39, %v3122_v16 }
0x2863   :  { %v3800_v23 = vpop.f32.mrf.mxu1 }
0x2864   :  { %v3130_v26 = vmul.f32 %v3129_v21, %v3122_v16 }
0x2866   :  { %v3131_v18 = vadd.f32 %v3130_v26, %v3122_v16 }
0x2868   :  { %v3132_v9 = vmul.f32 0.7978846, %v3131_v18 }
0x286a   :  { %3927 = vtanh.f32 %v3132_v9 }
0x2877   :  { %v3928_v25 = vpop.eup %3927 }
0x2878   :  { %v3134_v32 = vadd.f32 1.0, %v3928_v25 }
0x287a   :  { %v3135_v15 = vmul.f32 %v3134_v32, %v3127_v27 }
0x287c   :  { %v3145_v34 = vpack.c.bf16 %v3135_v15, %v3135_v15 }
0x287e   :  { %3810 = vmatmul.mubr.msk.bf16.vlgmr.msra.gmra.mxu0 %vm1590_vm4, %v3145_v34 }
0x293e   :  { %v3211_v35 = vpop.f32.mrf.mxu0 }
0x293f   :  { %v3212_v40 = vadd.f32 %v3211_v35, %v3149_v6 }
0x2940   :  { %v3811_v38 = vpop.f32.mrf.mxu0 }
0x2941   :  { %v3217_v37 = vadd.f32 %v3212_v40, %v3061_v4 }
0x2942   :  { %v3214_v45 = vpop.f32.mrf.mxu0 }
0x2943   :  { %v3219_v46 = vsel %vm3218_vm6, %v3217_v37, 0.0 }
0x2944   :  { %3220 = vadd.xlane.f32.xlu0 %v3219_v46  ;;  %v3812_v48 = vpop.f32.mrf.mxu0 }
0x29cd   :  { %v3221_v47 = vpop.xlane.xlu0 %3220 }
0x29ce   :  { %v3222_v50 = vmul.f32 0.03125, %v3221_v47 }
0x29d0   :  { %v3223_v44 = vsub.f32 %v3217_v37, %v3222_v50 }
0x29d2   :  { %v3224_v51 = vmul.f32 %v3223_v44, %v3223_v44 }
0x29d4   :  { %v3225_v41 = vsel %vm3218_vm6, %v3224_v51, 0.0 }
0x29d5   :  { %3226 = vadd.xlane.f32.xlu1 %v3225_v41 }
0x2a5e   :  { %v3227_v43 = vpop.xlane.xlu1 %3226 }
0x2a5f   :  { %v3228_v12 = vmul.f32 0.03125, %v3227_v43 }
0x2a61   :  { %v3229_v29 = vadd.f32 1e-12, %v3228_v12 }
0x2a63   :  { %3929 = vrsqrt.f32 %v3229_v29 }
0x2a70   :  { %v3930_v30 = vpop.eup %3929 }
0x2a71   :  { %v3231_v52 = vmul.f32 %v3930_v30, %v3223_v44 }
0x2a73   :  { %v3236_v0 = vmul.f32 %v3235_v22, %v3231_v52 }
0x2a75   :  { %v3241_v56 = vadd.f32 %v3240_v54, %v3236_v0 }
0x2a77   :  { %3242 = vst.msk [vmem:[#allocation2] sm:$0x3] %vm3218_vm6, %v3241_v56 }
0x2a78   :  { %3946 = shalt.err (!%p3943_p4)
}
0x2a79   :  { %3252 = dma.vmem_to_hbm [thread:$0]  %s3250_s3, 32, %s4707_s8, [#allocation3]  }
0x2a7a   :  { %3955 = dma.done.wait [#allocation3], 32  }
0x2a7b   :  { %3956 = vsyncadd [#allocation3], 4294967264 }
0x2a7c   :  { %3256 = vsyncpa [#allocation3], 1 }

</bundles_post_ra>
